<compile_context>
chip_gen: v7x
topology: tpu7x:2x2x1
jax: 0.10.0
libtpu: 0.0.40
codegen_flags: <defaults>
</compile_context>

<pallas_src>
import functools

import jax
import jax.numpy as jnp
from jax.experimental import pallas as pl
from jax.experimental.pallas import tpu as pltpu

CONV_INI = 16            # original module: 128
IN_CH = 3
HIDDEN = 1000
HIDDEN_PAD = 1024        # lane-dense padding of the fc1 width (zero-padded, exact)
NUM_CLASSES = 2
NC_PAD = 128             # lane-dense padding of the fc2 width (sliced outside)
CONV_FIN = 4 * CONV_INI
DIM_IMG_FIN = CONV_INI // 8      # spatial size after the 3 max-pools
IMG = CONV_INI                   # input spatial size implied by the module
VMEM_LIMIT = 32 * 1024 * 1024    # fits all tiles below; safe on v5e/v6e/v7x


# ----------------------------- Pallas kernels -------------------------------

def conv1_kernel(x_ref, w_ref, b_ref, o_ref, t_ref, *, half, npairs):
    """conv1: single im2col GEMM + fused bias/ReLU/2x2-maxpool for one image.

    x_ref: (H*W, 9*Cin) bf16 im2col patches; rows ordered [even output rows;
           odd output rows], each parity block row-major over (row, col).
    w_ref: (9*Cin, Cout) bf16; b_ref: (1, Cout) f32.
    o_ref: (Ho*Wo, Cout)  bf16 pooled output, row-major over (Ho, Wo).
    t_ref: (H*W, Cout)    f32 scratch (pre-pool conv activations).
    """
    t_ref[...] = jnp.dot(x_ref[...], w_ref[...],
                         preferred_element_type=jnp.float32)
    # column-pair max inside each parity half (stride-2 sublane loads) ...
    ce = jnp.maximum(t_ref[pl.ds(0, npairs, 2), :],
                     t_ref[pl.ds(1, npairs, 2), :])
    co = jnp.maximum(t_ref[pl.ds(half, npairs, 2), :],
                     t_ref[pl.ds(half + 1, npairs, 2), :])
    # ... row-pair max is elementwise (even vs odd); bias + ReLU folded in.
    o_ref[...] = jnp.maximum(jnp.maximum(ce, co) + b_ref[...],
                             0.0).astype(o_ref.dtype)


def conv_eo_kernel(xe_ref, xo_ref, w_ref, b_ref, o_ref, te_ref, to_ref, *, Wp, M):
    """3x3 same-conv + bias + ReLU + 2x2 max-pool for one image (Cin >= 128-ish).

    xe_ref/xo_ref: ((Ho+2)*Wp, Cin) bf16 even/odd padded-row planes, flattened
                   row-major with width Wp = W + 2.
    w_ref: (9*Cin, Cout) bf16, rows ordered (dy, dx, cin);  b_ref: (1, Cout) f32.
    o_ref: (Ho*(Wo+1), Cout) bf16 pooled output (one junk column per pooled row,
           dropped by the wrapper).
    te_ref/to_ref: (M, Cout) f32 scratch, M = Ho*Wp, conv outputs of the
                   even/odd output rows (2 junk columns per row, never read).
    """
    Cin = xe_ref.shape[-1]

    def wk(dy, dx):
        return w_ref[pl.ds((dy * 3 + dx) * Cin, Cin), :]

    def dy_group(dy, src_ref, base):
        # sum the 3 dx taps of one dy in registers -> one scratch RMW per dy
        acc = jnp.dot(src_ref[pl.ds(base, M), :], wk(dy, 0),
                      preferred_element_type=jnp.float32)
        acc = acc + jnp.dot(src_ref[pl.ds(base + 1, M), :], wk(dy, 1),
                            preferred_element_type=jnp.float32)
        acc = acc + jnp.dot(src_ref[pl.ds(base + 2, M), :], wk(dy, 2),
                            preferred_element_type=jnp.float32)
        return acc

    # even output rows 2i need padded rows 2i (xe), 2i+1 (xo), 2i+2 (xe shifted)
    te_ref[...] = dy_group(0, xe_ref, 0)
    te_ref[...] += dy_group(1, xo_ref, 0)
    te_ref[...] += dy_group(2, xe_ref, Wp)
    # odd output rows 2i+1 need padded rows 2i+1 (xo), 2i+2 (xe+Wp), 2i+3 (xo+Wp)
    to_ref[...] = dy_group(0, xo_ref, 0)
    to_ref[...] += dy_group(1, xe_ref, Wp)
    to_ref[...] += dy_group(2, xo_ref, Wp)

    # fused pooling epilogue: column pairs via stride-2 loads, row pairs via the
    # elementwise even/odd max; bias + ReLU folded into the single output store.
    npairs = M // 2                          # = Ho * (Wo + 1), incl. 1 junk pair/row
    ce = jnp.maximum(te_ref[pl.ds(0, npairs, 2), :],
                     te_ref[pl.ds(1, npairs, 2), :])
    co = jnp.maximum(to_ref[pl.ds(0, npairs, 2), :],
                     to_ref[pl.ds(1, npairs, 2), :])
    o_ref[...] = jnp.maximum(jnp.maximum(ce, co) + b_ref[...],
                             0.0).astype(o_ref.dtype)


def mlp_kernel(x_ref, w1_ref, b1_ref, w2_ref, o_ref, acc_ref):
    """fc1 (tiled over reduction dim k, hidden split over parallel axis j)
    + ReLU + partial fc2; dropout = identity at inference."""
    k = pl.program_id(1)

    @pl.when(k == 0)
    def _init():
        acc_ref[...] = jnp.zeros_like(acc_ref)

    acc_ref[...] += jnp.dot(x_ref[...], w1_ref[...],
                            preferred_element_type=jnp.float32)

    @pl.when(k == pl.num_programs(1) - 1)
    def _finalize():
        h = jnp.maximum(acc_ref[...] + b1_ref[...], 0.0).astype(w2_ref.dtype)
        o_ref[...] = jnp.dot(h, w2_ref[...], preferred_element_type=jnp.float32)


# ------------------------------- wrappers ------------------------------------

def conv1_relu_pool(x_nhwc, wmat, bias):
    """First conv layer (Cin=3): layer-1-only im2col + single-GEMM kernel."""
    N, H, W, Cin = x_nhwc.shape
    Cout = wmat.shape[1]
    Ho, Wo = H // 2, W // 2

    # im2col with (dy, dx, cin) channel ordering (matches the weight rows), and
    # output rows reordered [even rows; odd rows] so the row-pooling in-kernel
    # is a contiguous-half elementwise max.  Tiny tensor (27 channels), XLA-side.
    xp = jnp.pad(x_nhwc, ((0, 0), (1, 1), (1, 1), (0, 0)))
    patches = jnp.concatenate(
        [xp[:, dy:dy + H, dx:dx + W, :] for dy in range(3) for dx in range(3)],
        axis=-1)                                            # (N, H, W, 9*Cin)
    patches = jnp.concatenate([patches[:, 0::2], patches[:, 1::2]], axis=1)
    patches = patches.reshape(N, H * W, 9 * Cin)

    half = Ho * W
    npairs = Ho * Wo
    kernel = functools.partial(conv1_kernel, half=half, npairs=npairs)
    flops = 2 * N * H * W * 9 * Cin * Cout
    bytes_accessed = (patches.size * 2 + wmat.size * 2 + bias.size * 4
                      + N * npairs * Cout * 2)

    out = pl.pallas_call(
        kernel,
        grid=(N,),
        in_specs=[pl.BlockSpec((None, H * W, 9 * Cin), lambda n: (n, 0, 0)),
                  pl.BlockSpec((9 * Cin, Cout), lambda n: (0, 0)),
                  pl.BlockSpec((1, Cout), lambda n: (0, 0))],
        out_specs=pl.BlockSpec((None, npairs, Cout), lambda n: (n, 0, 0)),
        out_shape=jax.ShapeDtypeStruct((N, npairs, Cout), jnp.bfloat16),
        scratch_shapes=[pltpu.VMEM((H * W, Cout), jnp.float32)],
        compiler_params=pltpu.CompilerParams(
            dimension_semantics=("parallel",),
            vmem_limit_bytes=VMEM_LIMIT),
        cost_estimate=pl.CostEstimate(flops=int(flops), transcendentals=0,
                                      bytes_accessed=int(bytes_accessed)),
    )(patches, wmat, bias)
    return out.reshape(N, Ho, Wo, Cout)


def conv_relu_pool(x_nhwc, wmat, bias):
    """conv2/conv3: even/odd-row-plane kernel (no im2col, ~1.1x layout padding)."""
    N, H, W, Cin = x_nhwc.shape
    Cout = wmat.shape[1]
    Ho, Wo = H // 2, W // 2
    Wp = W + 2
    M = Ho * Wp                  # GEMM rows per output-row parity (2 junk cols/row)
    Le = (Ho + 2) * Wp           # flat rows of each even/odd padded-row plane

    # single pad (1 top, 3 bottom, 1 left/right) then split padded rows by parity
    xp = jnp.pad(x_nhwc, ((0, 0), (1, 3), (1, 1), (0, 0)))   # (N, H+4, Wp, Cin)
    xe = xp[:, 0::2].reshape(N, Le, Cin)
    xo = xp[:, 1::2].reshape(N, Le, Cin)

    kernel = functools.partial(conv_eo_kernel, Wp=Wp, M=M)
    flops = 2 * N * (2 * M) * 9 * Cin * Cout
    bytes_accessed = (2 * xe.size * 2 + wmat.size * 2 + bias.size * 4
                      + N * Ho * (Wo + 1) * Cout * 2)

    out = pl.pallas_call(
        kernel,
        grid=(N,),
        in_specs=[pl.BlockSpec((None, Le, Cin), lambda n: (n, 0, 0)),
                  pl.BlockSpec((None, Le, Cin), lambda n: (n, 0, 0)),
                  pl.BlockSpec((9 * Cin, Cout), lambda n: (0, 0)),
                  pl.BlockSpec((1, Cout), lambda n: (0, 0))],
        out_specs=pl.BlockSpec((None, Ho * (Wo + 1), Cout), lambda n: (n, 0, 0)),
        out_shape=jax.ShapeDtypeStruct((N, Ho * (Wo + 1), Cout), jnp.bfloat16),
        scratch_shapes=[pltpu.VMEM((M, Cout), jnp.float32),
                        pltpu.VMEM((M, Cout), jnp.float32)],
        compiler_params=pltpu.CompilerParams(
            dimension_semantics=("parallel",),
            vmem_limit_bytes=VMEM_LIMIT),
        cost_estimate=pl.CostEstimate(flops=int(flops), transcendentals=0,
                                      bytes_accessed=int(bytes_accessed)),
    )(xe, xo, wmat, bias)
    # drop the one junk pooled column produced by the flattened-row layout
    return out.reshape(N, Ho, Wo + 1, Cout)[:, :, :Wo, :]


def mlp(x, w1, b1, w2, b2):
    """fc1 -> ReLU -> fc2.  Grid = (hidden-half [parallel], fc1-reduction [arbitrary])."""
    B, F = x.shape
    Hd = w1.shape[1]             # HIDDEN_PAD
    Hh = Hd // 2                 # per-core hidden half (lane-dense 512)
    NCp = w2.shape[1]            # NC_PAD

    # Large reduction tiles: fc1 is pure w1 streaming, so use few, big grid steps
    # (block <= 8 MB bf16, double-buffered 16 MB -> fits the 32 MB budget).
    tk = F
    for cand in (8192, 4096, 2048, 1024, 512, 256, 128):
        if F % cand == 0:
            tk = cand
            break

    flops = 2 * B * F * Hd + 2 * B * Hd * NCp
    bytes_accessed = (2 * x.size * 2 + w1.size * 2 + w2.size * 2
                      + b1.size * 4 + 2 * B * NCp * 4)

    partial = pl.pallas_call(
        mlp_kernel,
        grid=(2, F // tk),
        in_specs=[pl.BlockSpec((B, tk), lambda j, k: (0, k)),
                  pl.BlockSpec((tk, Hh), lambda j, k: (k, j)),
                  pl.BlockSpec((1, Hh), lambda j, k: (0, j)),
                  pl.BlockSpec((Hh, NCp), lambda j, k: (j, 0))],
        out_specs=pl.BlockSpec((None, B, NCp), lambda j, k: (j, 0, 0)),
        out_shape=jax.ShapeDtypeStruct((2, B, NCp), jnp.float32),
        scratch_shapes=[pltpu.VMEM((B, Hh), jnp.float32)],
        compiler_params=pltpu.CompilerParams(
            dimension_semantics=("parallel", "arbitrary"),
            vmem_limit_bytes=VMEM_LIMIT),
        cost_estimate=pl.CostEstimate(flops=int(flops), transcendentals=0,
                                      bytes_accessed=int(bytes_accessed)),
    )(x, w1, b1, w2)
    # sum the two hidden-half partial logits and add the fc2 bias in XLA
    return partial[0] + partial[1] + b2


def net_forward(x_nchw, kp):
    x = jnp.transpose(x_nchw, (0, 2, 3, 1)).astype(jnp.bfloat16)   # NCHW -> NHWC
    x = conv1_relu_pool(x, kp["wc1"], kp["bc1"])
    x = conv_relu_pool(x, kp["wc2"], kp["bc2"])
    x = conv_relu_pool(x, kp["wc3"], kp["bc3"])
    x = x.reshape(x.shape[0], -1)        # NHWC flatten; fc1 rows pre-permuted to match
    # nn.Dropout(0.25) is identity at inference time -> no-op.
    logits = mlp(x, kp["wf1"], kp["bf1"], kp["wf2"], kp["bf2"])
    return logits[:, :NUM_CLASSES]       # strip the lane padding of fc2


# ----------------------- parameters (PyTorch layout) --------------------------

def init_params(key):
    """Parameters in PyTorch layout (OIHW conv weights, fc weights as (in, out))."""
    ks = jax.random.split(key, 10)

    def uni(k, shape, fan_in):
        bound = 1.0 / jnp.sqrt(float(fan_in))
        return jax.random.uniform(k, shape, jnp.float32, -bound, bound)

    C = CONV_INI
    F = CONV_FIN * DIM_IMG_FIN * DIM_IMG_FIN
    return {
        "w_conv1": uni(ks[0], (C, IN_CH, 3, 3), IN_CH * 9),
        "b_conv1": uni(ks[1], (C,), IN_CH * 9),
        "w_conv2": uni(ks[2], (2 * C, C, 3, 3), C * 9),
        "b_conv2": uni(ks[3], (2 * C,), C * 9),
        "w_conv3": uni(ks[4], (4 * C, 2 * C, 3, 3), 2 * C * 9),
        "b_conv3": uni(ks[5], (4 * C,), 2 * C * 9),
        "w_fc1": uni(ks[6], (F, HIDDEN), F),     # applied as x @ w (== fc1.weight.T)
        "b_fc1": uni(ks[7], (HIDDEN,), F),
        "w_fc2": uni(ks[8], (HIDDEN, NUM_CLASSES), HIDDEN),
        "b_fc2": uni(ks[9], (NUM_CLASSES,), HIDDEN),
    }


def prepare_params(p):
    """One-time layout/dtype plumbing: PyTorch-layout params -> kernel params."""
    bf = jnp.bfloat16

    def conv_w(w):   # (Cout, Cin, 3, 3) -> (9*Cin, Cout), rows ordered (dy, dx, cin)
        cout, cin = w.shape[0], w.shape[1]
        return jnp.transpose(w, (2, 3, 1, 0)).reshape(9 * cin, cout).astype(bf)

    C3, S = CONV_FIN, DIM_IMG_FIN
    F = C3 * S * S
    # fc1 rows are stored for the PyTorch NCHW flatten (c, h, w); permute them to
    # the kernel's NHWC flatten (h, w, c) so no runtime transpose is needed.
    w1 = jnp.transpose(p["w_fc1"].reshape(C3, S, S, HIDDEN), (1, 2, 0, 3))
    w1 = w1.reshape(F, HIDDEN)
    w1 = jnp.pad(w1, ((0, 0), (0, HIDDEN_PAD - HIDDEN))).astype(bf)
    b1 = jnp.pad(p["b_fc1"], (0, HIDDEN_PAD - HIDDEN)).reshape(1, HIDDEN_PAD)
    w2 = jnp.pad(p["w_fc2"], ((0, HIDDEN_PAD - HIDDEN),
                              (0, NC_PAD - NUM_CLASSES))).astype(bf)
    b2 = jnp.pad(p["b_fc2"], (0, NC_PAD - NUM_CLASSES)).reshape(1, NC_PAD)
    return {
        "wc1": conv_w(p["w_conv1"]), "bc1": p["b_conv1"].reshape(1, -1),
        "wc2": conv_w(p["w_conv2"]), "bc2": p["b_conv2"].reshape(1, -1),
        "wc3": conv_w(p["w_conv3"]), "bc3": p["b_conv3"].reshape(1, -1),
        "wf1": w1, "bf1": b1, "wf2": w2, "bf2": b2,
    }


# ------------------------------ reference (XLA) -------------------------------

def net_forward_ref(x_nchw, p):
    """Pure-XLA reference with the same bf16-operand / f32-accumulate precision."""
    bf = jnp.bfloat16

    def conv(x, w, b):
        y = jax.lax.conv_general_dilated(
            x.astype(bf), w.astype(bf), window_strides=(1, 1),
            padding=((1, 1), (1, 1)),
            dimension_numbers=("NCHW", "OIHW", "NCHW"),
            preferred_element_type=jnp.float32)
        return y + b[None, :, None, None]

    def pool(x):
        return jax.lax.reduce_window(x, -jnp.inf, jax.lax.max,
                                     (1, 1, 2, 2), (1, 1, 2, 2), "VALID")

    x = pool(jnp.maximum(conv(x_nchw, p["w_conv1"], p["b_conv1"]), 0.0))
    x = pool(jnp.maximum(conv(x, p["w_conv2"], p["b_conv2"]), 0.0))
    x = pool(jnp.maximum(conv(x, p["w_conv3"], p["b_conv3"]), 0.0))
    x = x.reshape(x.shape[0], -1).astype(bf)               # NCHW flatten
    h = jnp.maximum(
        jnp.dot(x, p["w_fc1"].astype(bf), preferred_element_type=jnp.float32)
        + p["b_fc1"], 0.0)
    return (jnp.dot(h.astype(bf), p["w_fc2"].astype(bf),
                    preferred_element_type=jnp.float32) + p["b_fc2"])


if __name__ == "__main__":
    key = jax.random.PRNGKey(0)
    pkey, xkey = jax.random.split(key)
    torch_params = init_params(pkey)                 # PyTorch-layout f32 params
    kernel_params = prepare_params(torch_params)     # kernel-ready (bf16, permuted, padded)
    x = jax.random.normal(xkey, (2, IN_CH, IMG, IMG), jnp.float32)   # NCHW like PyTorch

    out = jax.block_until_ready(jax.jit(net_forward)(x, kernel_params))
    assert out.shape == (2, NUM_CLASSES), out.shape

    ref = jax.block_until_ready(net_forward_ref(x, torch_params))
    max_err = float(jnp.max(jnp.abs(out - ref)))
    assert max_err < 1e-2, f"mismatch vs reference: {max_err}"

    print("KERNEL_OK")
</pallas_src>

<mosaic_0001>
module attributes {stable_mosaic.version = 11 : i64} {
  func.func @conv1_kernel(%arg0: i32, %arg1: memref<1x256x27xbf16, #tpu.memory_space<vmem>>, %arg2: memref<27x16xbf16, #tpu.memory_space<vmem>>, %arg3: memref<1x16xf32, #tpu.memory_space<vmem>>, %arg4: memref<1x64x16xbf16, #tpu.memory_space<vmem>>, %arg5: memref<256x16xf32, #tpu.memory_space<vmem>>) attributes {dimension_semantics = [#tpu.dimension_semantics<parallel>], iteration_bounds = array<i64: 2>, scalar_prefetch = 0 : i64, scratch_operands = 1 : i64, tpu.core_type = #tpu.core_type<tc>, window_params = [{transform_indices = @transform_0, window_bounds = array<i64: 1, 256, 27>}, {pipeline_mode = #tpu.pipeline_mode<synchronous>, transform_indices = @transform_1, window_bounds = array<i64: 27, 16>}, {pipeline_mode = #tpu.pipeline_mode<synchronous>, transform_indices = @transform_2, window_bounds = array<i64: 1, 16>}, {transform_indices = @transform_3, window_bounds = array<i64: 1, 64, 16>}]} {
    %c0 = arith.constant 0 : index
    %c0_0 = arith.constant 0 : index
    %c0_1 = arith.constant 0 : index
    %0 = vector.load %arg1[%c0, %c0_0, %c0_1] : memref<1x256x27xbf16, #tpu.memory_space<vmem>>, vector<1x256x27xbf16>
    %1 = vector.shape_cast %0 : vector<1x256x27xbf16> to vector<256x27xbf16>
    %c0_2 = arith.constant 0 : index
    %c0_3 = arith.constant 0 : index
    %2 = vector.load %arg2[%c0_2, %c0_3] : memref<27x16xbf16, #tpu.memory_space<vmem>>, vector<27x16xbf16>
    %cst = arith.constant dense<0.000000e+00> : vector<256x16xf32>
    %3 = tpu.matmul %1, %2, %cst {dimension_numbers = #tpu.dot_dimension_numbers<[1], [0], [0], [1], [0, 0, 1, 1], [], []>} : vector<256x27xbf16>, vector<27x16xbf16>, vector<256x16xf32> -> vector<256x16xf32>
    %c0_4 = arith.constant 0 : index
    %c0_5 = arith.constant 0 : index
    %4 = vector.load %arg5[%c0_4, %c0_5] : memref<256x16xf32, #tpu.memory_space<vmem>>, vector<256x16xf32>
    tpu.vector_store %arg5[%c0_4, %c0_5], %3 {strides = array<i32>} : memref<256x16xf32, #tpu.memory_space<vmem>>, vector<256x16xf32>,
    %c0_6 = arith.constant 0 : index
    %c0_7 = arith.constant 0 : index
    %5 = tpu.strided_load %arg5[%c0_6, %c0_7] {strides = array<i32: 2, 1>} : memref<256x16xf32, #tpu.memory_space<vmem>>, vector<64x16xf32>
    %c1 = arith.constant 1 : index
    %c0_8 = arith.constant 0 : index
    %6 = tpu.strided_load %arg5[%c1, %c0_8] {strides = array<i32: 2, 1>} : memref<256x16xf32, #tpu.memory_space<vmem>>, vector<64x16xf32>
    %7 = arith.maximumf %5, %6 : vector<64x16xf32>
    %c128 = arith.constant 128 : index
    %c0_9 = arith.constant 0 : index
    %8 = tpu.strided_load %arg5[%c128, %c0_9] {strides = array<i32: 2, 1>} : memref<256x16xf32, #tpu.memory_space<vmem>>, vector<64x16xf32>
    %c129 = arith.constant 129 : index
    %c0_10 = arith.constant 0 : index
    %9 = tpu.strided_load %arg5[%c129, %c0_10] {strides = array<i32: 2, 1>} : memref<256x16xf32, #tpu.memory_space<vmem>>, vector<64x16xf32>
    %10 = arith.maximumf %8, %9 : vector<64x16xf32>
    %11 = arith.maximumf %7, %10 : vector<64x16xf32>
    %c0_11 = arith.constant 0 : index
    %c0_12 = arith.constant 0 : index
    %12 = vector.load %arg3[%c0_11, %c0_12] : memref<1x16xf32, #tpu.memory_space<vmem>>, vector<1x16xf32>
    %13 = vector.broadcast %12 : vector<1x16xf32> to vector<64x16xf32>
    %14 = arith.addf %11, %13 : vector<64x16xf32>
    %cst_13 = arith.constant 0.000000e+00 : f32
    %15 = vector.broadcast %cst_13 : f32 to vector<64x16xf32>
    %16 = arith.maximumf %14, %15 : vector<64x16xf32>
    %17 = arith.truncf %16 : vector<64x16xf32> to vector<64x16xbf16>
    %c0_14 = arith.constant 0 : index
    %c0_15 = arith.constant 0 : index
    %c0_16 = arith.constant 0 : index
    %18 = vector.load %arg4[%c0_14, %c0_15, %c0_16] : memref<1x64x16xbf16, #tpu.memory_space<vmem>>, vector<1x64x16xbf16>
    %19 = vector.shape_cast %18 : vector<1x64x16xbf16> to vector<64x16xbf16>
    %20 = vector.shape_cast %17 : vector<64x16xbf16> to vector<1x64x16xbf16>
    tpu.vector_store %arg4[%c0_14, %c0_15, %c0_16], %20 {strides = array<i32>} : memref<1x64x16xbf16, #tpu.memory_space<vmem>>, vector<1x64x16xbf16>,
    return
  }
  func.func @transform_0(%arg0: i32) -> (i32, i32, i32) {
    %c0_i32 = arith.constant 0 : i32
    %c0_i32_0 = arith.constant 0 : i32
    %c0_i32_1 = arith.constant 0 : i32
    return %arg0, %c0_i32, %c0_i32_0 : i32, i32, i32
  }
  func.func @transform_1(%arg0: i32) -> (i32, i32) {
    %c0_i32 = arith.constant 0 : i32
    %c0_i32_0 = arith.constant 0 : i32
    %c0_i32_1 = arith.constant 0 : i32
    return %c0_i32, %c0_i32_0 : i32, i32
  }
  func.func @transform_2(%arg0: i32) -> (i32, i32) {
    %c0_i32 = arith.constant 0 : i32
    %c0_i32_0 = arith.constant 0 : i32
    %c0_i32_1 = arith.constant 0 : i32
    return %c0_i32, %c0_i32_0 : i32, i32
  }
  func.func @transform_3(%arg0: i32) -> (i32, i32, i32) {
    %c0_i32 = arith.constant 0 : i32
    %c0_i32_0 = arith.constant 0 : i32
    %c0_i32_1 = arith.constant 0 : i32
    return %arg0, %c0_i32, %c0_i32_0 : i32, i32, i32
  }
}

module attributes {stable_mosaic.version = 11 : i64} {
  func.func @conv_eo_kernel(%arg0: i32, %arg1: memref<1x60x16xbf16, #tpu.memory_space<vmem>>, %arg2: memref<1x60x16xbf16, #tpu.memory_space<vmem>>, %arg3: memref<144x32xbf16, #tpu.memory_space<vmem>>, %arg4: memref<1x32xf32, #tpu.memory_space<vmem>>, %arg5: memref<1x20x32xbf16, #tpu.memory_space<vmem>>, %arg6: memref<40x32xf32, #tpu.memory_space<vmem>>, %arg7: memref<40x32xf32, #tpu.memory_space<vmem>>) attributes {dimension_semantics = [#tpu.dimension_semantics<parallel>], iteration_bounds = array<i64: 2>, scalar_prefetch = 0 : i64, scratch_operands = 2 : i64, tpu.core_type = #tpu.core_type<tc>, window_params = [{transform_indices = @transform_0, window_bounds = array<i64: 1, 60, 16>}, {transform_indices = @transform_1, window_bounds = array<i64: 1, 60, 16>}, {pipeline_mode = #tpu.pipeline_mode<synchronous>, transform_indices = @transform_2, window_bounds = array<i64: 144, 32>}, {pipeline_mode = #tpu.pipeline_mode<synchronous>, transform_indices = @transform_3, window_bounds = array<i64: 1, 32>}, {transform_indices = @transform_4, window_bounds = array<i64: 1, 20, 32>}]} {
    %c0 = arith.constant 0 : index
    %c0_0 = arith.constant 0 : index
    %c0_1 = arith.constant 0 : index
    %0 = vector.load %arg1[%c0, %c0_0, %c0_1] : memref<1x60x16xbf16, #tpu.memory_space<vmem>>, vector<1x40x16xbf16>
    %1 = vector.shape_cast %0 : vector<1x40x16xbf16> to vector<40x16xbf16>
    %c0_2 = arith.constant 0 : index
    %c0_3 = arith.constant 0 : index
    %2 = vector.load %arg3[%c0_2, %c0_3] : memref<144x32xbf16, #tpu.memory_space<vmem>>, vector<16x32xbf16>
    %cst = arith.constant dense<0.000000e+00> : vector<40x32xf32>
    %3 = tpu.matmul %1, %2, %cst {dimension_numbers = #tpu.dot_dimension_numbers<[1], [0], [0], [1], [0, 0, 1, 1], [], []>} : vector<40x16xbf16>, vector<16x32xbf16>, vector<40x32xf32> -> vector<40x32xf32>
    %c0_4 = arith.constant 0 : index
    %c1 = arith.constant 1 : index
    %c0_5 = arith.constant 0 : index
    %4 = vector.load %arg1[%c0_4, %c1, %c0_5] : memref<1x60x16xbf16, #tpu.memory_space<vmem>>, vector<1x40x16xbf16>
    %5 = vector.shape_cast %4 : vector<1x40x16xbf16> to vector<40x16xbf16>
    %c16 = arith.constant 16 : index
    %c0_6 = arith.constant 0 : index
    %6 = vector.load %arg3[%c16, %c0_6] : memref<144x32xbf16, #tpu.memory_space<vmem>>, vector<16x32xbf16>
    %cst_7 = arith.constant dense<0.000000e+00> : vector<40x32xf32>
    %7 = tpu.matmul %5, %6, %cst_7 {dimension_numbers = #tpu.dot_dimension_numbers<[1], [0], [0], [1], [0, 0, 1, 1], [], []>} : vector<40x16xbf16>, vector<16x32xbf16>, vector<40x32xf32> -> vector<40x32xf32>
    %8 = arith.addf %3, %7 : vector<40x32xf32>
    %c0_8 = arith.constant 0 : index
    %c2 = arith.constant 2 : index
    %c0_9 = arith.constant 0 : index
    %9 = vector.load %arg1[%c0_8, %c2, %c0_9] : memref<1x60x16xbf16, #tpu.memory_space<vmem>>, vector<1x40x16xbf16>
    %10 = vector.shape_cast %9 : vector<1x40x16xbf16> to vector<40x16xbf16>
    %c32 = arith.constant 32 : index
    %c0_10 = arith.constant 0 : index
    %11 = vector.load %arg3[%c32, %c0_10] : memref<144x32xbf16, #tpu.memory_space<vmem>>, vector<16x32xbf16>
    %cst_11 = arith.constant dense<0.000000e+00> : vector<40x32xf32>
    %12 = tpu.matmul %10, %11, %cst_11 {dimension_numbers = #tpu.dot_dimension_numbers<[1], [0], [0], [1], [0, 0, 1, 1], [], []>} : vector<40x16xbf16>, vector<16x32xbf16>, vector<40x32xf32> -> vector<40x32xf32>
    %13 = arith.addf %8, %12 : vector<40x32xf32>
    %c0_12 = arith.constant 0 : index
    %c0_13 = arith.constant 0 : index
    %14 = vector.load %arg6[%c0_12, %c0_13] : memref<40x32xf32, #tpu.memory_space<vmem>>, vector<40x32xf32>
    tpu.vector_store %arg6[%c0_12, %c0_13], %13 {strides = array<i32>} : memref<40x32xf32, #tpu.memory_space<vmem>>, vector<40x32xf32>,
    %c0_14 = arith.constant 0 : index
    %c0_15 = arith.constant 0 : index
    %15 = vector.load %arg6[%c0_14, %c0_15] : memref<40x32xf32, #tpu.memory_space<vmem>>, vector<40x32xf32>
    %c0_16 = arith.constant 0 : index
    %c0_17 = arith.constant 0 : index
    %c0_18 = arith.constant 0 : index
    %16 = vector.load %arg2[%c0_16, %c0_17, %c0_18] : memref<1x60x16xbf16, #tpu.memory_space<vmem>>, vector<1x40x16xbf16>
    %17 = vector.shape_cast %16 : vector<1x40x16xbf16> to vector<40x16xbf16>
    %c48 = arith.constant 48 : index
    %c0_19 = arith.constant 0 : index
    %18 = vector.load %arg3[%c48, %c0_19] : memref<144x32xbf16, #tpu.memory_space<vmem>>, vector<16x32xbf16>
    %cst_20 = arith.constant dense<0.000000e+00> : vector<40x32xf32>
    %19 = tpu.matmul %17, %18, %cst_20 {dimension_numbers = #tpu.dot_dimension_numbers<[1], [0], [0], [1], [0, 0, 1, 1], [], []>} : vector<40x16xbf16>, vector<16x32xbf16>, vector<40x32xf32> -> vector<40x32xf32>
    %c0_21 = arith.constant 0 : index
    %c1_22 = arith.constant 1 : index
    %c0_23 = arith.constant 0 : index
    %20 = vector.load %arg2[%c0_21, %c1_22, %c0_23] : memref<1x60x16xbf16, #tpu.memory_space<vmem>>, vector<1x40x16xbf16>
    %21 = vector.shape_cast %20 : vector<1x40x16xbf16> to vector<40x16xbf16>
    %c64 = arith.constant 64 : index
    %c0_24 = arith.constant 0 : index
    %22 = vector.load %arg3[%c64, %c0_24] : memref<144x32xbf16, #tpu.memory_space<vmem>>, vector<16x32xbf16>
    %cst_25 = arith.constant dense<0.000000e+00> : vector<40x32xf32>
    %23 = tpu.matmul %21, %22, %cst_25 {dimension_numbers = #tpu.dot_dimension_numbers<[1], [0], [0], [1], [0, 0, 1, 1], [], []>} : vector<40x16xbf16>, vector<16x32xbf16>, vector<40x32xf32> -> vector<40x32xf32>
    %24 = arith.addf %19, %23 : vector<40x32xf32>
    %c0_26 = arith.constant 0 : index
    %c2_27 = arith.constant 2 : index
    %c0_28 = arith.constant 0 : index
    %25 = vector.load %arg2[%c0_26, %c2_27, %c0_28] : memref<1x60x16xbf16, #tpu.memory_space<vmem>>, vector<1x40x16xbf16>
    %26 = vector.shape_cast %25 : vector<1x40x16xbf16> to vector<40x16xbf16>
    %c80 = arith.constant 80 : index
    %c0_29 = arith.constant 0 : index
    %27 = vector.load %arg3[%c80, %c0_29] : memref<144x32xbf16, #tpu.memory_space<vmem>>, vector<16x32xbf16>
    %cst_30 = arith.constant dense<0.000000e+00> : vector<40x32xf32>
    %28 = tpu.matmul %26, %27, %cst_30 {dimension_numbers = #tpu.dot_dimension_numbers<[1], [0], [0], [1], [0, 0, 1, 1], [], []>} : vector<40x16xbf16>, vector<16x32xbf16>, vector<40x32xf32> -> vector<40x32xf32>
    %29 = arith.addf %24, %28 : vector<40x32xf32>
    %30 = arith.addf %15, %29 : vector<40x32xf32>
    %c0_31 = arith.constant 0 : index
    %c0_32 = arith.constant 0 : index
    %31 = vector.load %arg6[%c0_31, %c0_32] : memref<40x32xf32, #tpu.memory_space<vmem>>, vector<40x32xf32>
    tpu.vector_store %arg6[%c0_31, %c0_32], %30 {strides = array<i32>} : memref<40x32xf32, #tpu.memory_space<vmem>>, vector<40x32xf32>,
    %c0_33 = arith.constant 0 : index
    %c0_34 = arith.constant 0 : index
    %32 = vector.load %arg6[%c0_33, %c0_34] : memref<40x32xf32, #tpu.memory_space<vmem>>, vector<40x32xf32>
    %c0_35 = arith.constant 0 : index
    %c10 = arith.constant 10 : index
    %c0_36 = arith.constant 0 : index
    %33 = vector.load %arg1[%c0_35, %c10, %c0_36] : memref<1x60x16xbf16, #tpu.memory_space<vmem>>, vector<1x40x16xbf16>
    %34 = vector.shape_cast %33 : vector<1x40x16xbf16> to vector<40x16xbf16>
    %c96 = arith.constant 96 : index
    %c0_37 = arith.constant 0 : index
    %35 = vector.load %arg3[%c96, %c0_37] : memref<144x32xbf16, #tpu.memory_space<vmem>>, vector<16x32xbf16>
    %cst_38 = arith.constant dense<0.000000e+00> : vector<40x32xf32>
    %36 = tpu.matmul %34, %35, %cst_38 {dimension_numbers = #tpu.dot_dimension_numbers<[1], [0], [0], [1], [0, 0, 1, 1], [], []>} : vector<40x16xbf16>, vector<16x32xbf16>, vector<40x32xf32> -> vector<40x32xf32>
    %c0_39 = arith.constant 0 : index
    %c11 = arith.constant 11 : index
    %c0_40 = arith.constant 0 : index
    %37 = vector.load %arg1[%c0_39, %c11, %c0_40] : memref<1x60x16xbf16, #tpu.memory_space<vmem>>, vector<1x40x16xbf16>
    %38 = vector.shape_cast %37 : vector<1x40x16xbf16> to vector<40x16xbf16>
    %c112 = arith.constant 112 : index
    %c0_41 = arith.constant 0 : index
    %39 = vector.load %arg3[%c112, %c0_41] : memref<144x32xbf16, #tpu.memory_space<vmem>>, vector<16x32xbf16>
    %cst_42 = arith.constant dense<0.000000e+00> : vector<40x32xf32>
    %40 = tpu.matmul %38, %39, %cst_42 {dimension_numbers = #tpu.dot_dimension_numbers<[1], [0], [0], [1], [0, 0, 1, 1], [], []>} : vector<40x16xbf16>, vector<16x32xbf16>, vector<40x32xf32> -> vector<40x32xf32>
    %41 = arith.addf %36, %40 : vector<40x32xf32>
    %c0_43 = arith.constant 0 : index
    %c12 = arith.constant 12 : index
    %c0_44 = arith.constant 0 : index
    %42 = vector.load %arg1[%c0_43, %c12, %c0_44] : memref<1x60x16xbf16, #tpu.memory_space<vmem>>, vector<1x40x16xbf16>
    %43 = vector.shape_cast %42 : vector<1x40x16xbf16> to vector<40x16xbf16>
    %c128 = arith.constant 128 : index
    %c0_45 = arith.constant 0 : index
    %44 = vector.load %arg3[%c128, %c0_45] : memref<144x32xbf16, #tpu.memory_space<vmem>>, vector<16x32xbf16>
    %cst_46 = arith.constant dense<0.000000e+00> : vector<40x32xf32>
    %45 = tpu.matmul %43, %44, %cst_46 {dimension_numbers = #tpu.dot_dimension_numbers<[1], [0], [0], [1], [0, 0, 1, 1], [], []>} : vector<40x16xbf16>, vector<16x32xbf16>, vector<40x32xf32> -> vector<40x32xf32>
    %46 = arith.addf %41, %45 : vector<40x32xf32>
    %47 = arith.addf %32, %46 : vector<40x32xf32>
    %c0_47 = arith.constant 0 : index
    %c0_48 = arith.constant 0 : index
    %48 = vector.load %arg6[%c0_47, %c0_48] : memref<40x32xf32, #tpu.memory_space<vmem>>, vector<40x32xf32>
    tpu.vector_store %arg6[%c0_47, %c0_48], %47 {strides = array<i32>} : memref<40x32xf32, #tpu.memory_space<vmem>>, vector<40x32xf32>,
    %c0_49 = arith.constant 0 : index
    %c0_50 = arith.constant 0 : index
    %c0_51 = arith.constant 0 : index
    %49 = vector.load %arg2[%c0_49, %c0_50, %c0_51] : memref<1x60x16xbf16, #tpu.memory_space<vmem>>, vector<1x40x16xbf16>
    %50 = vector.shape_cast %49 : vector<1x40x16xbf16> to vector<40x16xbf16>
    %c0_52 = arith.constant 0 : index
    %c0_53 = arith.constant 0 : index
    %51 = vector.load %arg3[%c0_52, %c0_53] : memref<144x32xbf16, #tpu.memory_space<vmem>>, vector<16x32xbf16>
    %cst_54 = arith.constant dense<0.000000e+00> : vector<40x32xf32>
    %52 = tpu.matmul %50, %51, %cst_54 {dimension_numbers = #tpu.dot_dimension_numbers<[1], [0], [0], [1], [0, 0, 1, 1], [], []>} : vector<40x16xbf16>, vector<16x32xbf16>, vector<40x32xf32> -> vector<40x32xf32>
    %c0_55 = arith.constant 0 : index
    %c1_56 = arith.constant 1 : index
    %c0_57 = arith.constant 0 : index
    %53 = vector.load %arg2[%c0_55, %c1_56, %c0_57] : memref<1x60x16xbf16, #tpu.memory_space<vmem>>, vector<1x40x16xbf16>
    %54 = vector.shape_cast %53 : vector<1x40x16xbf16> to vector<40x16xbf16>
    %c16_58 = arith.constant 16 : index
    %c0_59 = arith.constant 0 : index
    %55 = vector.load %arg3[%c16_58, %c0_59] : memref<144x32xbf16, #tpu.memory_space<vmem>>, vector<16x32xbf16>
    %cst_60 = arith.constant dense<0.000000e+00> : vector<40x32xf32>
    %56 = tpu.matmul %54, %55, %cst_60 {dimension_numbers = #tpu.dot_dimension_numbers<[1], [0], [0], [1], [0, 0, 1, 1], [], []>} : vector<40x16xbf16>, vector<16x32xbf16>, vector<40x32xf32> -> vector<40x32xf32>
    %57 = arith.addf %52, %56 : vector<40x32xf32>
    %c0_61 = arith.constant 0 : index
    %c2_62 = arith.constant 2 : index
    %c0_63 = arith.constant 0 : index
    %58 = vector.load %arg2[%c0_61, %c2_62, %c0_63] : memref<1x60x16xbf16, #tpu.memory_space<vmem>>, vector<1x40x16xbf16>
    %59 = vector.shape_cast %58 : vector<1x40x16xbf16> to vector<40x16xbf16>
    %c32_64 = arith.constant 32 : index
    %c0_65 = arith.constant 0 : index
    %60 = vector.load %arg3[%c32_64, %c0_65] : memref<144x32xbf16, #tpu.memory_space<vmem>>, vector<16x32xbf16>
    %cst_66 = arith.constant dense<0.000000e+00> : vector<40x32xf32>
    %61 = tpu.matmul %59, %60, %cst_66 {dimension_numbers = #tpu.dot_dimension_numbers<[1], [0], [0], [1], [0, 0, 1, 1], [], []>} : vector<40x16xbf16>, vector<16x32xbf16>, vector<40x32xf32> -> vector<40x32xf32>
    %62 = arith.addf %57, %61 : vector<40x32xf32>
    %c0_67 = arith.constant 0 : index
    %c0_68 = arith.constant 0 : index
    %63 = vector.load %arg7[%c0_67, %c0_68] : memref<40x32xf32, #tpu.memory_space<vmem>>, vector<40x32xf32>
    tpu.vector_store %arg7[%c0_67, %c0_68], %62 {strides = array<i32>} : memref<40x32xf32, #tpu.memory_space<vmem>>, vector<40x32xf32>,
    %c0_69 = arith.constant 0 : index
    %c0_70 = arith.constant 0 : index
    %64 = vector.load %arg7[%c0_69, %c0_70] : memref<40x32xf32, #tpu.memory_space<vmem>>, vector<40x32xf32>
    %c0_71 = arith.constant 0 : index
    %c10_72 = arith.constant 10 : index
    %c0_73 = arith.constant 0 : index
    %65 = vector.load %arg1[%c0_71, %c10_72, %c0_73] : memref<1x60x16xbf16, #tpu.memory_space<vmem>>, vector<1x40x16xbf16>
    %66 = vector.shape_cast %65 : vector<1x40x16xbf16> to vector<40x16xbf16>
    %c48_74 = arith.constant 48 : index
    %c0_75 = arith.constant 0 : index
    %67 = vector.load %arg3[%c48_74, %c0_75] : memref<144x32xbf16, #tpu.memory_space<vmem>>, vector<16x32xbf16>
    %cst_76 = arith.constant dense<0.000000e+00> : vector<40x32xf32>
    %68 = tpu.matmul %66, %67, %cst_76 {dimension_numbers = #tpu.dot_dimension_numbers<[1], [0], [0], [1], [0, 0, 1, 1], [], []>} : vector<40x16xbf16>, vector<16x32xbf16>, vector<40x32xf32> -> vector<40x32xf32>
    %c0_77 = arith.constant 0 : index
    %c11_78 = arith.constant 11 : index
    %c0_79 = arith.constant 0 : index
    %69 = vector.load %arg1[%c0_77, %c11_78, %c0_79] : memref<1x60x16xbf16, #tpu.memory_space<vmem>>, vector<1x40x16xbf16>
    %70 = vector.shape_cast %69 : vector<1x40x16xbf16> to vector<40x16xbf16>
    %c64_80 = arith.constant 64 : index
    %c0_81 = arith.constant 0 : index
    %71 = vector.load %arg3[%c64_80, %c0_81] : memref<144x32xbf16, #tpu.memory_space<vmem>>, vector<16x32xbf16>
    %cst_82 = arith.constant dense<0.000000e+00> : vector<40x32xf32>
    %72 = tpu.matmul %70, %71, %cst_82 {dimension_numbers = #tpu.dot_dimension_numbers<[1], [0], [0], [1], [0, 0, 1, 1], [], []>} : vector<40x16xbf16>, vector<16x32xbf16>, vector<40x32xf32> -> vector<40x32xf32>
    %73 = arith.addf %68, %72 : vector<40x32xf32>
    %c0_83 = arith.constant 0 : index
    %c12_84 = arith.constant 12 : index
    %c0_85 = arith.constant 0 : index
    %74 = vector.load %arg1[%c0_83, %c12_84, %c0_85] : memref<1x60x16xbf16, #tpu.memory_space<vmem>>, vector<1x40x16xbf16>
    %75 = vector.shape_cast %74 : vector<1x40x16xbf16> to vector<40x16xbf16>
    %c80_86 = arith.constant 80 : index
    %c0_87 = arith.constant 0 : index
    %76 = vector.load %arg3[%c80_86, %c0_87] : memref<144x32xbf16, #tpu.memory_space<vmem>>, vector<16x32xbf16>
    %cst_88 = arith.constant dense<0.000000e+00> : vector<40x32xf32>
    %77 = tpu.matmul %75, %76, %cst_88 {dimension_numbers = #tpu.dot_dimension_numbers<[1], [0], [0], [1], [0, 0, 1, 1], [], []>} : vector<40x16xbf16>, vector<16x32xbf16>, vector<40x32xf32> -> vector<40x32xf32>
    %78 = arith.addf %73, %77 : vector<40x32xf32>
    %79 = arith.addf %64, %78 : vector<40x32xf32>
    %c0_89 = arith.constant 0 : index
    %c0_90 = arith.constant 0 : index
    %80 = vector.load %arg7[%c0_89, %c0_90] : memref<40x32xf32, #tpu.memory_space<vmem>>, vector<40x32xf32>
    tpu.vector_store %arg7[%c0_89, %c0_90], %79 {strides = array<i32>} : memref<40x32xf32, #tpu.memory_space<vmem>>, vector<40x32xf32>,
    %c0_91 = arith.constant 0 : index
    %c0_92 = arith.constant 0 : index
    %81 = vector.load %arg7[%c0_91, %c0_92] : memref<40x32xf32, #tpu.memory_space<vmem>>, vector<40x32xf32>
    %c0_93 = arith.constant 0 : index
    %c10_94 = arith.constant 10 : index
    %c0_95 = arith.constant 0 : index
    %82 = vector.load %arg2[%c0_93, %c10_94, %c0_95] : memref<1x60x16xbf16, #tpu.memory_space<vmem>>, vector<1x40x16xbf16>
    %83 = vector.shape_cast %82 : vector<1x40x16xbf16> to vector<40x16xbf16>
    %c96_96 = arith.constant 96 : index
    %c0_97 = arith.constant 0 : index
    %84 = vector.load %arg3[%c96_96, %c0_97] : memref<144x32xbf16, #tpu.memory_space<vmem>>, vector<16x32xbf16>
    %cst_98 = arith.constant dense<0.000000e+00> : vector<40x32xf32>
    %85 = tpu.matmul %83, %84, %cst_98 {dimension_numbers = #tpu.dot_dimension_numbers<[1], [0], [0], [1], [0, 0, 1, 1], [], []>} : vector<40x16xbf16>, vector<16x32xbf16>, vector<40x32xf32> -> vector<40x32xf32>
    %c0_99 = arith.constant 0 : index
    %c11_100 = arith.constant 11 : index
    %c0_101 = arith.constant 0 : index
    %86 = vector.load %arg2[%c0_99, %c11_100, %c0_101] : memref<1x60x16xbf16, #tpu.memory_space<vmem>>, vector<1x40x16xbf16>
    %87 = vector.shape_cast %86 : vector<1x40x16xbf16> to vector<40x16xbf16>
    %c112_102 = arith.constant 112 : index
    %c0_103 = arith.constant 0 : index
    %88 = vector.load %arg3[%c112_102, %c0_103] : memref<144x32xbf16, #tpu.memory_space<vmem>>, vector<16x32xbf16>
    %cst_104 = arith.constant dense<0.000000e+00> : vector<40x32xf32>
    %89 = tpu.matmul %87, %88, %cst_104 {dimension_numbers = #tpu.dot_dimension_numbers<[1], [0], [0], [1], [0, 0, 1, 1], [], []>} : vector<40x16xbf16>, vector<16x32xbf16>, vector<40x32xf32> -> vector<40x32xf32>
    %90 = arith.addf %85, %89 : vector<40x32xf32>
    %c0_105 = arith.constant 0 : index
    %c12_106 = arith.constant 12 : index
    %c0_107 = arith.constant 0 : index
    %91 = vector.load %arg2[%c0_105, %c12_106, %c0_107] : memref<1x60x16xbf16, #tpu.memory_space<vmem>>, vector<1x40x16xbf16>
    %92 = vector.shape_cast %91 : vector<1x40x16xbf16> to vector<40x16xbf16>
    %c128_108 = arith.constant 128 : index
    %c0_109 = arith.constant 0 : index
    %93 = vector.load %arg3[%c128_108, %c0_109] : memref<144x32xbf16, #tpu.memory_space<vmem>>, vector<16x32xbf16>
    %cst_110 = arith.constant dense<0.000000e+00> : vector<40x32xf32>
    %94 = tpu.matmul %92, %93, %cst_110 {dimension_numbers = #tpu.dot_dimension_numbers<[1], [0], [0], [1], [0, 0, 1, 1], [], []>} : vector<40x16xbf16>, vector<16x32xbf16>, vector<40x32xf32> -> vector<40x32xf32>
    %95 = arith.addf %90, %94 : vector<40x32xf32>
    %96 = arith.addf %81, %95 : vector<40x32xf32>
    %c0_111 = arith.constant 0 : index
    %c0_112 = arith.constant 0 : index
    %97 = vector.load %arg7[%c0_111, %c0_112] : memref<40x32xf32, #tpu.memory_space<vmem>>, vector<40x32xf32>
    tpu.vector_store %arg7[%c0_111, %c0_112], %96 {strides = array<i32>} : memref<40x32xf32, #tpu.memory_space<vmem>>, vector<40x32xf32>,
    %c0_113 = arith.constant 0 : index
    %c0_114 = arith.constant 0 : index
    %98 = tpu.strided_load %arg6[%c0_113, %c0_114] {strides = array<i32: 2, 1>} : memref<40x32xf32, #tpu.memory_space<vmem>>, vector<20x32xf32>
    %c1_115 = arith.constant 1 : index
    %c0_116 = arith.constant 0 : index
    %99 = tpu.strided_load %arg6[%c1_115, %c0_116] {strides = array<i32: 2, 1>} : memref<40x32xf32, #tpu.memory_space<vmem>>, vector<20x32xf32>
    %100 = arith.maximumf %98, %99 : vector<20x32xf32>
    %c0_117 = arith.constant 0 : index
    %c0_118 = arith.constant 0 : index
    %101 = tpu.strided_load %arg7[%c0_117, %c0_118] {strides = array<i32: 2, 1>} : memref<40x32xf32, #tpu.memory_space<vmem>>, vector<20x32xf32>
    %c1_119 = arith.constant 1 : index
    %c0_120 = arith.constant 0 : index
    %102 = tpu.strided_load %arg7[%c1_119, %c0_120] {strides = array<i32: 2, 1>} : memref<40x32xf32, #tpu.memory_space<vmem>>, vector<20x32xf32>
    %103 = arith.maximumf %101, %102 : vector<20x32xf32>
    %104 = arith.maximumf %100, %103 : vector<20x32xf32>
    %c0_121 = arith.constant 0 : index
    %c0_122 = arith.constant 0 : index
    %105 = vector.load %arg4[%c0_121, %c0_122] : memref<1x32xf32, #tpu.memory_space<vmem>>, vector<1x32xf32>
    %106 = vector.broadcast %105 : vector<1x32xf32> to vector<20x32xf32>
    %107 = arith.addf %104, %106 : vector<20x32xf32>
    %cst_123 = arith.constant 0.000000e+00 : f32
    %108 = vector.broadcast %cst_123 : f32 to vector<20x32xf32>
    %109 = arith.maximumf %107, %108 : vector<20x32xf32>
    %110 = arith.truncf %109 : vector<20x32xf32> to vector<20x32xbf16>
    %c0_124 = arith.constant 0 : index
    %c0_125 = arith.constant 0 : index
    %c0_126 = arith.constant 0 : index
    %111 = vector.load %arg5[%c0_124, %c0_125, %c0_126] : memref<1x20x32xbf16, #tpu.memory_space<vmem>>, vector<1x20x32xbf16>
    %112 = vector.shape_cast %111 : vector<1x20x32xbf16> to vector<20x32xbf16>
    %113 = vector.shape_cast %110 : vector<20x32xbf16> to vector<1x20x32xbf16>
    tpu.vector_store %arg5[%c0_124, %c0_125, %c0_126], %113 {strides = array<i32>} : memref<1x20x32xbf16, #tpu.memory_space<vmem>>, vector<1x20x32xbf16>,
    return
  }
  func.func @transform_0(%arg0: i32) -> (i32, i32, i32) {
    %c0_i32 = arith.constant 0 : i32
    %c0_i32_0 = arith.constant 0 : i32
    %c0_i32_1 = arith.constant 0 : i32
    return %arg0, %c0_i32, %c0_i32_0 : i32, i32, i32
  }
  func.func @transform_1(%arg0: i32) -> (i32, i32, i32) {
    %c0_i32 = arith.constant 0 : i32
    %c0_i32_0 = arith.constant 0 : i32
    %c0_i32_1 = arith.constant 0 : i32
    return %arg0, %c0_i32, %c0_i32_0 : i32, i32, i32
  }
  func.func @transform_2(%arg0: i32) -> (i32, i32) {
    %c0_i32 = arith.constant 0 : i32
    %c0_i32_0 = arith.constant 0 : i32
    %c0_i32_1 = arith.constant 0 : i32
    return %c0_i32, %c0_i32_0 : i32, i32
  }
  func.func @transform_3(%arg0: i32) -> (i32, i32) {
    %c0_i32 = arith.constant 0 : i32
    %c0_i32_0 = arith.constant 0 : i32
    %c0_i32_1 = arith.constant 0 : i32
    return %c0_i32, %c0_i32_0 : i32, i32
  }
  func.func @transform_4(%arg0: i32) -> (i32, i32, i32) {
    %c0_i32 = arith.constant 0 : i32
    %c0_i32_0 = arith.constant 0 : i32
    %c0_i32_1 = arith.constant 0 : i32
    return %arg0, %c0_i32, %c0_i32_0 : i32, i32, i32
  }
}

module attributes {stable_mosaic.version = 11 : i64} {
  func.func @conv_eo_kernel(%arg0: i32, %arg1: memref<1x24x32xbf16, #tpu.memory_space<vmem>>, %arg2: memref<1x24x32xbf16, #tpu.memory_space<vmem>>, %arg3: memref<288x64xbf16, #tpu.memory_space<vmem>>, %arg4: memref<1x64xf32, #tpu.memory_space<vmem>>, %arg5: memref<1x6x64xbf16, #tpu.memory_space<vmem>>, %arg6: memref<12x64xf32, #tpu.memory_space<vmem>>, %arg7: memref<12x64xf32, #tpu.memory_space<vmem>>) attributes {dimension_semantics = [#tpu.dimension_semantics<parallel>], iteration_bounds = array<i64: 2>, scalar_prefetch = 0 : i64, scratch_operands = 2 : i64, tpu.core_type = #tpu.core_type<tc>, window_params = [{transform_indices = @transform_0, window_bounds = array<i64: 1, 24, 32>}, {transform_indices = @transform_1, window_bounds = array<i64: 1, 24, 32>}, {pipeline_mode = #tpu.pipeline_mode<synchronous>, transform_indices = @transform_2, window_bounds = array<i64: 288, 64>}, {pipeline_mode = #tpu.pipeline_mode<synchronous>, transform_indices = @transform_3, window_bounds = array<i64: 1, 64>}, {transform_indices = @transform_4, window_bounds = array<i64: 1, 6, 64>}]} {
    %c0 = arith.constant 0 : index
    %c0_0 = arith.constant 0 : index
    %c0_1 = arith.constant 0 : index
    %0 = vector.load %arg1[%c0, %c0_0, %c0_1] : memref<1x24x32xbf16, #tpu.memory_space<vmem>>, vector<1x12x32xbf16>
    %1 = vector.shape_cast %0 : vector<1x12x32xbf16> to vector<12x32xbf16>
    %c0_2 = arith.constant 0 : index
    %c0_3 = arith.constant 0 : index
    %2 = vector.load %arg3[%c0_2, %c0_3] : memref<288x64xbf16, #tpu.memory_space<vmem>>, vector<32x64xbf16>
    %cst = arith.constant dense<0.000000e+00> : vector<12x64xf32>
    %3 = tpu.matmul %1, %2, %cst {dimension_numbers = #tpu.dot_dimension_numbers<[1], [0], [0], [1], [0, 0, 1, 1], [], []>} : vector<12x32xbf16>, vector<32x64xbf16>, vector<12x64xf32> -> vector<12x64xf32>
    %c0_4 = arith.constant 0 : index
    %c1 = arith.constant 1 : index
    %c0_5 = arith.constant 0 : index
    %4 = vector.load %arg1[%c0_4, %c1, %c0_5] : memref<1x24x32xbf16, #tpu.memory_space<vmem>>, vector<1x12x32xbf16>
    %5 = vector.shape_cast %4 : vector<1x12x32xbf16> to vector<12x32xbf16>
    %c32 = arith.constant 32 : index
    %c0_6 = arith.constant 0 : index
    %6 = vector.load %arg3[%c32, %c0_6] : memref<288x64xbf16, #tpu.memory_space<vmem>>, vector<32x64xbf16>
    %cst_7 = arith.constant dense<0.000000e+00> : vector<12x64xf32>
    %7 = tpu.matmul %5, %6, %cst_7 {dimension_numbers = #tpu.dot_dimension_numbers<[1], [0], [0], [1], [0, 0, 1, 1], [], []>} : vector<12x32xbf16>, vector<32x64xbf16>, vector<12x64xf32> -> vector<12x64xf32>
    %8 = arith.addf %3, %7 : vector<12x64xf32>
    %c0_8 = arith.constant 0 : index
    %c2 = arith.constant 2 : index
    %c0_9 = arith.constant 0 : index
    %9 = vector.load %arg1[%c0_8, %c2, %c0_9] : memref<1x24x32xbf16, #tpu.memory_space<vmem>>, vector<1x12x32xbf16>
    %10 = vector.shape_cast %9 : vector<1x12x32xbf16> to vector<12x32xbf16>
    %c64 = arith.constant 64 : index
    %c0_10 = arith.constant 0 : index
    %11 = vector.load %arg3[%c64, %c0_10] : memref<288x64xbf16, #tpu.memory_space<vmem>>, vector<32x64xbf16>
    %cst_11 = arith.constant dense<0.000000e+00> : vector<12x64xf32>
    %12 = tpu.matmul %10, %11, %cst_11 {dimension_numbers = #tpu.dot_dimension_numbers<[1], [0], [0], [1], [0, 0, 1, 1], [], []>} : vector<12x32xbf16>, vector<32x64xbf16>, vector<12x64xf32> -> vector<12x64xf32>
    %13 = arith.addf %8, %12 : vector<12x64xf32>
    %c0_12 = arith.constant 0 : index
    %c0_13 = arith.constant 0 : index
    %14 = vector.load %arg6[%c0_12, %c0_13] : memref<12x64xf32, #tpu.memory_space<vmem>>, vector<12x64xf32>
    tpu.vector_store %arg6[%c0_12, %c0_13], %13 {strides = array<i32>} : memref<12x64xf32, #tpu.memory_space<vmem>>, vector<12x64xf32>,
    %c0_14 = arith.constant 0 : index
    %c0_15 = arith.constant 0 : index
    %15 = vector.load %arg6[%c0_14, %c0_15] : memref<12x64xf32, #tpu.memory_space<vmem>>, vector<12x64xf32>
    %c0_16 = arith.constant 0 : index
    %c0_17 = arith.constant 0 : index
    %c0_18 = arith.constant 0 : index
    %16 = vector.load %arg2[%c0_16, %c0_17, %c0_18] : memref<1x24x32xbf16, #tpu.memory_space<vmem>>, vector<1x12x32xbf16>
    %17 = vector.shape_cast %16 : vector<1x12x32xbf16> to vector<12x32xbf16>
    %c96 = arith.constant 96 : index
    %c0_19 = arith.constant 0 : index
    %18 = vector.load %arg3[%c96, %c0_19] : memref<288x64xbf16, #tpu.memory_space<vmem>>, vector<32x64xbf16>
    %cst_20 = arith.constant dense<0.000000e+00> : vector<12x64xf32>
    %19 = tpu.matmul %17, %18, %cst_20 {dimension_numbers = #tpu.dot_dimension_numbers<[1], [0], [0], [1], [0, 0, 1, 1], [], []>} : vector<12x32xbf16>, vector<32x64xbf16>, vector<12x64xf32> -> vector<12x64xf32>
    %c0_21 = arith.constant 0 : index
    %c1_22 = arith.constant 1 : index
    %c0_23 = arith.constant 0 : index
    %20 = vector.load %arg2[%c0_21, %c1_22, %c0_23] : memref<1x24x32xbf16, #tpu.memory_space<vmem>>, vector<1x12x32xbf16>
    %21 = vector.shape_cast %20 : vector<1x12x32xbf16> to vector<12x32xbf16>
    %c128 = arith.constant 128 : index
    %c0_24 = arith.constant 0 : index
    %22 = vector.load %arg3[%c128, %c0_24] : memref<288x64xbf16, #tpu.memory_space<vmem>>, vector<32x64xbf16>
    %cst_25 = arith.constant dense<0.000000e+00> : vector<12x64xf32>
    %23 = tpu.matmul %21, %22, %cst_25 {dimension_numbers = #tpu.dot_dimension_numbers<[1], [0], [0], [1], [0, 0, 1, 1], [], []>} : vector<12x32xbf16>, vector<32x64xbf16>, vector<12x64xf32> -> vector<12x64xf32>
    %24 = arith.addf %19, %23 : vector<12x64xf32>
    %c0_26 = arith.constant 0 : index
    %c2_27 = arith.constant 2 : index
    %c0_28 = arith.constant 0 : index
    %25 = vector.load %arg2[%c0_26, %c2_27, %c0_28] : memref<1x24x32xbf16, #tpu.memory_space<vmem>>, vector<1x12x32xbf16>
    %26 = vector.shape_cast %25 : vector<1x12x32xbf16> to vector<12x32xbf16>
    %c160 = arith.constant 160 : index
    %c0_29 = arith.constant 0 : index
    %27 = vector.load %arg3[%c160, %c0_29] : memref<288x64xbf16, #tpu.memory_space<vmem>>, vector<32x64xbf16>
    %cst_30 = arith.constant dense<0.000000e+00> : vector<12x64xf32>
    %28 = tpu.matmul %26, %27, %cst_30 {dimension_numbers = #tpu.dot_dimension_numbers<[1], [0], [0], [1], [0, 0, 1, 1], [], []>} : vector<12x32xbf16>, vector<32x64xbf16>, vector<12x64xf32> -> vector<12x64xf32>
    %29 = arith.addf %24, %28 : vector<12x64xf32>
    %30 = arith.addf %15, %29 : vector<12x64xf32>
    %c0_31 = arith.constant 0 : index
    %c0_32 = arith.constant 0 : index
    %31 = vector.load %arg6[%c0_31, %c0_32] : memref<12x64xf32, #tpu.memory_space<vmem>>, vector<12x64xf32>
    tpu.vector_store %arg6[%c0_31, %c0_32], %30 {strides = array<i32>} : memref<12x64xf32, #tpu.memory_space<vmem>>, vector<12x64xf32>,
    %c0_33 = arith.constant 0 : index
    %c0_34 = arith.constant 0 : index
    %32 = vector.load %arg6[%c0_33, %c0_34] : memref<12x64xf32, #tpu.memory_space<vmem>>, vector<12x64xf32>
    %c0_35 = arith.constant 0 : index
    %c6 = arith.constant 6 : index
    %c0_36 = arith.constant 0 : index
    %33 = vector.load %arg1[%c0_35, %c6, %c0_36] : memref<1x24x32xbf16, #tpu.memory_space<vmem>>, vector<1x12x32xbf16>
    %34 = vector.shape_cast %33 : vector<1x12x32xbf16> to vector<12x32xbf16>
    %c192 = arith.constant 192 : index
    %c0_37 = arith.constant 0 : index
    %35 = vector.load %arg3[%c192, %c0_37] : memref<288x64xbf16, #tpu.memory_space<vmem>>, vector<32x64xbf16>
    %cst_38 = arith.constant dense<0.000000e+00> : vector<12x64xf32>
    %36 = tpu.matmul %34, %35, %cst_38 {dimension_numbers = #tpu.dot_dimension_numbers<[1], [0], [0], [1], [0, 0, 1, 1], [], []>} : vector<12x32xbf16>, vector<32x64xbf16>, vector<12x64xf32> -> vector<12x64xf32>
    %c0_39 = arith.constant 0 : index
    %c7 = arith.constant 7 : index
    %c0_40 = arith.constant 0 : index
    %37 = vector.load %arg1[%c0_39, %c7, %c0_40] : memref<1x24x32xbf16, #tpu.memory_space<vmem>>, vector<1x12x32xbf16>
    %38 = vector.shape_cast %37 : vector<1x12x32xbf16> to vector<12x32xbf16>
    %c224 = arith.constant 224 : index
    %c0_41 = arith.constant 0 : index
    %39 = vector.load %arg3[%c224, %c0_41] : memref<288x64xbf16, #tpu.memory_space<vmem>>, vector<32x64xbf16>
    %cst_42 = arith.constant dense<0.000000e+00> : vector<12x64xf32>
    %40 = tpu.matmul %38, %39, %cst_42 {dimension_numbers = #tpu.dot_dimension_numbers<[1], [0], [0], [1], [0, 0, 1, 1], [], []>} : vector<12x32xbf16>, vector<32x64xbf16>, vector<12x64xf32> -> vector<12x64xf32>
    %41 = arith.addf %36, %40 : vector<12x64xf32>
    %c0_43 = arith.constant 0 : index
    %c8 = arith.constant 8 : index
    %c0_44 = arith.constant 0 : index
    %42 = vector.load %arg1[%c0_43, %c8, %c0_44] : memref<1x24x32xbf16, #tpu.memory_space<vmem>>, vector<1x12x32xbf16>
    %43 = vector.shape_cast %42 : vector<1x12x32xbf16> to vector<12x32xbf16>
    %c256 = arith.constant 256 : index
    %c0_45 = arith.constant 0 : index
    %44 = vector.load %arg3[%c256, %c0_45] : memref<288x64xbf16, #tpu.memory_space<vmem>>, vector<32x64xbf16>
    %cst_46 = arith.constant dense<0.000000e+00> : vector<12x64xf32>
    %45 = tpu.matmul %43, %44, %cst_46 {dimension_numbers = #tpu.dot_dimension_numbers<[1], [0], [0], [1], [0, 0, 1, 1], [], []>} : vector<12x32xbf16>, vector<32x64xbf16>, vector<12x64xf32> -> vector<12x64xf32>
    %46 = arith.addf %41, %45 : vector<12x64xf32>
    %47 = arith.addf %32, %46 : vector<12x64xf32>
    %c0_47 = arith.constant 0 : index
    %c0_48 = arith.constant 0 : index
    %48 = vector.load %arg6[%c0_47, %c0_48] : memref<12x64xf32, #tpu.memory_space<vmem>>, vector<12x64xf32>
    tpu.vector_store %arg6[%c0_47, %c0_48], %47 {strides = array<i32>} : memref<12x64xf32, #tpu.memory_space<vmem>>, vector<12x64xf32>,
    %c0_49 = arith.constant 0 : index
    %c0_50 = arith.constant 0 : index
    %c0_51 = arith.constant 0 : index
    %49 = vector.load %arg2[%c0_49, %c0_50, %c0_51] : memref<1x24x32xbf16, #tpu.memory_space<vmem>>, vector<1x12x32xbf16>
    %50 = vector.shape_cast %49 : vector<1x12x32xbf16> to vector<12x32xbf16>
    %c0_52 = arith.constant 0 : index
    %c0_53 = arith.constant 0 : index
    %51 = vector.load %arg3[%c0_52, %c0_53] : memref<288x64xbf16, #tpu.memory_space<vmem>>, vector<32x64xbf16>
    %cst_54 = arith.constant dense<0.000000e+00> : vector<12x64xf32>
    %52 = tpu.matmul %50, %51, %cst_54 {dimension_numbers = #tpu.dot_dimension_numbers<[1], [0], [0], [1], [0, 0, 1, 1], [], []>} : vector<12x32xbf16>, vector<32x64xbf16>, vector<12x64xf32> -> vector<12x64xf32>
    %c0_55 = arith.constant 0 : index
    %c1_56 = arith.constant 1 : index
    %c0_57 = arith.constant 0 : index
    %53 = vector.load %arg2[%c0_55, %c1_56, %c0_57] : memref<1x24x32xbf16, #tpu.memory_space<vmem>>, vector<1x12x32xbf16>
    %54 = vector.shape_cast %53 : vector<1x12x32xbf16> to vector<12x32xbf16>
    %c32_58 = arith.constant 32 : index
    %c0_59 = arith.constant 0 : index
    %55 = vector.load %arg3[%c32_58, %c0_59] : memref<288x64xbf16, #tpu.memory_space<vmem>>, vector<32x64xbf16>
    %cst_60 = arith.constant dense<0.000000e+00> : vector<12x64xf32>
    %56 = tpu.matmul %54, %55, %cst_60 {dimension_numbers = #tpu.dot_dimension_numbers<[1], [0], [0], [1], [0, 0, 1, 1], [], []>} : vector<12x32xbf16>, vector<32x64xbf16>, vector<12x64xf32> -> vector<12x64xf32>
    %57 = arith.addf %52, %56 : vector<12x64xf32>
    %c0_61 = arith.constant 0 : index
    %c2_62 = arith.constant 2 : index
    %c0_63 = arith.constant 0 : index
    %58 = vector.load %arg2[%c0_61, %c2_62, %c0_63] : memref<1x24x32xbf16, #tpu.memory_space<vmem>>, vector<1x12x32xbf16>
    %59 = vector.shape_cast %58 : vector<1x12x32xbf16> to vector<12x32xbf16>
    %c64_64 = arith.constant 64 : index
    %c0_65 = arith.constant 0 : index
    %60 = vector.load %arg3[%c64_64, %c0_65] : memref<288x64xbf16, #tpu.memory_space<vmem>>, vector<32x64xbf16>
    %cst_66 = arith.constant dense<0.000000e+00> : vector<12x64xf32>
    %61 = tpu.matmul %59, %60, %cst_66 {dimension_numbers = #tpu.dot_dimension_numbers<[1], [0], [0], [1], [0, 0, 1, 1], [], []>} : vector<12x32xbf16>, vector<32x64xbf16>, vector<12x64xf32> -> vector<12x64xf32>
    %62 = arith.addf %57, %61 : vector<12x64xf32>
    %c0_67 = arith.constant 0 : index
    %c0_68 = arith.constant 0 : index
    %63 = vector.load %arg7[%c0_67, %c0_68] : memref<12x64xf32, #tpu.memory_space<vmem>>, vector<12x64xf32>
    tpu.vector_store %arg7[%c0_67, %c0_68], %62 {strides = array<i32>} : memref<12x64xf32, #tpu.memory_space<vmem>>, vector<12x64xf32>,
    %c0_69 = arith.constant 0 : index
    %c0_70 = arith.constant 0 : index
    %64 = vector.load %arg7[%c0_69, %c0_70] : memref<12x64xf32, #tpu.memory_space<vmem>>, vector<12x64xf32>
    %c0_71 = arith.constant 0 : index
    %c6_72 = arith.constant 6 : index
    %c0_73 = arith.constant 0 : index
    %65 = vector.load %arg1[%c0_71, %c6_72, %c0_73] : memref<1x24x32xbf16, #tpu.memory_space<vmem>>, vector<1x12x32xbf16>
    %66 = vector.shape_cast %65 : vector<1x12x32xbf16> to vector<12x32xbf16>
    %c96_74 = arith.constant 96 : index
    %c0_75 = arith.constant 0 : index
    %67 = vector.load %arg3[%c96_74, %c0_75] : memref<288x64xbf16, #tpu.memory_space<vmem>>, vector<32x64xbf16>
    %cst_76 = arith.constant dense<0.000000e+00> : vector<12x64xf32>
    %68 = tpu.matmul %66, %67, %cst_76 {dimension_numbers = #tpu.dot_dimension_numbers<[1], [0], [0], [1], [0, 0, 1, 1], [], []>} : vector<12x32xbf16>, vector<32x64xbf16>, vector<12x64xf32> -> vector<12x64xf32>
    %c0_77 = arith.constant 0 : index
    %c7_78 = arith.constant 7 : index
    %c0_79 = arith.constant 0 : index
    %69 = vector.load %arg1[%c0_77, %c7_78, %c0_79] : memref<1x24x32xbf16, #tpu.memory_space<vmem>>, vector<1x12x32xbf16>
    %70 = vector.shape_cast %69 : vector<1x12x32xbf16> to vector<12x32xbf16>
    %c128_80 = arith.constant 128 : index
    %c0_81 = arith.constant 0 : index
    %71 = vector.load %arg3[%c128_80, %c0_81] : memref<288x64xbf16, #tpu.memory_space<vmem>>, vector<32x64xbf16>
    %cst_82 = arith.constant dense<0.000000e+00> : vector<12x64xf32>
    %72 = tpu.matmul %70, %71, %cst_82 {dimension_numbers = #tpu.dot_dimension_numbers<[1], [0], [0], [1], [0, 0, 1, 1], [], []>} : vector<12x32xbf16>, vector<32x64xbf16>, vector<12x64xf32> -> vector<12x64xf32>
    %73 = arith.addf %68, %72 : vector<12x64xf32>
    %c0_83 = arith.constant 0 : index
    %c8_84 = arith.constant 8 : index
    %c0_85 = arith.constant 0 : index
    %74 = vector.load %arg1[%c0_83, %c8_84, %c0_85] : memref<1x24x32xbf16, #tpu.memory_space<vmem>>, vector<1x12x32xbf16>
    %75 = vector.shape_cast %74 : vector<1x12x32xbf16> to vector<12x32xbf16>
    %c160_86 = arith.constant 160 : index
    %c0_87 = arith.constant 0 : index
    %76 = vector.load %arg3[%c160_86, %c0_87] : memref<288x64xbf16, #tpu.memory_space<vmem>>, vector<32x64xbf16>
    %cst_88 = arith.constant dense<0.000000e+00> : vector<12x64xf32>
    %77 = tpu.matmul %75, %76, %cst_88 {dimension_numbers = #tpu.dot_dimension_numbers<[1], [0], [0], [1], [0, 0, 1, 1], [], []>} : vector<12x32xbf16>, vector<32x64xbf16>, vector<12x64xf32> -> vector<12x64xf32>
    %78 = arith.addf %73, %77 : vector<12x64xf32>
    %79 = arith.addf %64, %78 : vector<12x64xf32>
    %c0_89 = arith.constant 0 : index
    %c0_90 = arith.constant 0 : index
    %80 = vector.load %arg7[%c0_89, %c0_90] : memref<12x64xf32, #tpu.memory_space<vmem>>, vector<12x64xf32>
    tpu.vector_store %arg7[%c0_89, %c0_90], %79 {strides = array<i32>} : memref<12x64xf32, #tpu.memory_space<vmem>>, vector<12x64xf32>,
    %c0_91 = arith.constant 0 : index
    %c0_92 = arith.constant 0 : index
    %81 = vector.load %arg7[%c0_91, %c0_92] : memref<12x64xf32, #tpu.memory_space<vmem>>, vector<12x64xf32>
    %c0_93 = arith.constant 0 : index
    %c6_94 = arith.constant 6 : index
    %c0_95 = arith.constant 0 : index
    %82 = vector.load %arg2[%c0_93, %c6_94, %c0_95] : memref<1x24x32xbf16, #tpu.memory_space<vmem>>, vector<1x12x32xbf16>
    %83 = vector.shape_cast %82 : vector<1x12x32xbf16> to vector<12x32xbf16>
    %c192_96 = arith.constant 192 : index
    %c0_97 = arith.constant 0 : index
    %84 = vector.load %arg3[%c192_96, %c0_97] : memref<288x64xbf16, #tpu.memory_space<vmem>>, vector<32x64xbf16>
    %cst_98 = arith.constant dense<0.000000e+00> : vector<12x64xf32>
    %85 = tpu.matmul %83, %84, %cst_98 {dimension_numbers = #tpu.dot_dimension_numbers<[1], [0], [0], [1], [0, 0, 1, 1], [], []>} : vector<12x32xbf16>, vector<32x64xbf16>, vector<12x64xf32> -> vector<12x64xf32>
    %c0_99 = arith.constant 0 : index
    %c7_100 = arith.constant 7 : index
    %c0_101 = arith.constant 0 : index
    %86 = vector.load %arg2[%c0_99, %c7_100, %c0_101] : memref<1x24x32xbf16, #tpu.memory_space<vmem>>, vector<1x12x32xbf16>
    %87 = vector.shape_cast %86 : vector<1x12x32xbf16> to vector<12x32xbf16>
    %c224_102 = arith.constant 224 : index
    %c0_103 = arith.constant 0 : index
    %88 = vector.load %arg3[%c224_102, %c0_103] : memref<288x64xbf16, #tpu.memory_space<vmem>>, vector<32x64xbf16>
    %cst_104 = arith.constant dense<0.000000e+00> : vector<12x64xf32>
    %89 = tpu.matmul %87, %88, %cst_104 {dimension_numbers = #tpu.dot_dimension_numbers<[1], [0], [0], [1], [0, 0, 1, 1], [], []>} : vector<12x32xbf16>, vector<32x64xbf16>, vector<12x64xf32> -> vector<12x64xf32>
    %90 = arith.addf %85, %89 : vector<12x64xf32>
    %c0_105 = arith.constant 0 : index
    %c8_106 = arith.constant 8 : index
    %c0_107 = arith.constant 0 : index
    %91 = vector.load %arg2[%c0_105, %c8_106, %c0_107] : memref<1x24x32xbf16, #tpu.memory_space<vmem>>, vector<1x12x32xbf16>
    %92 = vector.shape_cast %91 : vector<1x12x32xbf16> to vector<12x32xbf16>
    %c256_108 = arith.constant 256 : index
    %c0_109 = arith.constant 0 : index
    %93 = vector.load %arg3[%c256_108, %c0_109] : memref<288x64xbf16, #tpu.memory_space<vmem>>, vector<32x64xbf16>
    %cst_110 = arith.constant dense<0.000000e+00> : vector<12x64xf32>
    %94 = tpu.matmul %92, %93, %cst_110 {dimension_numbers = #tpu.dot_dimension_numbers<[1], [0], [0], [1], [0, 0, 1, 1], [], []>} : vector<12x32xbf16>, vector<32x64xbf16>, vector<12x64xf32> -> vector<12x64xf32>
    %95 = arith.addf %90, %94 : vector<12x64xf32>
    %96 = arith.addf %81, %95 : vector<12x64xf32>
    %c0_111 = arith.constant 0 : index
    %c0_112 = arith.constant 0 : index
    %97 = vector.load %arg7[%c0_111, %c0_112] : memref<12x64xf32, #tpu.memory_space<vmem>>, vector<12x64xf32>
    tpu.vector_store %arg7[%c0_111, %c0_112], %96 {strides = array<i32>} : memref<12x64xf32, #tpu.memory_space<vmem>>, vector<12x64xf32>,
    %c0_113 = arith.constant 0 : index
    %c0_114 = arith.constant 0 : index
    %98 = tpu.strided_load %arg6[%c0_113, %c0_114] {strides = array<i32: 2, 1>} : memref<12x64xf32, #tpu.memory_space<vmem>>, vector<6x64xf32>
    %c1_115 = arith.constant 1 : index
    %c0_116 = arith.constant 0 : index
    %99 = tpu.strided_load %arg6[%c1_115, %c0_116] {strides = array<i32: 2, 1>} : memref<12x64xf32, #tpu.memory_space<vmem>>, vector<6x64xf32>
    %100 = arith.maximumf %98, %99 : vector<6x64xf32>
    %c0_117 = arith.constant 0 : index
    %c0_118 = arith.constant 0 : index
    %101 = tpu.strided_load %arg7[%c0_117, %c0_118] {strides = array<i32: 2, 1>} : memref<12x64xf32, #tpu.memory_space<vmem>>, vector<6x64xf32>
    %c1_119 = arith.constant 1 : index
    %c0_120 = arith.constant 0 : index
    %102 = tpu.strided_load %arg7[%c1_119, %c0_120] {strides = array<i32: 2, 1>} : memref<12x64xf32, #tpu.memory_space<vmem>>, vector<6x64xf32>
    %103 = arith.maximumf %101, %102 : vector<6x64xf32>
    %104 = arith.maximumf %100, %103 : vector<6x64xf32>
    %c0_121 = arith.constant 0 : index
    %c0_122 = arith.constant 0 : index
    %105 = vector.load %arg4[%c0_121, %c0_122] : memref<1x64xf32, #tpu.memory_space<vmem>>, vector<1x64xf32>
    %106 = vector.broadcast %105 : vector<1x64xf32> to vector<6x64xf32>
    %107 = arith.addf %104, %106 : vector<6x64xf32>
    %cst_123 = arith.constant 0.000000e+00 : f32
    %108 = vector.broadcast %cst_123 : f32 to vector<6x64xf32>
    %109 = arith.maximumf %107, %108 : vector<6x64xf32>
    %110 = arith.truncf %109 : vector<6x64xf32> to vector<6x64xbf16>
    %c0_124 = arith.constant 0 : index
    %c0_125 = arith.constant 0 : index
    %c0_126 = arith.constant 0 : index
    %111 = vector.load %arg5[%c0_124, %c0_125, %c0_126] : memref<1x6x64xbf16, #tpu.memory_space<vmem>>, vector<1x6x64xbf16>
    %112 = vector.shape_cast %111 : vector<1x6x64xbf16> to vector<6x64xbf16>
    %113 = vector.shape_cast %110 : vector<6x64xbf16> to vector<1x6x64xbf16>
    tpu.vector_store %arg5[%c0_124, %c0_125, %c0_126], %113 {strides = array<i32>} : memref<1x6x64xbf16, #tpu.memory_space<vmem>>, vector<1x6x64xbf16>,
    return
  }
  func.func @transform_0(%arg0: i32) -> (i32, i32, i32) {
    %c0_i32 = arith.constant 0 : i32
    %c0_i32_0 = arith.constant 0 : i32
    %c0_i32_1 = arith.constant 0 : i32
    return %arg0, %c0_i32, %c0_i32_0 : i32, i32, i32
  }
  func.func @transform_1(%arg0: i32) -> (i32, i32, i32) {
    %c0_i32 = arith.constant 0 : i32
    %c0_i32_0 = arith.constant 0 : i32
    %c0_i32_1 = arith.constant 0 : i32
    return %arg0, %c0_i32, %c0_i32_0 : i32, i32, i32
  }
  func.func @transform_2(%arg0: i32) -> (i32, i32) {
    %c0_i32 = arith.constant 0 : i32
    %c0_i32_0 = arith.constant 0 : i32
    %c0_i32_1 = arith.constant 0 : i32
    return %c0_i32, %c0_i32_0 : i32, i32
  }
  func.func @transform_3(%arg0: i32) -> (i32, i32) {
    %c0_i32 = arith.constant 0 : i32
    %c0_i32_0 = arith.constant 0 : i32
    %c0_i32_1 = arith.constant 0 : i32
    return %c0_i32, %c0_i32_0 : i32, i32
  }
  func.func @transform_4(%arg0: i32) -> (i32, i32, i32) {
    %c0_i32 = arith.constant 0 : i32
    %c0_i32_0 = arith.constant 0 : i32
    %c0_i32_1 = arith.constant 0 : i32
    return %arg0, %c0_i32, %c0_i32_0 : i32, i32, i32
  }
}

module attributes {stable_mosaic.version = 11 : i64} {
  func.func @mlp_kernel(%arg0: i32, %arg1: i32, %arg2: memref<2x256xbf16, #tpu.memory_space<vmem>>, %arg3: memref<256x512xbf16, #tpu.memory_space<vmem>>, %arg4: memref<1x512xf32, #tpu.memory_space<vmem>>, %arg5: memref<512x128xbf16, #tpu.memory_space<vmem>>, %arg6: memref<1x2x128xf32, #tpu.memory_space<vmem>>, %arg7: memref<2x512xf32, #tpu.memory_space<vmem>>) attributes {dimension_semantics = [#tpu.dimension_semantics<parallel>, #tpu.dimension_semantics<arbitrary>], iteration_bounds = array<i64: 2, 1>, scalar_prefetch = 0 : i64, scratch_operands = 1 : i64, tpu.core_type = #tpu.core_type<tc>, window_params = [{transform_indices = @transform_0, window_bounds = array<i64: 2, 256>}, {transform_indices = @transform_1, window_bounds = array<i64: 256, 512>}, {transform_indices = @transform_2, window_bounds = array<i64: 1, 512>}, {transform_indices = @transform_3, window_bounds = array<i64: 512, 128>}, {transform_indices = @transform_4, window_bounds = array<i64: 1, 2, 128>}]} {
    %c0_i32 = arith.constant 0 : i32
    %0 = arith.cmpi eq, %arg1, %c0_i32 : i32
    %1 = arith.extui %0 : i1 to i32
    %c0_i32_0 = arith.constant 0 : i32
    %2 = arith.cmpi ne, %1, %c0_i32_0 : i32
    scf.if %2 {
      %cst_10 = arith.constant 0.000000e+00 : f32
      %12 = vector.broadcast %cst_10 : f32 to vector<2x512xf32>
      %c0_11 = arith.constant 0 : index
      %c0_12 = arith.constant 0 : index
      %13 = vector.load %arg7[%c0_11, %c0_12] : memref<2x512xf32, #tpu.memory_space<vmem>>, vector<2x512xf32>
      tpu.vector_store %arg7[%c0_11, %c0_12], %12 {strides = array<i32>} : memref<2x512xf32, #tpu.memory_space<vmem>>, vector<2x512xf32>,
    } else {
    }
    %c0 = arith.constant 0 : index
    %c0_1 = arith.constant 0 : index
    %3 = vector.load %arg7[%c0, %c0_1] : memref<2x512xf32, #tpu.memory_space<vmem>>, vector<2x512xf32>
    %c0_2 = arith.constant 0 : index
    %c0_3 = arith.constant 0 : index
    %4 = vector.load %arg2[%c0_2, %c0_3] : memref<2x256xbf16, #tpu.memory_space<vmem>>, vector<2x256xbf16>
    %c0_4 = arith.constant 0 : index
    %c0_5 = arith.constant 0 : index
    %5 = vector.load %arg3[%c0_4, %c0_5] : memref<256x512xbf16, #tpu.memory_space<vmem>>, vector<256x512xbf16>
    %cst = arith.constant dense<0.000000e+00> : vector<2x512xf32>
    %6 = tpu.matmul %4, %5, %cst {dimension_numbers = #tpu.dot_dimension_numbers<[1], [0], [0], [1], [0, 0, 1, 1], [], []>} : vector<2x256xbf16>, vector<256x512xbf16>, vector<2x512xf32> -> vector<2x512xf32>
    %7 = arith.addf %3, %6 : vector<2x512xf32>
    %c0_6 = arith.constant 0 : index
    %c0_7 = arith.constant 0 : index
    %8 = vector.load %arg7[%c0_6, %c0_7] : memref<2x512xf32, #tpu.memory_space<vmem>>, vector<2x512xf32>
    tpu.vector_store %arg7[%c0_6, %c0_7], %7 {strides = array<i32>} : memref<2x512xf32, #tpu.memory_space<vmem>>, vector<2x512xf32>,
    %c0_i32_8 = arith.constant 0 : i32
    %9 = arith.cmpi eq, %arg1, %c0_i32_8 : i32
    %10 = arith.extui %9 : i1 to i32
    %c0_i32_9 = arith.constant 0 : i32
    %11 = arith.cmpi ne, %10, %c0_i32_9 : i32
    scf.if %11 {
      %c0_10 = arith.constant 0 : index
      %c0_11 = arith.constant 0 : index
      %12 = vector.load %arg7[%c0_10, %c0_11] : memref<2x512xf32, #tpu.memory_space<vmem>>, vector<2x512xf32>
      %c0_12 = arith.constant 0 : index
      %c0_13 = arith.constant 0 : index
      %13 = vector.load %arg4[%c0_12, %c0_13] : memref<1x512xf32, #tpu.memory_space<vmem>>, vector<1x512xf32>
      %14 = vector.broadcast %13 : vector<1x512xf32> to vector<2x512xf32>
      %15 = arith.addf %12, %14 : vector<2x512xf32>
      %cst_14 = arith.constant 0.000000e+00 : f32
      %16 = vector.broadcast %cst_14 : f32 to vector<2x512xf32>
      %17 = arith.maximumf %15, %16 : vector<2x512xf32>
      %18 = arith.truncf %17 : vector<2x512xf32> to vector<2x512xbf16>
      %c0_15 = arith.constant 0 : index
      %c0_16 = arith.constant 0 : index
      %19 = vector.load %arg5[%c0_15, %c0_16] : memref<512x128xbf16, #tpu.memory_space<vmem>>, vector<512x128xbf16>
      %cst_17 = arith.constant dense<0.000000e+00> : vector<2x128xf32>
      %20 = tpu.matmul %18, %19, %cst_17 {dimension_numbers = #tpu.dot_dimension_numbers<[1], [0], [0], [1], [0, 0, 1, 1], [], []>} : vector<2x512xbf16>, vector<512x128xbf16>, vector<2x128xf32> -> vector<2x128xf32>
      %c0_18 = arith.constant 0 : index
      %c0_19 = arith.constant 0 : index
      %c0_20 = arith.constant 0 : index
      %21 = vector.load %arg6[%c0_18, %c0_19, %c0_20] : memref<1x2x128xf32, #tpu.memory_space<vmem>>, vector<1x2x128xf32>
      %22 = vector.shape_cast %21 : vector<1x2x128xf32> to vector<2x128xf32>
      %23 = vector.shape_cast %20 : vector<2x128xf32> to vector<1x2x128xf32>
      tpu.vector_store %arg6[%c0_18, %c0_19, %c0_20], %23 {strides = array<i32>} : memref<1x2x128xf32, #tpu.memory_space<vmem>>, vector<1x2x128xf32>,
    } else {
    }
    return
  }
  func.func @transform_0(%arg0: i32, %arg1: i32) -> (i32, i32) {
    %c0_i32 = arith.constant 0 : i32
    %c0_i32_0 = arith.constant 0 : i32
    return %c0_i32, %arg1 : i32, i32
  }
  func.func @transform_1(%arg0: i32, %arg1: i32) -> (i32, i32) {
    %c0_i32 = arith.constant 0 : i32
    return %arg1, %arg0 : i32, i32
  }
  func.func @transform_2(%arg0: i32, %arg1: i32) -> (i32, i32) {
    %c0_i32 = arith.constant 0 : i32
    %c0_i32_0 = arith.constant 0 : i32
    return %c0_i32, %arg0 : i32, i32
  }
  func.func @transform_3(%arg0: i32, %arg1: i32) -> (i32, i32) {
    %c0_i32 = arith.constant 0 : i32
    %c0_i32_0 = arith.constant 0 : i32
    return %arg0, %c0_i32 : i32, i32
  }
  func.func @transform_4(%arg0: i32, %arg1: i32) -> (i32, i32, i32) {
    %c0_i32 = arith.constant 0 : i32
    %c0_i32_0 = arith.constant 0 : i32
    %c0_i32_1 = arith.constant 0 : i32
    return %arg0, %c0_i32, %c0_i32_0 : i32, i32, i32
  }
}

</mosaic_0001>

<bundles_post_ra>
// kernel: net_forward.4
= control target key start
LH: loop header
LB: loop body
LE: loop exit
PB: predicated region body
PF: predicated region fallthrough
CT: control target
= control target key end

     0   :  { %s933_s12 = smov 0   ;;  %s1057_s0 = inlined_call_operand.vmem [shape: bf16[2,256,27], index: 0, kind: input, shape index: {}]   ;;  %s1058_s1 = inlined_call_operand.vmem [shape: bf16[27,16], index: 1, kind: input, shape index: {}]   ;;  %s1059_s2 = inlined_call_operand.vmem [shape: f32[1,16], index: 2, kind: input, shape index: {}]   ;;  %s1060_s3 = inlined_call_operand.vmem [shape: bf16[2,64,16], index: 3, kind: output, shape index: {}]  }
   0x1 LB: > { %s755_s13 = sadd.s32 4294967295, %s910_s12   ;;  %p759_p0 = scmp.ge.s32.totalorder %s910_s12, 1  ;;  %s910_s12 = sphi %s933_s12, %s13_s12  }
   0x2   : > { %p137_p1 = scmp.lt.s32.totalorder %s910_s12, 3 }
   0x4   : > { %p138_p2 = pnand %p759_p0, %p137_p1 }
   0x5   : > { %v886_v0 = vld [vmem:[%s1058_s1] sm:$0xff] (!%p138_p2)   ;;  %vm348_vm0 = vcmask (!%p138_p2), 1044480   ;;  %v887_v1 = vld [vmem:[%s1058_s1 + $0x8] sm:$0x3f] (!%p138_p2)   ;;  %vm349_vm1 = vcmask (!%p138_p2), 1045504   ;;  %p161_p3 = scmp.lt.s32.totalorder (!%p138_p2), %s755_s13, 1 }
   0x6   : > { %141 = sbr.rel (%p138_p2) target bundleno = 280 (0x118), region = 32  ;;  %837 = vmatprep.subr.bf16.mxu0 (!%p138_p2), %v886_v0  ;;  %873 = vmatprep.subr.bf16.mxu1 (!%p138_p2), %v886_v0  ;;  %v912_v2 = vmov (!%p138_p2), 65535   ;;  %vm299_vm2 = vcmask (!%p138_p2), 220160   ;;  %vm516_vm3 = vcmask (!%p138_p2), 130048   ;;  %v1003_v45 = vld [vmem:[%s1059_s2] ss:$0 sm:$0xff] (!%p138_p2) }
   0x7   : > { %838 = vmatpush3.bf16.msra.mxu0 (!%p138_p2), %v886_v0  ;;  %875 = vmatpush3.bf16.msra.mxu1 (!%p138_p2), %v886_v0  ;;  %v350_v3 = vsel (!%p138_p2), %vm348_vm0, 4294967295, %v912_v2  ;;  %vm691_vm4 = vcmask (!%p138_p2), 125952  }
   0x8   : > { %v351_v4 = vsel (!%p138_p2), %vm349_vm1, %v350_v3, 0 }
   0x9   : > { %v353_v5 = vand.u32 (!%p138_p2), %v887_v1, %v351_v4 }
   0xb   : > { %839 = vmatprep.subr.bf16.mxu0 (!%p138_p2), %v353_v5  ;;  %874 = vmatprep.subr.bf16.mxu1 (!%p138_p2), %v353_v5 }
   0xc   : > { %840 = vmatpush3.bf16.msra.mxu0 (!%p138_p2), %v353_v5  ;;  %876 = vmatpush3.bf16.msra.mxu1 (!%p138_p2), %v353_v5 }
   0xd   : > { %s1062_s13 = smov (!%p161_p3, %s755_s13), 1 }
   0xe   : > { %s809_s18 = sshll.u32 %s1062_s13, 7  ;;  %s810_s24 = sshll.u32 %s1062_s13, 5 }
   0xf   : > { %s953_s21 = scalar_lea.vmem %s1057_s0, %s809_s18  ;;  %s1017_s27 = scalar_lea.vmem %s1060_s3, %s810_s24 }
  0x10   : > { %v888_v6 = vld [vmem:[%s953_s21] sm:$0xff]   ;;  %v890_v8 = vld [vmem:[%s953_s21 + $0x8] sm:$0xff]   ;;  %v892_v10 = vld [vmem:[%s953_s21 + $0x10] sm:$0xff]  }
  0x11   : > { %v889_v7 = vld [vmem:[%s953_s21 + $0x40] sm:$0xff]   ;;  %841 = vmatprep.mubr.msk.bf16.mxu0 %vm299_vm2, %v888_v6  ;;  %v891_v9 = vld [vmem:[%s953_s21 + $0x48] sm:$0xff]   ;;  %v893_v11 = vld [vmem:[%s953_s21 + $0x50] sm:$0xff]  }
  0x12   : > { %857 = vmatprep.mubr.msk.bf16.mxu1 %vm299_vm2, %v889_v7  ;;  %842 = vmatmul.mubr.msk.bf16.vlgmr.msra.gmra.mrb[0].mxu0 %vm299_vm2, %v890_v8  ;;  %v894_v12 = vld [vmem:[%s953_s21 + $0x18] sm:$0xff]   ;;  %v896_v14 = vld [vmem:[%s953_s21 + $0x20] sm:$0xff]   ;;  %v898_v16 = vld [vmem:[%s953_s21 + $0x28] sm:$0xff]  }
  0x13   : > { %858 = vmatmul.mubr.msk.bf16.vlgmr.msra.gmra.mrb[0].mxu1 %vm299_vm2, %v891_v9  ;;  %845 = vmatprep.mubr.msk.bf16.mxu0 %vm299_vm2, %v892_v10  ;;  %v895_v13 = vld [vmem:[%s953_s21 + $0x58] sm:$0xff]   ;;  %v897_v15 = vld [vmem:[%s953_s21 + $0x60] sm:$0xff]   ;;  %v899_v17 = vld [vmem:[%s953_s21 + $0x68] sm:$0xff]  }
  0x14   : > { %861 = vmatprep.mubr.msk.bf16.mxu1 %vm299_vm2, %v893_v11  ;;  %v900_v18 = vld [vmem:[%s953_s21 + $0x30] sm:$0xff]   ;;  %v902_v20 = vld [vmem:[%s953_s21 + $0x38] sm:$0xff]  }
  0x15   : > { %v901_v19 = vld [vmem:[%s953_s21 + $0x70] sm:$0xff]   ;;  %v903_v21 = vld [vmem:[%s953_s21 + $0x78] sm:$0xff]  }
  0x1a   : > { %846 = vmatmul.mubr.msk.bf16.gmra.mrb[4].mxu0 %vm299_vm2, %v894_v12 }
  0x1b   : > { %862 = vmatmul.mubr.msk.bf16.gmra.mrb[4].mxu1 %vm299_vm2, %v895_v13  ;;  %849 = vmatprep.mubr.msk.bf16.mxu0 %vm299_vm2, %v896_v14 }
  0x1c   : > { %865 = vmatprep.mubr.msk.bf16.mxu1 %vm299_vm2, %v897_v15 }
  0x22   : > { %850 = vmatmul.mubr.msk.bf16.gmra.mrb[8].mxu0 %vm299_vm2, %v898_v16 }
  0x23   : > { %866 = vmatmul.mubr.msk.bf16.gmra.mrb[8].mxu1 %vm299_vm2, %v899_v17  ;;  %853 = vmatprep.mubr.msk.bf16.mxu0 %vm299_vm2, %v900_v18 }
  0x24   : > { %869 = vmatprep.mubr.msk.bf16.mxu1 %vm299_vm2, %v901_v19 }
  0x2a   : > { %854 = vmatmul.mubr.msk.bf16.gmra.mrb[12].mxu0 %vm299_vm2, %v902_v20 }
  0x2b   : > { %870 = vmatmul.mubr.msk.bf16.gmra.mrb[12].mxu1 %vm299_vm2, %v903_v21 }
  0xe5   : > { %v843_v22 = vpop.f32.mrb[0].mxu0 }
  0xe6   : > { %519 = vst.msk [vmem:[#allocation2 + $0x10] sm:$0xff] %vm516_vm3, %v843_v22  ;;  %v859_v23 = vpop.f32.mrb[0].mxu1  ;;  %v389_v24 = vpop.f32.mrb[1].mxu0 }
  0xe7   : > { %535 = vst.msk [vmem:[#allocation2 + $0x90] sm:$0xff] %vm516_vm3, %v859_v23  ;;  %517 = vst.msk [vmem:[#allocation2] sm:$0xff] %vm516_vm3, %v389_v24  ;;  %v453_v25 = vpop.f32.mrb[1].mxu1  ;;  %v844_v26 = vpop.f32.mrb[2].mxu0 }
  0xe8   : > { %533 = vst.msk [vmem:[#allocation2 + $0x80] sm:$0xff] %vm516_vm3, %v453_v25  ;;  %520 = vst.msk [vmem:[#allocation2 + $0x18] sm:$0xff] %vm516_vm3, %v844_v26  ;;  %v860_v27 = vpop.f32.mrb[2].mxu1  ;;  %v392_v28 = vpop.f32.mrb[3].mxu0 }
  0xe9   : > { %536 = vst.msk [vmem:[#allocation2 + $0x98] sm:$0xff] %vm516_vm3, %v860_v27  ;;  %518 = vst.msk [vmem:[#allocation2 + $0x8] sm:$0xff] %vm516_vm3, %v392_v28  ;;  %v456_v29 = vpop.f32.mrb[3].mxu1 }
  0xea   : > { %534 = vst.msk [vmem:[#allocation2 + $0x88] sm:$0xff] %vm516_vm3, %v456_v29 }
  0xed   : > { %v847_v30 = vpop.f32.mrb[4].mxu0 }
  0xee   : > { %523 = vst.msk [vmem:[#allocation2 + $0x30] sm:$0xff] %vm516_vm3, %v847_v30  ;;  %v863_v31 = vpop.f32.mrb[4].mxu1  ;;  %v405_v32 = vpop.f32.mrb[5].mxu0 }
  0xef   : > { %v551_v33 = vld [vmem:[#allocation2 + $0x10] ss:$2 sm:$0xff]  ;;  %v567_v34 = vld [vmem:[#allocation2 + $0x11] ss:$2 sm:$0xff]  ;;  %539 = vst.msk [vmem:[#allocation2 + $0xb0] sm:$0xff] %vm516_vm3, %v863_v31  ;;  %521 = vst.msk [vmem:[#allocation2 + $0x20] sm:$0xff] %vm516_vm3, %v405_v32 }
  0xf0   : > { %v469_v35 = vpop.f32.mrb[5].mxu1  ;;  %v848_v36 = vpop.f32.mrb[6].mxu0  ;;  %v581_v37 = vmax.f32 %v551_v33, %v567_v34  ;;  %v591_v38 = vld [vmem:[#allocation2 + $0x90] ss:$2 sm:$0xff]  ;;  %v607_v39 = vld [vmem:[#allocation2 + $0x91] ss:$2 sm:$0xff] }
  0xf1   : > { %v549_v40 = vld [vmem:[#allocation2] ss:$2 sm:$0xff]  ;;  %537 = vst.msk [vmem:[#allocation2 + $0xa0] sm:$0xff] %vm516_vm3, %v469_v35  ;;  %524 = vst.msk [vmem:[#allocation2 + $0x38] sm:$0xff] %vm516_vm3, %v848_v36  ;;  %v621_v41 = vmax.f32 %v591_v38, %v607_v39  ;;  %v565_v42 = vld [vmem:[#allocation2 + $0x1] ss:$2 sm:$0xff] }
  0xf2   : > { %v589_v43 = vld [vmem:[#allocation2 + $0x80] ss:$2 sm:$0xff]  ;;  %v605_v44 = vld [vmem:[#allocation2 + $0x81] ss:$2 sm:$0xff]  ;;  %v580_v46 = vmax.f32 %v549_v40, %v565_v42  ;;  %v864_v48 = vpop.f32.mrb[6].mxu1  ;;  %v408_v49 = vpop.f32.mrb[7].mxu0 }
  0xf3   : > { %v620_v47 = vmax.f32 %v589_v43, %v605_v44  ;;  %v629_v50 = vmax.f32 %v581_v37, %v621_v41  ;;  %540 = vst.msk [vmem:[#allocation2 + $0xb8] sm:$0xff] %vm516_vm3, %v864_v48  ;;  %522 = vst.msk [vmem:[#allocation2 + $0x28] sm:$0xff] %vm516_vm3, %v408_v49  ;;  %v472_v51 = vpop.f32.mrb[7].mxu1 }
  0xf4   : > { %538 = vst.msk [vmem:[#allocation2 + $0xa8] sm:$0xff] %vm516_vm3, %v472_v51 }
  0xf5   : > { %v628_v52 = vmax.f32 %v580_v46, %v620_v47  ;;  %v644_v53 = vadd.f32 %v1003_v45, %v629_v50  ;;  %v851_v54 = vpop.f32.mrb[8].mxu0 }
  0xf6   : > { %527 = vst.msk [vmem:[#allocation2 + $0x50] sm:$0xff] %vm516_vm3, %v851_v54  ;;  %v867_v56 = vpop.f32.mrb[8].mxu1  ;;  %v421_v57 = vpop.f32.mrb[9].mxu0 }
  0xf7   : > { %v643_v55 = vadd.f32 %v1003_v45, %v628_v52  ;;  %v652_v58 = vmax.f32 %v644_v53, 0.0  ;;  %543 = vst.msk [vmem:[#allocation2 + $0xd0] sm:$0xff] %vm516_vm3, %v867_v56  ;;  %525 = vst.msk [vmem:[#allocation2 + $0x40] sm:$0xff] %vm516_vm3, %v421_v57  ;;  %v485_v61 = vpop.f32.mrb[9].mxu1  ;;  %v852_v63 = vpop.f32.mrb[10].mxu0 }
  0xf8   : > { %v555_v59 = vld [vmem:[#allocation2 + $0x30] ss:$2 sm:$0xff]  ;;  %v571_v60 = vld [vmem:[#allocation2 + $0x31] ss:$2 sm:$0xff]  ;;  %541 = vst.msk [vmem:[#allocation2 + $0xc0] sm:$0xff] %vm516_vm3, %v485_v61  ;;  %v868_v0 = vpop.f32.mrb[10].mxu1 }
  0xf9   : > { %v651_v62 = vmax.f32 %v643_v55, 0.0  ;;  %v812_v1 = vpack.c.bf16 %v652_v58, %v652_v58  ;;  %v583_v2 = vmax.f32 %v555_v59, %v571_v60  ;;  %528 = vst.msk [vmem:[#allocation2 + $0x58] sm:$0xff] %vm516_vm3, %v852_v63  ;;  %544 = vst.msk [vmem:[#allocation2 + $0xd8] sm:$0xff] %vm516_vm3, %v868_v0  ;;  %v424_v3 = vpop.f32.mrb[11].mxu0  ;;  %v488_v4 = vpop.f32.mrb[11].mxu1 }
  0xfa   : > { %v595_v6 = vld [vmem:[#allocation2 + $0xb0] ss:$2 sm:$0xff]  ;;  %v611_v7 = vld [vmem:[#allocation2 + $0xb1] ss:$2 sm:$0xff]  ;;  %v553_v8 = vld [vmem:[#allocation2 + $0x20] ss:$2 sm:$0xff] }
  0xfb   : > { %v811_v5 = vpack.c.bf16 %v651_v62, %v651_v62  ;;  %526 = vst.msk [vmem:[#allocation2 + $0x48] sm:$0xff] %vm516_vm3, %v424_v3  ;;  %542 = vst.msk [vmem:[#allocation2 + $0xc8] sm:$0xff] %vm516_vm3, %v488_v4  ;;  %v623_v9 = vmax.f32 %v595_v6, %v611_v7  ;;  %v569_v10 = vld [vmem:[#allocation2 + $0x21] ss:$2 sm:$0xff]  ;;  %v593_v11 = vld [vmem:[#allocation2 + $0xa0] ss:$2 sm:$0xff] }
  0xfc   : > { %693 = vst.msk [vmem:[%s1017_s27 + $0x4] sm:$0xf] %vm691_vm4, %v812_v1  ;;  %v609_v12 = vld [vmem:[#allocation2 + $0xa1] ss:$2 sm:$0xff]  ;;  %v582_v13 = vmax.f32 %v553_v8, %v569_v10 }
  0xfd   : > { %692 = vst.msk [vmem:[%s1017_s27] sm:$0xf] %vm691_vm4, %v811_v5  ;;  %v622_v14 = vmax.f32 %v593_v11, %v609_v12  ;;  %v631_v15 = vmax.f32 %v583_v2, %v623_v9  ;;  %v855_v16 = vpop.f32.mrb[12].mxu0 }
  0xfe   : > { %531 = vst.msk [vmem:[#allocation2 + $0x70] sm:$0xff] %vm516_vm3, %v855_v16  ;;  %v871_v18 = vpop.f32.mrb[12].mxu1  ;;  %v437_v19 = vpop.f32.mrb[13].mxu0 }
  0xff   : > { %v630_v17 = vmax.f32 %v582_v13, %v622_v14  ;;  %v646_v20 = vadd.f32 %v1003_v45, %v631_v15  ;;  %547 = vst.msk [vmem:[#allocation2 + $0xf0] sm:$0xff] %vm516_vm3, %v871_v18  ;;  %529 = vst.msk [vmem:[#allocation2 + $0x60] sm:$0xff] %vm516_vm3, %v437_v19  ;;  %v501_v21 = vpop.f32.mrb[13].mxu1  ;;  %v856_v22 = vpop.f32.mrb[14].mxu0 }
 0x100   : > { %v559_v24 = vld [vmem:[#allocation2 + $0x50] ss:$2 sm:$0xff]  ;;  %v575_v25 = vld [vmem:[#allocation2 + $0x51] ss:$2 sm:$0xff]  ;;  %545 = vst.msk [vmem:[#allocation2 + $0xe0] sm:$0xff] %vm516_vm3, %v501_v21  ;;  %532 = vst.msk [vmem:[#allocation2 + $0x78] sm:$0xff] %vm516_vm3, %v856_v22 }
 0x101   : > { %v645_v23 = vadd.f32 %v1003_v45, %v630_v17  ;;  %v599_v26 = vld [vmem:[#allocation2 + $0xd0] ss:$2 sm:$0xff]  ;;  %v654_v27 = vmax.f32 %v646_v20, 0.0  ;;  %v585_v28 = vmax.f32 %v559_v24, %v575_v25  ;;  %v615_v29 = vld [vmem:[#allocation2 + $0xd1] ss:$2 sm:$0xff]  ;;  %v872_v31 = vpop.f32.mrb[14].mxu1 }
 0x102   : > { %v557_v30 = vld [vmem:[#allocation2 + $0x40] ss:$2 sm:$0xff]  ;;  %v625_v33 = vmax.f32 %v599_v26, %v615_v29  ;;  %v573_v34 = vld [vmem:[#allocation2 + $0x41] ss:$2 sm:$0xff]  ;;  %548 = vst.msk [vmem:[#allocation2 + $0xf8] sm:$0xff] %vm516_vm3, %v872_v31  ;;  %v440_v36 = vpop.f32.mrb[15].mxu0 }
 0x103   : > { %v653_v32 = vmax.f32 %v645_v23, 0.0  ;;  %v597_v35 = vld [vmem:[#allocation2 + $0xc0] ss:$2 sm:$0xff]  ;;  %v814_v37 = vpack.c.bf16 %v654_v27, %v654_v27  ;;  %v584_v38 = vmax.f32 %v557_v30, %v573_v34  ;;  %v613_v39 = vld [vmem:[#allocation2 + $0xc1] ss:$2 sm:$0xff]  ;;  %530 = vst.msk [vmem:[#allocation2 + $0x68] sm:$0xff] %vm516_vm3, %v440_v36 }
 0x104   : > { %v504_v40 = vpop.f32.mrb[15].mxu1  ;;  %v633_v42 = vmax.f32 %v585_v28, %v625_v33  ;;  %v624_v43 = vmax.f32 %v597_v35, %v613_v39 }
 0x105   : > { %v813_v41 = vpack.c.bf16 %v653_v32, %v653_v32  ;;  %546 = vst.msk [vmem:[#allocation2 + $0xe8] sm:$0xff] %vm516_vm3, %v504_v40 }
 0x106   : > { %695 = vst.msk [vmem:[%s1017_s27 + $0xc] sm:$0xf] %vm691_vm4, %v814_v37  ;;  %v648_v44 = vadd.f32 %v1003_v45, %v633_v42  ;;  %v632_v46 = vmax.f32 %v584_v38, %v624_v43 }
 0x107   : > { %694 = vst.msk [vmem:[%s1017_s27 + $0x8] sm:$0xf] %vm691_vm4, %v813_v41  ;;  %v563_v47 = vld [vmem:[#allocation2 + $0x70] ss:$2 sm:$0xff]  ;;  %v579_v48 = vld [vmem:[#allocation2 + $0x71] ss:$2 sm:$0xff] }
 0x108   : > { %v656_v49 = vmax.f32 %v648_v44, 0.0  ;;  %v647_v50 = vadd.f32 %v1003_v45, %v632_v46  ;;  %v587_v51 = vmax.f32 %v563_v47, %v579_v48 }
 0x109   : > { %v603_v52 = vld [vmem:[#allocation2 + $0xf0] ss:$2 sm:$0xff]  ;;  %v619_v53 = vld [vmem:[#allocation2 + $0xf1] ss:$2 sm:$0xff] }
 0x10a   : > { %v816_v54 = vpack.c.bf16 %v656_v49, %v656_v49  ;;  %v655_v55 = vmax.f32 %v647_v50, 0.0  ;;  %v627_v56 = vmax.f32 %v603_v52, %v619_v53  ;;  %v561_v57 = vld [vmem:[#allocation2 + $0x60] ss:$2 sm:$0xff]  ;;  %v577_v58 = vld [vmem:[#allocation2 + $0x61] ss:$2 sm:$0xff] }
 0x10b   : > { %v586_v59 = vmax.f32 %v561_v57, %v577_v58 }
 0x10c   : > { %v601_v60 = vld [vmem:[#allocation2 + $0xe0] ss:$2 sm:$0xff]  ;;  %v617_v61 = vld [vmem:[#allocation2 + $0xe1] ss:$2 sm:$0xff]  ;;  %697 = vst.msk [vmem:[%s1017_s27 + $0x14] sm:$0xf] %vm691_vm4, %v816_v54  ;;  %v815_v62 = vpack.c.bf16 %v655_v55, %v655_v55  ;;  %v635_v63 = vmax.f32 %v587_v51, %v627_v56 }
 0x10d   : > { %v626_v0 = vmax.f32 %v601_v60, %v617_v61 }
 0x10e   : > { %696 = vst.msk [vmem:[%s1017_s27 + $0x10] sm:$0xf] %vm691_vm4, %v815_v62  ;;  %v650_v1 = vadd.f32 %v1003_v45, %v635_v63 }
 0x10f   : > { %v634_v2 = vmax.f32 %v586_v59, %v626_v0 }
 0x110   : > { %v658_v3 = vmax.f32 %v650_v1, 0.0 }
 0x111   : > { %v649_v4 = vadd.f32 %v1003_v45, %v634_v2 }
 0x112   : > { %v818_v5 = vpack.c.bf16 %v658_v3, %v658_v3 }
 0x113   : > { %v657_v6 = vmax.f32 %v649_v4, 0.0 }
 0x114   : > { %699 = vst.msk [vmem:[%s1017_s27 + $0x1c] sm:$0xf] %vm691_vm4, %v818_v5 }
 0x115   : > { %v817_v7 = vpack.c.bf16 %v657_v6, %v657_v6 }
 0x117   : > { %698 = vst.msk [vmem:[%s1017_s27 + $0x18] sm:$0xf] %vm691_vm4, %v817_v7 }
 0x118 PF: > { %s13_s12 = sadd.s32 1, %s910_s12  }
 0x119   : > { %p10_p4 = scmp.ge.s32.totalorder %s13_s12, 4  }
 0x11b   :  { %12 = sbr.rel (!%p10_p4) target bundleno = 1 (0x1), region = 93 }

// kernel: net_forward.5
= control target key start
LH: loop header
LB: loop body
LE: loop exit
PB: predicated region body
PF: predicated region fallthrough
CT: control target
= control target key end

     0   :  { %s2708_s15 = smov 0   ;;  %s3189_s0 = inlined_call_operand.vmem [shape: bf16[2,60,16], index: 0, kind: input, shape index: {}]   ;;  %s3190_s1 = inlined_call_operand.vmem [shape: bf16[2,60,16], index: 1, kind: input, shape index: {}]   ;;  %s3191_s2 = inlined_call_operand.vmem [shape: bf16[144,32], index: 2, kind: input, shape index: {}]   ;;  %s3192_s3 = inlined_call_operand.vmem [shape: f32[1,32], index: 3, kind: input, shape index: {}]   ;;  %s3193_s4 = inlined_call_operand.vmem [shape: bf16[2,20,32], index: 4, kind: output, shape index: {}]  }
   0x1 LB: > { %s2119_s16 = sadd.s32 4294967295, %s2679_s15   ;;  %p2123_p0 = scmp.ge.s32.totalorder %s2679_s15, 1  ;;  %s2679_s15 = sphi %s2708_s15, %s14_s15  }
   0x2   : > { %p172_p1 = scmp.lt.s32.totalorder %s2679_s15, 3 }
   0x4   : > { %p173_p2 = pnand %p2123_p0, %p172_p1 }
   0x5   : > { %v2625_v0 = vld [vmem:[%s3191_s2 + $0x8] sm:$0xff] (!%p173_p2)   ;;  %v2681_v1 = vmov (!%p173_p2), 0.0   ;;  %v2626_v2 = vld [vmem:[%s3191_s2 + $0x20] sm:$0xff] (!%p173_p2)   ;;  %vm2682_vm0 = vmmov (!%p173_p2), 0   ;;  %p203_p3 = scmp.lt.s32.totalorder (!%p173_p2), %s2119_s16, 1  ;;  %vm274_vm2 = vcmask (!%p173_p2), 130048  }
   0x6   : > { %176 = sbr.rel (%p173_p2) target bundleno = 471 (0x1d7), region = 36  ;;  %2314 = vmatprep.subr.bf16.mxu0 (!%p173_p2), %v2681_v1  ;;  %2356 = vmatprep.subr.bf16.mxu1 (!%p173_p2), %v2681_v1  ;;  %vm244_vm1 = vsmask.f32 (!%p173_p2), 7424  ;;  %v2629_v26 = vld [vmem:[%s3191_s2] sm:$0xff] (!%p173_p2)   ;;  %v2632_v30 = vld [vmem:[%s3191_s2 + $0x18] sm:$0xff] (!%p173_p2)   ;;  %v2635_v47 = vld [vmem:[%s3191_s2 + $0x10] sm:$0xff] (!%p173_p2)  }
   0x7   : > { %2315 = vmatpush3.bf16.msra.mxu0 (!%p173_p2), %v2625_v0  ;;  %2316 = vmatprep.mubr.msk.bf16.mxu0 (!%p173_p2), %vm2682_vm0, %v2681_v1  ;;  %v2636_v48 = vld [vmem:[%s3191_s2 + $0x28] sm:$0xff] (!%p173_p2)   ;;  %vm1009_vm3 = vcmask (!%p173_p2), 1045504   ;;  %vm416_vm4 = vcmask (!%p173_p2), 1046528   ;;  %vm826_vm5 = vsmask.f32 (!%p173_p2), 6400  ;;  %vm498_vm6 = vcmask (!%p173_p2), 261120  }
   0x8   : > { %2357 = vmatpush3.bf16.msra.mxu1 (!%p173_p2), %v2626_v2  ;;  %2328 = vmatprep.subr.bf16.mxu0 (!%p173_p2), %v2681_v1  ;;  %vm2047_vm7 = vcmask (!%p173_p2), 257024   ;;  %vm2050_vm8 = vcmask (!%p173_p2), 254976  }
   0x9   : > { %2358 = vmatprep.mubr.msk.bf16.mxu1 (!%p173_p2), %vm2682_vm0, %v2681_v1  ;;  %2370 = vmatprep.subr.bf16.mxu1 (!%p173_p2), %v2681_v1 }
   0xd   : > { %s3195_s16 = smov (!%p203_p3, %s2119_s16), 1 }
   0xe   : > { %s2237_s21 = sshll.u32 %s3195_s16, 5  ;;  %s2614_s12 = smul.u32 12, %s3195_s16 }
   0xf   : > { %s2736_s24 = scalar_lea.vmem %s3189_s0, %s2237_s21  ;;  %s2741_s27 = scalar_lea.vmem %s3190_s1, %s2237_s21 }
  0x10   : > { %v219_v3 = vld [vmem:[%s2736_s24] sm:$0xf]  ;;  %v2745_v4 = vld [vmem:[%s2736_s24 + $0x4] sm:$0xf]  ;;  %v2749_v6 = vld [vmem:[%s2736_s24 + $0x8] sm:$0xff]   ;;  %s217_s17 = scalar_lea.vmem %s3193_s4, %s2614_s12 }
  0x11   : > { %v2129_v5 = vcombine.low %v219_v3, %v2745_v4  ;;  %v509_v7 = vld [vmem:[%s2741_s27] sm:$0xf]  ;;  %v2753_v8 = vld [vmem:[%s2741_s27 + $0x4] sm:$0xf]  ;;  %v253_v11 = vshll.u32 %v2749_v6, 16  ;;  %v2758_v13 = vld [vmem:[%s2741_s27 + $0x8] sm:$0xff]  }
  0x12   : > { %v2146_v12 = vcombine.low %v509_v7, %v2753_v8  ;;  %v2761_v14 = vld [vmem:[%s2736_s24 + $0x10] sm:$0xf]  ;;  %v226_v15 = vld [vmem:[%s2736_s24 + $0x14] sm:$0x1]  ;;  %v542_v22 = vshll.u32 %v2758_v13, 16  ;;  %v257_v28 = vshrl.u32 %v2749_v6, 16 }
  0x13   : > { %v246_v9 = vshrl.u32 %v2129_v5, 16  ;;  %v248_v10 = vshll.u32 %v2129_v5, 16  ;;  %v2765_v16 = vld [vmem:[%s2741_s27 + $0x10] sm:$0xf]  ;;  %v255_v18 = vrot.slane %v253_v11, 1  ;;  %v2770_v23 = vcombine.low %v2761_v14, %v226_v15 }
  0x14   : > { %v535_v19 = vshrl.u32 %v2146_v12, 16  ;;  %v537_v20 = vshll.u32 %v2146_v12, 16  ;;  %v516_v21 = vld [vmem:[%s2741_s27 + $0x14] sm:$0x1]  ;;  %v544_v29 = vrot.slane %v542_v22, 1  ;;  %v546_v34 = vshrl.u32 %v2758_v13, 16 }
  0x15   : > { %v250_v17 = vrot.slane %v248_v10, 1  ;;  %v2773_v24 = vcombine.low %v2765_v16, %v516_v21  ;;  %v261_v31 = vshll.u32 %v2770_v23, 16  ;;  %v259_v37 = vor.u32 %v257_v28, %v255_v18  ;;  %v410_v49 = vld [vmem:[%s2736_s24] sm:$0xe]  ;;  %v2833_v50 = vld [vmem:[%s2736_s24 + $0xc] sm:$0xff]  }
  0x16   : > { %v539_v27 = vrot.slane %v537_v20, 1  ;;  %v548_v39 = vor.u32 %v546_v34, %v544_v29  ;;  %v265_v43 = vshrl.u32 %v2770_v23, 16  ;;  %v2838_v51 = vld [vmem:[%s2736_s24 + $0x8] sm:$0xf]  ;;  %v1589_v52 = vld [vmem:[%s2736_s24 + $0x4] sm:$0xc]  ;;  %v2136_v53 = vcombine.low %v2761_v14, %v2761_v14 }
  0x17   : > { %v251_v25 = vor.u32 %v250_v17, %v246_v9  ;;  %v550_v35 = vshll.u32 %v2773_v24, 16  ;;  %v263_v38 = vrot.slane %v261_v31, 1  ;;  %v554_v44 = vshrl.u32 %v2773_v24, 16  ;;  %v698_v54 = vld [vmem:[%s2741_s27] sm:$0xe]  ;;  %v2642_v11 = vld [vmem:[%s3191_s2 + $0x30] sm:$0xff]  }
  0x18   : > { %v540_v33 = vor.u32 %v539_v27, %v535_v19  ;;  %v2209_v55 = vcombine.low %v1589_v52, %v2838_v51  ;;  %v1596_v56 = vrot.slane %v2833_v50, 2  ;;  %v2141_v57 = vcombine.low %v410_v49, %v2745_v4  ;;  %v2850_v59 = vld [vmem:[%s2736_s24 + $0x14] sm:$0xf]  ;;  %v1395_v60 = vld [vmem:[%s2736_s24 + $0x18] sm:$0x3] }
  0x19   : > { %v256_v32 = vsel %vm244_vm1, %v251_v25, %v255_v18  ;;  %v552_v40 = vrot.slane %v550_v35, 1  ;;  %v264_v41 = vsel %vm244_vm1, %v259_v37, %v263_v38  ;;  %v267_v45 = vor.u32 %v265_v43, %v263_v38  ;;  %v2890_v14 = vld [vmem:[%s2736_s24 + $0x8] sm:$0xf]  ;;  %v2899_v18 = vld [vmem:[%s2736_s24 + $0xc] sm:$0xff]   ;;  %v804_v20 = vld [vmem:[%s2736_s24 + $0x14] sm:$0xf] }
  0x1a   : > { %2317 = vmatmul.mubr.msk.bf16.vlgmr.msra.gmra.mrb[0].mxu0 %vm274_vm2, %v256_v32  ;;  %v545_v36 = vsel %vm244_vm1, %v540_v33, %v544_v29  ;;  %v2153_v58 = vcombine.low %v2765_v16, %v2765_v16  ;;  %v1595_v61 = vrot.slane %v2209_v55, 2  ;;  %v2158_v62 = vcombine.low %v698_v54, %v2753_v8  ;;  %v808_v25 = vld [vmem:[%s2736_s24 + $0x18] sm:$0x3]  ;;  %v2646_v43 = vld [vmem:[%s3191_s2 + $0x8] sm:$0xff]   ;;  %v1003_v54 = vld [vmem:[%s2736_s24 + $0x4] sm:$0xc] }
  0x1b   : > { %2329 = vmatpush3.bf16.msra.mxu0 %v2629_v26  ;;  %2320 = vmatprep.mubr.msk.bf16.mxu0 %vm2682_vm0, %v2681_v1  ;;  %v553_v42 = vsel %vm244_vm1, %v548_v39, %v552_v40  ;;  %v556_v46 = vor.u32 %v554_v44, %v552_v40  ;;  %v417_v0 = vrot.slane %v2141_v57, 1  ;;  %v418_v2 = vrot.slane %v2749_v6, 1  ;;  %v805_v37 = vld [vmem:[%s2736_s24 + $0x18] sm:$0x1]  ;;  %v2645_v39 = vld [vmem:[%s3191_s2 + $0x40] sm:$0xff]   ;;  %v2957_v55 = vld [vmem:[%s2741_s27 + $0x8] sm:$0xff]  }
  0x1c   : > { %2359 = vmatmul.mubr.msk.bf16.vlgmr.msra.gmra.mrb[0].mxu1 %vm274_vm2, %v545_v36  ;;  %2342 = vmatprep.subr.bf16.mxu0 %v2681_v1  ;;  %v2856_v63 = vsel %vm1009_vm3, %v1595_v61, %v1596_v56  ;;  %v2862_v3 = vcombine.low %v2850_v59, %v1395_v60  ;;  %v704_v4 = vrot.slane %v2158_v62, 1  ;;  %v707_v15 = vrot.slane %v2773_v24, 1  ;;  %v2965_v62 = vld [vmem:[%s2741_s27 + $0x10] sm:$0xf] }
  0x1d   : > { %2371 = vmatpush3.bf16.msra.mxu1 %v2632_v30  ;;  %2362 = vmatprep.mubr.msk.bf16.mxu1 %vm2682_vm0, %v2681_v1  ;;  %v419_v8 = vsel %vm416_vm4, %v417_v0, %v418_v2  ;;  %v839_v24 = vshll.u32 %v2899_v18, 16  ;;  %v2912_v26 = vcombine.low %v804_v20, %v808_v25  ;;  %v928_v36 = vrot.slane %v2899_v18, 1  ;;  %v1108_v0 = vld [vmem:[%s2741_s27 + $0x14] sm:$0x1] }
  0x1e   : > { %2384 = vmatprep.subr.bf16.mxu1 %v2681_v1  ;;  %v1598_v7 = vrot.slane %v2862_v3, 2  ;;  %v2170_v44 = vcombine.low %v804_v20, %v805_v37  ;;  %v2175_v57 = vcombine.low %v1003_v54, %v2890_v14  ;;  %v1134_v61 = vshll.u32 %v2957_v55, 16  ;;  %v2657_v37 = vld [vmem:[%s3191_s2 + $0x18] sm:$0xff]   ;;  %v2662_v54 = vld [vmem:[%s3191_s2 + $0x28] sm:$0xff]  }
  0x1f   : > { %v841_v30 = vrot.slane %v839_v24, 2  ;;  %v845_v33 = vshrl.u32 %v2912_v26, 16  ;;  %v848_v34 = vshll.u32 %v2912_v26, 16  ;;  %v1422_v25 = vshrl.u32 %v2833_v50, 16 }
  0x20   : > { %v2876_v9 = vsel %vm1009_vm3, %v1596_v56, %v1598_v7 }
  0x21   : > { %v847_v40 = vrot.slane %v845_v33, 1 }
  0x22   : > { %2321 = vmatmul.mubr.msk.bf16.gmra.mrb[4].mxu0 %vm274_vm2, %v264_v41  ;;  %v850_v41 = vrot.slane %v848_v34, 2  ;;  %v1431_v34 = vshrl.u32 %v2862_v3, 16 }
  0x23   : > { %2324 = vmatprep.mubr.msk.bf16.mxu0 %vm2682_vm0, %v2681_v1 }
  0x24   : > { %2363 = vmatmul.mubr.msk.bf16.gmra.mrb[4].mxu1 %vm274_vm2, %v553_v42 }
  0x25   : > { %2366 = vmatprep.mubr.msk.bf16.mxu1 %vm2682_vm0, %v2681_v1 }
  0x2a   : > { %2325 = vmatmul.mubr.msk.bf16.gmra.mrb[8].mxu0 %vm274_vm2, %v267_v45  ;;  %v851_v45 = vor.u32 %v850_v41, %v847_v40  ;;  %v2658_v40 = vld [vmem:[%s3191_s2 + $0x10] sm:$0xff]  }
  0x2b   : > { %2330 = vmatprep.mubr.msk.bf16.mxu0 %vm2682_vm0, %v2681_v1 }
  0x2c   : > { %2367 = vmatmul.mubr.msk.bf16.gmra.mrb[8].mxu1 %vm274_vm2, %v556_v46  ;;  %v930_v46 = vrot.slane %v2170_v44, 1  ;;  %v2187_v44 = vcombine.low %v2965_v62, %v2965_v62 }
  0x2d   : > { %2372 = vmatprep.mubr.msk.bf16.mxu1 %vm2682_vm0, %v2681_v1 }
  0x2e   : > { %v931_v52 = vsel %vm416_vm4, %v928_v36, %v930_v46 }
  0x32   : > { %2331 = vmatmul.mubr.msk.bf16.vlgmr.msra.gmra.mrb[0].mxu0 %vm274_vm2, %v2129_v5  ;;  %v705_v5 = vrot.slane %v2758_v13, 1 }
  0x33   : > { %2343 = vmatpush3.bf16.msra.mxu0 %v2635_v47  ;;  %2334 = vmatprep.mubr.msk.bf16.mxu0 %vm2682_vm0, %v2681_v1  ;;  %v1101_v47 = vld [vmem:[%s2741_s27] sm:$0xf] }
  0x34   : > { %2373 = vmatmul.mubr.msk.bf16.vlgmr.msra.gmra.mrb[12].mxu1 %vm274_vm2, %v2146_v12  ;;  %2398 = vmatprep.subr.bf16.mxu0 %v2681_v1  ;;  %v706_v10 = vsel %vm416_vm4, %v704_v4, %v705_v5  ;;  %v420_v12 = vrot.slane %v2770_v23, 1  ;;  %v708_v19 = vsel %vm416_vm4, %v705_v5, %v707_v15  ;;  %v836_v23 = vshrl.u32 %v2899_v18, 16 }
  0x35   : > { %2385 = vmatpush3.bf16.msra.mxu1 %v2636_v48  ;;  %2376 = vmatprep.mubr.msk.bf16.mxu1 %vm2682_vm0, %v2681_v1  ;;  %v2941_v48 = vld [vmem:[%s2741_s27 + $0x4] sm:$0xf]  ;;  %v1011_v4 = vrot.slane %v2899_v18, 2 }
  0x36   : > { %2412 = vmatprep.subr.bf16.mxu1 %v2681_v1  ;;  %v421_v16 = vsel %vm416_vm4, %v418_v2, %v420_v12  ;;  %v838_v29 = vrot.slane %v836_v23, 1  ;;  %v1010_v2 = vrot.slane %v2175_v57, 2  ;;  %v2663_v57 = vld [vmem:[%s3191_s2 + $0x38] sm:$0xff]  }
  0x38   : > { %v842_v32 = vor.u32 %v841_v30, %v838_v29  ;;  %v1424_v29 = vrot.slane %v1422_v25, 1 }
  0x3a   : > { %2335 = vmatmul.mubr.msk.bf16.gmra.mrb[4].mxu0 %vm274_vm2, %v2749_v6  ;;  %v2641_v6 = vld [vmem:[%s3191_s2 + $0x38] sm:$0xff]   ;;  %v852_v49 = vsel %vm826_vm5, %v842_v32, %v851_v45 }
  0x3b   : > { %2338 = vmatprep.mubr.msk.bf16.mxu0 %vm2682_vm0, %v2681_v1 }
  0x3c   : > { %2377 = vmatmul.mubr.msk.bf16.gmra.mrb[16].mxu1 %vm274_vm2, %v2758_v13  ;;  %v800_v13 = vld [vmem:[%s2736_s24 + $0x4] sm:$0xe] }
  0x3d   : > { %2380 = vmatprep.mubr.msk.bf16.mxu1 %vm2682_vm0, %v2681_v1  ;;  %v2163_v17 = vcombine.low %v800_v13, %v2890_v14  ;;  %v2653_v13 = vld [vmem:[%s3191_s2] sm:$0xff]   ;;  %v1138_v14 = vshrl.u32 %v2957_v55, 16 }
  0x3f   : > { %v828_v21 = vshrl.u32 %v2163_v17, 16  ;;  %v831_v22 = vshll.u32 %v2163_v17, 16  ;;  %v927_v35 = vrot.slane %v2163_v17, 1  ;;  %v1387_v17 = vld [vmem:[%s2736_s24 + $0x4] sm:$0xe] }
  0x41   : > { %v830_v27 = vrot.slane %v828_v21, 1  ;;  %v833_v28 = vrot.slane %v831_v22, 2  ;;  %v929_v42 = vsel %vm416_vm4, %v927_v35, %v928_v36  ;;  %v2197_v21 = vcombine.low %v1387_v17, %v2838_v51 }
  0x42   : > { %2339 = vmatmul.mubr.msk.bf16.gmra.mrb[8].mxu0 %vm274_vm2, %v2136_v53  ;;  %v2947_v53 = vcombine.low %v1101_v47, %v2941_v48  ;;  %v1434_v35 = vshll.u32 %v2862_v3, 16  ;;  %v1514_v47 = vrot.slane %v2833_v50, 1 }
  0x43   : > { %2344 = vmatprep.mubr.msk.bf16.mxu0 %vm2682_vm0, %v2681_v1  ;;  %v834_v31 = vor.u32 %v833_v28, %v830_v27  ;;  %v1414_v23 = vshrl.u32 %v2197_v21, 16  ;;  %v1417_v24 = vshll.u32 %v2197_v21, 16 }
  0x44   : > { %2381 = vmatmul.mubr.msk.bf16.gmra.mrb[20].mxu1 %vm274_vm2, %v2153_v58  ;;  %v1129_v56 = vshll.u32 %v2947_v53, 16  ;;  %v1127_v58 = vshrl.u32 %v2947_v53, 16 }
  0x45   : > { %2386 = vmatprep.mubr.msk.bf16.mxu1 %vm2682_vm0, %v2681_v1  ;;  %v843_v38 = vsel %vm826_vm5, %v834_v31, %v842_v32  ;;  %v1416_v51 = vrot.slane %v1414_v23, 1  ;;  %v1419_v28 = vrot.slane %v1417_v24, 2  ;;  %v2669_v23 = vld [vmem:[%s3191_s2 + $0x40] sm:$0xff]  }
  0x46   : > { %v1131_v60 = vrot.slane %v1129_v56, 1 }
  0x47   : > { %v1420_v32 = vor.u32 %v1419_v28, %v1416_v51 }
  0x48   : > { %v1132_v5 = vor.u32 %v1131_v60, %v1127_v58  ;;  %v1691_v58 = vld [vmem:[%s2741_s27 + $0x4] sm:$0xe]  ;;  %v1692_v60 = vld [vmem:[%s2741_s27 + $0x8] sm:$0xf] }
  0x4a   : > { %2345 = vmatmul.mubr.msk.bf16.vlgmr.msra.gmra.mrb[0].mxu0 %vm274_vm2, %v419_v8  ;;  %v1136_v8 = vrot.slane %v1134_v61, 1 }
  0x4b   : > { %2399 = vmatpush3.bf16.msra.mxu0 %v2641_v6  ;;  %2348 = vmatprep.mubr.msk.bf16.mxu0 %vm2682_vm0, %v2681_v1  ;;  %v2975_v6 = vcombine.low %v2965_v62, %v1108_v0  ;;  %v2214_v62 = vcombine.low %v1691_v58, %v1692_v60 }
  0x4c   : > { %2387 = vmatmul.mubr.msk.bf16.vlgmr.msra.gmra.mrb[24].mxu1 %vm274_vm2, %v706_v10  ;;  %2426 = vmatprep.subr.bf16.mxu0 %v2681_v1  ;;  %v1012_v10 = vsel %vm1009_vm3, %v1010_v2, %v1011_v4  ;;  %v1140_v18 = vor.u32 %v1138_v14, %v1136_v8  ;;  %v3077_v2 = vld [vmem:[%s2741_s27 + $0xc] sm:$0xff]  }
  0x4d   : > { %2413 = vmatpush3.bf16.msra.mxu1 %v2642_v11  ;;  %2390 = vmatprep.mubr.msk.bf16.mxu1 %vm2682_vm0, %v2681_v1  ;;  %v2652_v11 = vld [vmem:[%s3191_s2 + $0x20] sm:$0xff]   ;;  %v1146_v27 = vshrl.u32 %v2975_v6, 16  ;;  %v1817_v28 = vrot.slane %v2214_v62, 1 }
  0x4e   : > { %2440 = vmatprep.subr.bf16.mxu1 %v2681_v1 }
  0x52   : > { %2349 = vmatmul.mubr.msk.bf16.gmra.mrb[4].mxu0 %vm274_vm2, %v421_v16  ;;  %v1013_v16 = vrot.slane %v2912_v26, 2  ;;  %v1425_v26 = vshll.u32 %v2833_v50, 16 }
  0x53   : > { %2352 = vmatprep.mubr.msk.bf16.mxu0 %vm2682_vm0, %v2681_v1 }
  0x54   : > { %2391 = vmatmul.mubr.msk.bf16.gmra.mrb[28].mxu1 %vm274_vm2, %v708_v19  ;;  %v1014_v20 = vsel %vm1009_vm3, %v1011_v4, %v1013_v16  ;;  %v1427_v30 = vrot.slane %v1425_v26, 2  ;;  %v1718_v4 = vshrl.u32 %v2214_v62, 16 }
  0x55   : > { %2394 = vmatprep.mubr.msk.bf16.mxu1 %vm2682_vm0, %v2681_v1 }
  0x56   : > { %v1428_v33 = vor.u32 %v1427_v30, %v1424_v29  ;;  %v1696_v29 = vld [vmem:[%s2741_s27 + $0x18] sm:$0x1] }
  0x58   : > { %v1429_v36 = vsel %vm826_vm5, %v1420_v32, %v1428_v33 }
  0x5a   : > { %2353 = vmatmul.mubr.msk.bf16.gmra.mrb[8].mxu0 %vm274_vm2, %v420_v12  ;;  %v1137_v12 = vsel %vm244_vm1, %v1132_v5, %v1136_v8  ;;  %v1721_v5 = vshll.u32 %v2214_v62, 16  ;;  %v1726_v8 = vshrl.u32 %v3077_v2, 16 }
  0x5b   : > { %2400 = vmatprep.mubr.msk.bf16.mxu0 %vm2682_vm0, %v2681_v1 }
  0x5c   : > { %2395 = vmatmul.mubr.msk.bf16.gmra.mrb[32].mxu1 %vm274_vm2, %v707_v15  ;;  %v1142_v15 = vshll.u32 %v2975_v6, 16  ;;  %v1728_v14 = vrot.slane %v1726_v8, 1 }
  0x5d   : > { %2414 = vmatprep.mubr.msk.bf16.mxu1 %vm2682_vm0, %v2681_v1 }
  0x5e   : > { %v1144_v19 = vrot.slane %v1142_v15, 1 }
  0x60   : > { %v1145_v22 = vsel %vm244_vm1, %v1140_v18, %v1144_v19  ;;  %v1148_v31 = vor.u32 %v1146_v27, %v1144_v19 }
  0x62   : > { %2401 = vmatmul.mubr.msk.bf16.vlgmr.msra.gmra.mrb[12].mxu0 %vm274_vm2, %v843_v38  ;;  %v1433_v38 = vrot.slane %v1431_v34, 1 }
  0x63   : > { %2427 = vmatpush3.bf16.msra.mxu0 %v2645_v39  ;;  %2404 = vmatprep.mubr.msk.bf16.mxu0 %vm2682_vm0, %v2681_v1  ;;  %v1436_v39 = vrot.slane %v1434_v35, 2 }
  0x64   : > { %2415 = vmatmul.mubr.msk.bf16.vlgmr.msra.gmra.mrb[36].mxu1 %vm274_vm2, %v929_v42  ;;  %2482 = vmatprep.subr.bf16.mxu0 %v2681_v1 }
  0x65   : > { %2441 = vmatpush3.bf16.msra.mxu1 %v2646_v43  ;;  %2418 = vmatprep.mubr.msk.bf16.mxu1 %vm2682_vm0, %v2681_v1  ;;  %v1437_v41 = vor.u32 %v1436_v39, %v1433_v38  ;;  %v1290_v43 = vld [vmem:[%s2741_s27] sm:$0xe] }
  0x66   : > { %2454 = vmatprep.subr.bf16.mxu1 %v2681_v1 }
  0x67   : > { %v1438_v42 = vsel %vm826_vm5, %v1428_v33, %v1437_v41 }
  0x6a   : > { %2405 = vmatmul.mubr.msk.bf16.gmra.mrb[16].mxu0 %vm274_vm2, %v852_v49  ;;  %v1392_v49 = vld [vmem:[%s2736_s24 + $0x18] sm:$0x1] }
  0x6b   : > { %2408 = vmatprep.mubr.msk.bf16.mxu0 %vm2682_vm0, %v2681_v1  ;;  %v2204_v56 = vcombine.low %v2850_v59, %v1392_v49  ;;  %v1299_v59 = vrot.slane %v2975_v6, 1  ;;  %v1729_v6 = vshll.u32 %v3077_v2, 16 }
  0x6c   : > { %2419 = vmatmul.mubr.msk.bf16.gmra.mrb[40].mxu1 %vm274_vm2, %v931_v52 }
  0x6d   : > { %2422 = vmatprep.mubr.msk.bf16.mxu1 %vm2682_vm0, %v2681_v1  ;;  %v1731_v15 = vrot.slane %v1729_v6, 2 }
  0x6f   : > { %v1732_v18 = vor.u32 %v1731_v15, %v1728_v14 }
  0x72   : > { %2409 = vmatmul.mubr.msk.bf16.gmra.mrb[20].mxu0 %vm274_vm2, %v851_v45  ;;  %v2192_v45 = vcombine.low %v1290_v43, %v2941_v48 }
  0x73   : > { %2428 = vmatprep.mubr.msk.bf16.mxu0 %vm2682_vm0, %v2681_v1 }
  0x74   : > { %2423 = vmatmul.mubr.msk.bf16.gmra.mrb[44].mxu1 %vm274_vm2, %v930_v46  ;;  %v1513_v46 = vrot.slane %v2197_v21, 1  ;;  %v1296_v52 = vrot.slane %v2192_v45, 1  ;;  %v2668_v21 = vld [vmem:[%s3191_s2 + $0x30] sm:$0xff]  }
  0x75   : > { %2442 = vmatprep.mubr.msk.bf16.mxu1 %vm2682_vm0, %v2681_v1 }
  0x76   : > { %v1515_v48 = vsel %vm416_vm4, %v1513_v46, %v1514_v47 }
  0x7a   : > { %2429 = vmatmul.mubr.msk.bf16.vlgmr.msra.gmra.mrb[24].mxu0 %vm274_vm2, %v1012_v10  ;;  %v1695_v10 = vld [vmem:[%s2741_s27 + $0x14] sm:$0xf] }
  0x7b   : > { %2483 = vmatpush3.bf16.msra.mxu0 %v2652_v11  ;;  %2432 = vmatprep.mubr.msk.bf16.mxu0 %vm2682_vm0, %v2681_v1  ;;  %v1699_v11 = vld [vmem:[%s2741_s27 + $0x18] sm:$0x3]  ;;  %v2221_v3 = vcombine.low %v1695_v10, %v1696_v29 }
  0x7c   : > { %2443 = vmatmul.mubr.msk.bf16.vlgmr.msra.gmra.mrb[48].mxu1 %vm274_vm2, %v1137_v12  ;;  %2496 = vmatprep.subr.bf16.mxu0 %v2681_v1  ;;  %v1720_v12 = vrot.slane %v1718_v4, 1 }
  0x7d   : > { %2455 = vmatpush3.bf16.msra.mxu1 %v2653_v13  ;;  %2446 = vmatprep.mubr.msk.bf16.mxu1 %vm2682_vm0, %v2681_v1  ;;  %v1723_v13 = vrot.slane %v1721_v5, 2  ;;  %v1820_v33 = vrot.slane %v2221_v3, 1 }
  0x7e   : > { %2468 = vmatprep.subr.bf16.mxu1 %v2681_v1 }
  0x7f   : > { %v1724_v17 = vor.u32 %v1723_v13, %v1720_v12 }
  0x82   : > { %2433 = vmatmul.mubr.msk.bf16.gmra.mrb[28].mxu0 %vm274_vm2, %v1014_v20 }
  0x83   : > { %2436 = vmatprep.mubr.msk.bf16.mxu0 %vm2682_vm0, %v2681_v1 }
  0x84   : > { %2447 = vmatmul.mubr.msk.bf16.gmra.mrb[52].mxu1 %vm274_vm2, %v1145_v22  ;;  %v1733_v22 = vsel %vm826_vm5, %v1724_v17, %v1732_v18 }
  0x85   : > { %2450 = vmatprep.mubr.msk.bf16.mxu1 %vm2682_vm0, %v2681_v1 }
  0x8a   : > { %2437 = vmatmul.mubr.msk.bf16.gmra.mrb[32].mxu0 %vm274_vm2, %v1013_v16  ;;  %v2216_v16 = vcombine.low %v1695_v10, %v1699_v11 }
  0x8b   : > { %2484 = vmatprep.mubr.msk.bf16.mxu0 %vm2682_vm0, %v2681_v1 }
  0x8c   : > { %2451 = vmatmul.mubr.msk.bf16.gmra.mrb[56].mxu1 %vm274_vm2, %v1148_v31  ;;  %v1735_v19 = vshrl.u32 %v2216_v16, 16  ;;  %v1738_v20 = vshll.u32 %v2216_v16, 16  ;;  %v1900_v31 = vrot.slane %v3077_v2, 2  ;;  %v1902_v34 = vrot.slane %v2216_v16, 2 }
  0x8d   : > { %2456 = vmatprep.mubr.msk.bf16.mxu1 %vm2682_vm0, %v2681_v1 }
  0x8e   : > { %v1737_v24 = vrot.slane %v1735_v19, 1  ;;  %v1740_v25 = vrot.slane %v1738_v20, 2 }
  0x90   : > { %v1741_v26 = vor.u32 %v1740_v25, %v1737_v24 }
  0x92   : > { %2485 = vmatmul.mubr.msk.bf16.vlgmr.msra.gmra.mrb[36].mxu0 %vm274_vm2, %v1429_v36  ;;  %v1742_v27 = vsel %vm826_vm5, %v1732_v18, %v1741_v26  ;;  %v1903_v36 = vsel %vm1009_vm3, %v1900_v31, %v1902_v34 }
  0x93   : > { %2497 = vmatpush3.bf16.msra.mxu0 %v2657_v37  ;;  %2488 = vmatprep.mubr.msk.bf16.mxu0 %vm2682_vm0, %v2681_v1 }
  0x94   : > { %2457 = vmatmul.mubr.msk.bf16.vlgmr.msra.gmra.mrb[48].mxu1 %vm274_vm2, %v2947_v53  ;;  %2510 = vmatprep.subr.bf16.mxu0 %v2681_v1  ;;  %v1297_v53 = vrot.slane %v2957_v55, 1 }
  0x95   : > { %2469 = vmatpush3.bf16.msra.mxu1 %v2658_v40  ;;  %2460 = vmatprep.mubr.msk.bf16.mxu1 %vm2682_vm0, %v2681_v1 }
  0x96   : > { %2524 = vmatprep.subr.bf16.mxu1 %v2681_v1  ;;  %v1298_v50 = vsel %vm416_vm4, %v1296_v52, %v1297_v53  ;;  %v1300_v0 = vsel %vm416_vm4, %v1297_v53, %v1299_v59 }
  0x9a   : > { %2489 = vmatmul.mubr.msk.bf16.gmra.mrb[40].mxu0 %vm274_vm2, %v1438_v42 }
  0x9b   : > { %2492 = vmatprep.mubr.msk.bf16.mxu0 %vm2682_vm0, %v2681_v1 }
  0x9c   : > { %2461 = vmatmul.mubr.msk.bf16.gmra.mrb[52].mxu1 %vm274_vm2, %v2957_v55  ;;  %v1516_v55 = vrot.slane %v2204_v56, 1 }
  0x9d   : > { %2464 = vmatprep.mubr.msk.bf16.mxu1 %vm2682_vm0, %v2681_v1 }
  0x9e   : > { %v1517_v61 = vsel %vm416_vm4, %v1514_v47, %v1516_v55 }
  0xa2   : > { %2493 = vmatmul.mubr.msk.bf16.gmra.mrb[44].mxu0 %vm274_vm2, %v1437_v41 }
  0xa3   : > { %2498 = vmatprep.mubr.msk.bf16.mxu0 %vm2682_vm0, %v2681_v1 }
  0xa4   : > { %2465 = vmatmul.mubr.msk.bf16.gmra.mrb[56].mxu1 %vm274_vm2, %v2187_v44 }
  0xa5   : > { %2470 = vmatprep.mubr.msk.bf16.mxu1 %vm2682_vm0, %v2681_v1 }
  0xaa   : > { %2499 = vmatmul.mubr.msk.bf16.vlgmr.msra.gmra.mrb[48].mxu0 %vm274_vm2, %v1515_v48 }
  0xab   : > { %2511 = vmatpush3.bf16.msra.mxu0 %v2662_v54  ;;  %2502 = vmatprep.mubr.msk.bf16.mxu0 %vm2682_vm0, %v2681_v1 }
  0xac   : > { %2471 = vmatmul.mubr.msk.bf16.vlgmr.msra.gmra.mrb[48].mxu1 %vm274_vm2, %v1298_v50  ;;  %2538 = vmatprep.subr.bf16.mxu0 %v2681_v1 }
  0xad   : > { %2525 = vmatpush3.bf16.msra.mxu1 %v2663_v57  ;;  %2474 = vmatprep.mubr.msk.bf16.mxu1 %vm2682_vm0, %v2681_v1 }
  0xae   : > { %2552 = vmatprep.subr.bf16.mxu1 %v2681_v1 }
  0xb2   : > { %2503 = vmatmul.mubr.msk.bf16.gmra.mrb[52].mxu0 %vm274_vm2, %v1517_v61 }
  0xb3   : > { %2506 = vmatprep.mubr.msk.bf16.mxu0 %vm2682_vm0, %v2681_v1 }
  0xb4   : > { %2475 = vmatmul.mubr.msk.bf16.gmra.mrb[52].mxu1 %vm274_vm2, %v1300_v0 }
  0xb5   : > { %2478 = vmatprep.mubr.msk.bf16.mxu1 %vm2682_vm0, %v2681_v1 }
  0xba   : > { %2507 = vmatmul.mubr.msk.bf16.gmra.mrb[56].mxu0 %vm274_vm2, %v1516_v55 }
  0xbb   : > { %2512 = vmatprep.mubr.msk.bf16.mxu0 %vm2682_vm0, %v2681_v1 }
  0xbc   : > { %2479 = vmatmul.mubr.msk.bf16.gmra.mrb[56].mxu1 %vm274_vm2, %v1299_v59 }
  0xbd   : > { %2526 = vmatprep.mubr.msk.bf16.mxu1 %vm2682_vm0, %v2681_v1 }
  0xc2   : > { %2513 = vmatmul.mubr.msk.bf16.vlgmr.msra.gmra.mrb[60].mxu0 %vm274_vm2, %v2856_v63  ;;  %v1893_v63 = vld [vmem:[%s2741_s27 + $0x4] sm:$0xc] }
  0xc3   : > { %2539 = vmatpush3.bf16.msra.mxu0 %v2668_v21  ;;  %2516 = vmatprep.mubr.msk.bf16.mxu0 %vm2682_vm0, %v2681_v1  ;;  %v2226_v51 = vcombine.low %v1893_v63, %v1692_v60 }
  0xc4   : > { %2527 = vmatmul.mubr.msk.bf16.vlgmr.msra.gmra.mrb[60].mxu1 %vm274_vm2, %v1733_v22 }
  0xc5   : > { %2553 = vmatpush3.bf16.msra.mxu1 %v2669_v23  ;;  %2530 = vmatprep.mubr.msk.bf16.mxu1 %vm2682_vm0, %v2681_v1  ;;  %v1899_v30 = vrot.slane %v2226_v51, 2 }
  0xca   : > { %2517 = vmatmul.mubr.msk.bf16.gmra.mrb[64].mxu0 %vm274_vm2, %v2876_v9  ;;  %v1818_v9 = vrot.slane %v3077_v2, 1 }
  0xcb   : > { %2520 = vmatprep.mubr.msk.bf16.mxu0 %vm2682_vm0, %v2681_v1 }
  0xcc   : > { %2531 = vmatmul.mubr.msk.bf16.gmra.mrb[64].mxu1 %vm274_vm2, %v1742_v27  ;;  %v1819_v32 = vsel %vm416_vm4, %v1817_v28, %v1818_v9  ;;  %v1821_v35 = vsel %vm416_vm4, %v1818_v9, %v1820_v33 }
  0xcd   : > { %2534 = vmatprep.mubr.msk.bf16.mxu1 %vm2682_vm0, %v2681_v1 }
  0xd2   : > { %2521 = vmatmul.mubr.msk.bf16.gmra.mrb[68].mxu0 %vm274_vm2, %v1598_v7  ;;  %v1901_v7 = vsel %vm1009_vm3, %v1899_v30, %v1900_v31 }
  0xd3   : > { %2540 = vmatprep.mubr.msk.bf16.mxu0 %vm2682_vm0, %v2681_v1 }
  0xd4   : > { %2535 = vmatmul.mubr.msk.bf16.gmra.mrb[68].mxu1 %vm274_vm2, %v1741_v26 }
  0xd5   : > { %2554 = vmatprep.mubr.msk.bf16.mxu1 %vm2682_vm0, %v2681_v1 }
  0xda   : > { %2541 = vmatmul.mubr.msk.bf16.vlgmr.msra.gmra.mrb[72].mxu0 %vm274_vm2, %v1819_v32 }
  0xdb   : > { %2544 = vmatprep.mubr.msk.bf16.mxu0 %vm2682_vm0, %v2681_v1 }
  0xdc   : > { %2555 = vmatmul.mubr.msk.bf16.vlgmr.msra.gmra.mrb[72].mxu1 %vm274_vm2, %v1901_v7 }
  0xdd   : > { %2558 = vmatprep.mubr.msk.bf16.mxu1 %vm2682_vm0, %v2681_v1 }
  0xe2   : > { %2545 = vmatmul.mubr.msk.bf16.gmra.mrb[76].mxu0 %vm274_vm2, %v1821_v35 }
  0xe3   : > { %2548 = vmatprep.mubr.msk.bf16.mxu0 %vm2682_vm0, %v2681_v1 }
  0xe4   : > { %2559 = vmatmul.mubr.msk.bf16.gmra.mrb[76].mxu1 %vm274_vm2, %v1903_v36 }
  0xe5   : > { %2562 = vmatprep.mubr.msk.bf16.mxu1 %vm2682_vm0, %v2681_v1 }
  0xea   : > { %2549 = vmatmul.mubr.msk.bf16.gmra.mrb[80].mxu0 %vm274_vm2, %v1820_v33 }
  0xec   : > { %2563 = vmatmul.mubr.msk.bf16.gmra.mrb[80].mxu1 %vm274_vm2, %v1902_v34 }
  0xef   : > { %v606_v37 = vpop.f32.mrb[0].mxu1 }
  0xf0   : > { %v2360_v38 = vpop.f32.mrb[1].mxu1 }
  0xf1   : > { %v609_v39 = vpop.f32.mrb[2].mxu1 }
  0xf2   : > { %v2361_v40 = vpop.f32.mrb[3].mxu1 }
  0xf7   : > { %v614_v41 = vpop.f32.mrb[4].mxu1 }
  0xf8   : > { %v2364_v42 = vpop.f32.mrb[5].mxu1 }
  0xf9   : > { %v617_v43 = vpop.f32.mrb[6].mxu1 }
  0xfa   : > { %v2365_v44 = vpop.f32.mrb[7].mxu1 }
  0xff   : > { %v622_v45 = vpop.f32.mrb[8].mxu1 }
 0x100   : > { %v2368_v46 = vpop.f32.mrb[9].mxu1 }
 0x101   : > { %v625_v47 = vpop.f32.mrb[10].mxu1 }
 0x102   : > { %v2369_v49 = vpop.f32.mrb[11].mxu1 }
 0x107   : > { %v676_v52 = vpop.f32.mrb[12].mxu1 }
 0x108   : > { %v677_v53 = vadd.f32 %v676_v52, %v606_v37  ;;  %v2374_v48 = vpop.f32.mrb[13].mxu1 }
 0x109   : > { %v679_v1 = vpop.f32.mrb[14].mxu1 }
 0x10a   : > { %v680_v54 = vadd.f32 %v679_v1, %v609_v39  ;;  %v2375_v56 = vpop.f32.mrb[15].mxu1 }
 0x10f   : > { %v684_v50 = vpop.f32.mrb[16].mxu1 }
 0x110   : > { %v685_v57 = vadd.f32 %v684_v50, %v614_v41  ;;  %v2378_v55 = vpop.f32.mrb[17].mxu1 }
 0x111   : > { %v687_v59 = vpop.f32.mrb[18].mxu1 }
 0x112   : > { %v688_v58 = vadd.f32 %v687_v59, %v617_v43  ;;  %v2379_v60 = vpop.f32.mrb[19].mxu1 }
 0x117   : > { %v692_v61 = vpop.f32.mrb[20].mxu1 }
 0x118   : > { %v693_v62 = vadd.f32 %v692_v61, %v622_v45  ;;  %v2382_v0 = vpop.f32.mrb[21].mxu1 }
 0x119   : > { %v695_v2 = vpop.f32.mrb[22].mxu1 }
 0x11a   : > { %v2383_v4 = vpop.f32.mrb[23].mxu1 }
 0x11d   : > { %v471_v5 = vpop.f32.mrb[0].mxu0 }
 0x11e   : > { %499 = vst.msk [vmem:[#allocation2] sm:$0xff] %vm498_vm6, %v471_v5  ;;  %v2346_v8 = vpop.f32.mrb[1].mxu0 }
 0x11f   : > { %v758_v6 = vpop.f32.mrb[24].mxu1  ;;  %v474_v10 = vpop.f32.mrb[2].mxu0 }
 0x120   : > { %v780_v11 = vadd.f32 %v758_v6, %v677_v53  ;;  %v2388_v12 = vpop.f32.mrb[25].mxu1  ;;  %500 = vst.msk [vmem:[#allocation2 + $0x8] sm:$0xff] %vm498_vm6, %v474_v10  ;;  %v2347_v13 = vpop.f32.mrb[3].mxu0 }
 0x121   : > { %v761_v14 = vpop.f32.mrb[26].mxu1 }
 0x122   : > { %v781_v15 = vadd.f32 %v761_v14, %v680_v54  ;;  %v2389_v16 = vpop.f32.mrb[27].mxu1 }
 0x125   : > { %v504_v17 = vld [vmem:[#allocation2] sm:$0xff]  ;;  %v479_v18 = vpop.f32.mrb[4].mxu0 }
 0x126   : > { %v785_v19 = vadd.f32 %v780_v11, %v504_v17  ;;  %501 = vst.msk [vmem:[#allocation2 + $0x10] sm:$0xff] %vm498_vm6, %v479_v18  ;;  %v2350_v20 = vpop.f32.mrb[5].mxu0 }
 0x127   : > { %v505_v21 = vld [vmem:[#allocation2 + $0x8] sm:$0xff]  ;;  %v766_v22 = vpop.f32.mrb[28].mxu1  ;;  %v482_v23 = vpop.f32.mrb[6].mxu0 }
 0x128   : > { %790 = vst.msk [vmem:[#allocation2] sm:$0xff] %vm498_vm6, %v785_v19  ;;  %v786_v24 = vadd.f32 %v781_v15, %v505_v21  ;;  %v782_v25 = vadd.f32 %v766_v22, %v685_v57  ;;  %v2392_v26 = vpop.f32.mrb[29].mxu1  ;;  %502 = vst.msk [vmem:[#allocation2 + $0x18] sm:$0xff] %vm498_vm6, %v482_v23  ;;  %v2351_v27 = vpop.f32.mrb[7].mxu0 }
 0x129   : > { %v769_v63 = vpop.f32.mrb[30].mxu1 }
 0x12a   : > { %791 = vst.msk [vmem:[#allocation2 + $0x8] sm:$0xff] %vm498_vm6, %v786_v24  ;;  %v783_v51 = vadd.f32 %v769_v63, %v688_v58  ;;  %v2393_v28 = vpop.f32.mrb[31].mxu1 }
 0x12d   : > { %v506_v9 = vld [vmem:[#allocation2 + $0x10] sm:$0xff]  ;;  %v487_v29 = vpop.f32.mrb[8].mxu0 }
 0x12e   : > { %v787_v30 = vadd.f32 %v782_v25, %v506_v9  ;;  %503 = vst.msk [vmem:[#allocation2 + $0x20] sm:$0xff] %vm498_vm6, %v487_v29  ;;  %v2354_v31 = vpop.f32.mrb[9].mxu0 }
 0x12f   : > { %v507_v32 = vld [vmem:[#allocation2 + $0x18] sm:$0xff]  ;;  %v774_v3 = vpop.f32.mrb[32].mxu1  ;;  %v490_v7 = vpop.f32.mrb[10].mxu0  ;;  %v795_v14 = vld [vmem:[#allocation2] sm:$0xff] }
 0x130   : > { %792 = vst.msk [vmem:[#allocation2 + $0x10] sm:$0xff] %vm498_vm6, %v787_v30  ;;  %v788_v33 = vadd.f32 %v783_v51, %v507_v32  ;;  %v784_v34 = vadd.f32 %v774_v3, %v693_v62  ;;  %v2396_v35 = vpop.f32.mrb[33].mxu1  ;;  %v2355_v36 = vpop.f32.mrb[11].mxu0 }
 0x131   : > { %v777_v37 = vpop.f32.mrb[34].mxu1  ;;  %v796_v19 = vld [vmem:[#allocation2 + $0x8] sm:$0xff] }
 0x132   : > { %793 = vst.msk [vmem:[#allocation2 + $0x18] sm:$0xff] %vm498_vm6, %v788_v33  ;;  %v2397_v38 = vpop.f32.mrb[35].mxu1 }
 0x135   : > { %v508_v39 = vld [vmem:[#allocation2 + $0x20] sm:$0xff]  ;;  %v902_v40 = vpop.f32.mrb[12].mxu0 }
 0x136   : > { %v789_v41 = vadd.f32 %v784_v34, %v508_v39  ;;  %v2402_v42 = vpop.f32.mrb[13].mxu0 }
 0x137   : > { %v981_v43 = vpop.f32.mrb[36].mxu1  ;;  %v905_v44 = vpop.f32.mrb[14].mxu0  ;;  %v797_v24 = vld [vmem:[#allocation2 + $0x10] sm:$0xff] }
 0x138   : > { %794 = vst.msk [vmem:[#allocation2 + $0x20] sm:$0xff] %vm498_vm6, %v789_v41  ;;  %v982_v45 = vadd.f32 %v981_v43, %v902_v40  ;;  %v2416_v46 = vpop.f32.mrb[37].mxu1  ;;  %v2403_v47 = vpop.f32.mrb[15].mxu0 }
 0x139   : > { %v984_v49 = vpop.f32.mrb[38].mxu1  ;;  %v798_v51 = vld [vmem:[#allocation2 + $0x18] sm:$0xff] }
 0x13a   : > { %v985_v52 = vadd.f32 %v984_v49, %v905_v44  ;;  %v2417_v53 = vpop.f32.mrb[39].mxu1 }
 0x13d   : > { %v910_v48 = vpop.f32.mrb[16].mxu0 }
 0x13e   : > { %v2406_v1 = vpop.f32.mrb[17].mxu0 }
 0x13f   : > { %v989_v54 = vpop.f32.mrb[40].mxu1  ;;  %v913_v56 = vpop.f32.mrb[18].mxu0  ;;  %v799_v31 = vld [vmem:[#allocation2 + $0x20] sm:$0xff] }
 0x140   : > { %v990_v50 = vadd.f32 %v989_v54, %v910_v48  ;;  %v2420_v57 = vpop.f32.mrb[41].mxu1  ;;  %v2407_v55 = vpop.f32.mrb[19].mxu0 }
 0x141   : > { %v992_v59 = vpop.f32.mrb[42].mxu1 }
 0x142   : > { %v993_v58 = vadd.f32 %v992_v59, %v913_v56  ;;  %v2421_v60 = vpop.f32.mrb[43].mxu1 }
 0x145   : > { %v918_v61 = vpop.f32.mrb[20].mxu0 }
 0x146   : > { %v2410_v62 = vpop.f32.mrb[21].mxu0 }
 0x147   : > { %v997_v0 = vpop.f32.mrb[44].mxu1  ;;  %v921_v2 = vpop.f32.mrb[22].mxu0 }
 0x148   : > { %v998_v4 = vadd.f32 %v997_v0, %v918_v61  ;;  %v2424_v5 = vpop.f32.mrb[45].mxu1  ;;  %v2411_v8 = vpop.f32.mrb[23].mxu0 }
 0x149   : > { %v1000_v6 = vpop.f32.mrb[46].mxu1 }
 0x14a   : > { %v2425_v10 = vpop.f32.mrb[47].mxu1 }
 0x14d   : > { %v1064_v11 = vpop.f32.mrb[24].mxu0 }
 0x14e   : > { %v1086_v12 = vadd.f32 %v1064_v11, %v982_v45  ;;  %v2430_v13 = vpop.f32.mrb[25].mxu0 }
 0x14f   : > { %v1067_v15 = vpop.f32.mrb[26].mxu0 }
 0x150   : > { %v1091_v16 = vadd.f32 %v1086_v12, %v795_v14  ;;  %v1087_v17 = vadd.f32 %v1067_v15, %v985_v52  ;;  %v2431_v18 = vpop.f32.mrb[27].mxu0 }
 0x152   : > { %1096 = vst.msk [vmem:[#allocation2] sm:$0xff] %vm498_vm6, %v1091_v16  ;;  %v1092_v20 = vadd.f32 %v1087_v17, %v796_v19 }
 0x154   : > { %1097 = vst.msk [vmem:[#allocation2 + $0x8] sm:$0xff] %vm498_vm6, %v1092_v20 }
 0x155   : > { %v1072_v21 = vpop.f32.mrb[28].mxu0 }
 0x156   : > { %v1088_v22 = vadd.f32 %v1072_v21, %v990_v50  ;;  %v2434_v23 = vpop.f32.mrb[29].mxu0 }
 0x157   : > { %v1075_v25 = vpop.f32.mrb[30].mxu0 }
 0x158   : > { %v1093_v26 = vadd.f32 %v1088_v22, %v797_v24  ;;  %v1089_v27 = vadd.f32 %v1075_v25, %v993_v58  ;;  %v2435_v63 = vpop.f32.mrb[31].mxu0 }
 0x15a   : > { %1098 = vst.msk [vmem:[#allocation2 + $0x10] sm:$0xff] %vm498_vm6, %v1093_v26  ;;  %v1094_v28 = vadd.f32 %v1089_v27, %v798_v51 }
 0x15c   : > { %1099 = vst.msk [vmem:[#allocation2 + $0x18] sm:$0xff] %vm498_vm6, %v1094_v28 }
 0x15d   : > { %v1080_v9 = vpop.f32.mrb[32].mxu0 }
 0x15e   : > { %v1090_v29 = vadd.f32 %v1080_v9, %v998_v4  ;;  %v2438_v30 = vpop.f32.mrb[33].mxu0 }
 0x15f   : > { %v1083_v32 = vpop.f32.mrb[34].mxu0 }
 0x160   : > { %v1095_v3 = vadd.f32 %v1090_v29, %v799_v31  ;;  %v2439_v7 = vpop.f32.mrb[35].mxu0 }
 0x162   : > { %1100 = vst.msk [vmem:[#allocation2 + $0x20] sm:$0xff] %vm498_vm6, %v1095_v3 }
 0x165   : > { %v1488_v33 = vpop.f32.mrb[36].mxu0 }
 0x166   : > { %v2486_v34 = vpop.f32.mrb[37].mxu0 }
 0x167   : > { %v1491_v35 = vpop.f32.mrb[38].mxu0 }
 0x168   : > { %v2487_v36 = vpop.f32.mrb[39].mxu0 }
 0x16d   : > { %v1496_v37 = vpop.f32.mrb[40].mxu0 }
 0x16e   : > { %v2490_v38 = vpop.f32.mrb[41].mxu0 }
 0x16f   : > { %v1499_v39 = vpop.f32.mrb[42].mxu0 }
 0x170   : > { %v2491_v40 = vpop.f32.mrb[43].mxu0 }
 0x175   : > { %v1504_v41 = vpop.f32.mrb[44].mxu0 }
 0x176   : > { %v2494_v42 = vpop.f32.mrb[45].mxu0 }
 0x177   : > { %v1507_v43 = vpop.f32.mrb[46].mxu0 }
 0x178   : > { %v2495_v44 = vpop.f32.mrb[47].mxu0 }
 0x17d   : > { %v1567_v45 = vpop.f32.mrb[48].mxu0 }
 0x17e   : > { %v1568_v46 = vadd.f32 %v1567_v45, %v1488_v33  ;;  %v2500_v47 = vpop.f32.mrb[49].mxu0 }
 0x17f   : > { %v1350_v49 = vpop.f32.mrb[48].mxu1  ;;  %v1570_v52 = vpop.f32.mrb[50].mxu0 }
 0x180   : > { %1377 = vst.msk [vmem:[#allocation3] sm:$0xff] %vm498_vm6, %v1350_v49  ;;  %v2472_v53 = vpop.f32.mrb[49].mxu1  ;;  %v1571_v48 = vadd.f32 %v1570_v52, %v1491_v35  ;;  %v2501_v1 = vpop.f32.mrb[51].mxu0 }
 0x181   : > { %v1353_v54 = vpop.f32.mrb[50].mxu1 }
 0x182   : > { %1378 = vst.msk [vmem:[#allocation3 + $0x8] sm:$0xff] %vm498_vm6, %v1353_v54  ;;  %v2473_v56 = vpop.f32.mrb[51].mxu1 }
 0x185   : > { %v1575_v50 = vpop.f32.mrb[52].mxu0 }
 0x186   : > { %v1576_v57 = vadd.f32 %v1575_v50, %v1496_v37  ;;  %v2504_v55 = vpop.f32.mrb[53].mxu0 }
 0x187   : > { %v1358_v59 = vpop.f32.mrb[52].mxu1  ;;  %v1578_v58 = vpop.f32.mrb[54].mxu0  ;;  %v1382_v18 = vld [vmem:[#allocation3] sm:$0xff] }
 0x188   : > { %1379 = vst.msk [vmem:[#allocation3 + $0x10] sm:$0xff] %vm498_vm6, %v1358_v59  ;;  %v2476_v60 = vpop.f32.mrb[53].mxu1  ;;  %v1579_v61 = vadd.f32 %v1578_v58, %v1499_v39  ;;  %v2505_v62 = vpop.f32.mrb[55].mxu0 }
 0x189   : > { %v1361_v0 = vpop.f32.mrb[54].mxu1  ;;  %v1383_v25 = vld [vmem:[#allocation3 + $0x8] sm:$0xff] }
 0x18a   : > { %1380 = vst.msk [vmem:[#allocation3 + $0x18] sm:$0xff] %vm498_vm6, %v1361_v0  ;;  %v2477_v2 = vpop.f32.mrb[55].mxu1 }
 0x18d   : > { %v1583_v4 = vpop.f32.mrb[56].mxu0 }
 0x18e   : > { %v1584_v5 = vadd.f32 %v1583_v4, %v1504_v41  ;;  %v2508_v8 = vpop.f32.mrb[57].mxu0 }
 0x18f   : > { %v1366_v6 = vpop.f32.mrb[56].mxu1  ;;  %v1586_v10 = vpop.f32.mrb[58].mxu0  ;;  %v1384_v29 = vld [vmem:[#allocation3 + $0x10] sm:$0xff] }
 0x190   : > { %1381 = vst.msk [vmem:[#allocation3 + $0x20] sm:$0xff] %vm498_vm6, %v1366_v6  ;;  %v2480_v11 = vpop.f32.mrb[57].mxu1  ;;  %v2509_v12 = vpop.f32.mrb[59].mxu0 }
 0x191   : > { %v1369_v13 = vpop.f32.mrb[58].mxu1  ;;  %v1385_v34 = vld [vmem:[#allocation3 + $0x18] sm:$0xff] }
 0x192   : > { %v2481_v14 = vpop.f32.mrb[59].mxu1 }
 0x195   : > { %v1649_v15 = vpop.f32.mrb[60].mxu0 }
 0x196   : > { %v1671_v16 = vadd.f32 %v1649_v15, %v1568_v46  ;;  %v2514_v17 = vpop.f32.mrb[61].mxu0 }
 0x197   : > { %v1792_v19 = vpop.f32.mrb[60].mxu1  ;;  %v1652_v20 = vpop.f32.mrb[62].mxu0  ;;  %v1386_v41 = vld [vmem:[#allocation3 + $0x20] sm:$0xff] }
 0x198   : > { %v1676_v21 = vadd.f32 %v1671_v16, %v1382_v18  ;;  %v2528_v22 = vpop.f32.mrb[61].mxu1  ;;  %v1672_v23 = vadd.f32 %v1652_v20, %v1571_v48  ;;  %v2515_v24 = vpop.f32.mrb[63].mxu0  ;;  %v1990_v20 = vld [vmem:[#allocation2] ss:$2 sm:$0xff] }
 0x199   : > { %v1795_v26 = vpop.f32.mrb[62].mxu1 }
 0x19a   : > { %1681 = vst.msk [vmem:[#allocation3] sm:$0xff] %vm498_vm6, %v1676_v21  ;;  %v1677_v27 = vadd.f32 %v1672_v23, %v1383_v25  ;;  %v2529_v63 = vpop.f32.mrb[63].mxu1  ;;  %v1996_v21 = vld [vmem:[#allocation2 + $0x1] ss:$2 sm:$0xff] }
 0x19c   : > { %1682 = vst.msk [vmem:[#allocation3 + $0x8] sm:$0xff] %vm498_vm6, %v1677_v27  ;;  %v2001_v27 = vmax.f32 %v1990_v20, %v1996_v21 }
 0x19d   : > { %v1657_v51 = vpop.f32.mrb[64].mxu0 }
 0x19e   : > { %v1673_v28 = vadd.f32 %v1657_v51, %v1576_v57  ;;  %v2518_v9 = vpop.f32.mrb[65].mxu0 }
 0x19f   : > { %v1800_v30 = vpop.f32.mrb[64].mxu1  ;;  %v1660_v31 = vpop.f32.mrb[66].mxu0  ;;  %v2231_v9 = vld [vmem:[%s3192_s3] ss:$0 sm:$0xff] }
 0x1a0   : > { %v1678_v32 = vadd.f32 %v1673_v28, %v1384_v29  ;;  %v2532_v3 = vpop.f32.mrb[65].mxu1  ;;  %v1674_v7 = vadd.f32 %v1660_v31, %v1579_v61  ;;  %v2519_v33 = vpop.f32.mrb[67].mxu0 }
 0x1a1   : > { %v1803_v35 = vpop.f32.mrb[66].mxu1  ;;  %v1686_v59 = vld [vmem:[#allocation3] sm:$0xff] }
 0x1a2   : > { %1683 = vst.msk [vmem:[#allocation3 + $0x10] sm:$0xff] %vm498_vm6, %v1678_v32  ;;  %v1679_v36 = vadd.f32 %v1674_v7, %v1385_v34  ;;  %v2533_v37 = vpop.f32.mrb[67].mxu1 }
 0x1a3   : > { %v1687_v0 = vld [vmem:[#allocation3 + $0x8] sm:$0xff] }
 0x1a4   : > { %1684 = vst.msk [vmem:[#allocation3 + $0x18] sm:$0xff] %vm498_vm6, %v1679_v36 }
 0x1a5   : > { %v1665_v38 = vpop.f32.mrb[68].mxu0 }
 0x1a6   : > { %v1675_v39 = vadd.f32 %v1665_v38, %v1584_v5  ;;  %v2522_v40 = vpop.f32.mrb[69].mxu0  ;;  %v1992_v38 = vld [vmem:[#allocation2 + $0x10] ss:$2 sm:$0xff] }
 0x1a7   : > { %v1808_v42 = vpop.f32.mrb[68].mxu1  ;;  %v1668_v43 = vpop.f32.mrb[70].mxu0 }
 0x1a8   : > { %v1680_v44 = vadd.f32 %v1675_v39, %v1386_v41  ;;  %v2536_v45 = vpop.f32.mrb[69].mxu1  ;;  %v2523_v46 = vpop.f32.mrb[71].mxu0  ;;  %v1998_v39 = vld [vmem:[#allocation2 + $0x11] ss:$2 sm:$0xff] }
 0x1a9   : > { %v1811_v47 = vpop.f32.mrb[70].mxu1  ;;  %v1688_v15 = vld [vmem:[#allocation3 + $0x10] sm:$0xff]  ;;  %v2002_v43 = vmax.f32 %v1992_v38, %v1998_v39 }
 0x1aa   : > { %1685 = vst.msk [vmem:[#allocation3 + $0x20] sm:$0xff] %vm498_vm6, %v1680_v44  ;;  %v2537_v49 = vpop.f32.mrb[71].mxu1  ;;  %v1994_v47 = vld [vmem:[#allocation2 + $0x20] ss:$2 sm:$0xf] }
 0x1ab   : > { %v1689_v22 = vld [vmem:[#allocation3 + $0x18] sm:$0xff] }
 0x1ac   : > { %v2000_v49 = vld [vmem:[#allocation2 + $0x21] ss:$2 sm:$0xf] }
 0x1ad   : > { %v1871_v52 = vpop.f32.mrb[72].mxu0 }
 0x1ae   : > { %v1872_v53 = vadd.f32 %v1871_v52, %v1792_v19  ;;  %v2542_v48 = vpop.f32.mrb[73].mxu0 }
 0x1af   : > { %v1953_v1 = vpop.f32.mrb[72].mxu1  ;;  %v1874_v54 = vpop.f32.mrb[74].mxu0 }
 0x1b0   : > { %v1975_v56 = vadd.f32 %v1953_v1, %v1872_v53  ;;  %v2556_v50 = vpop.f32.mrb[73].mxu1  ;;  %v1875_v57 = vadd.f32 %v1874_v54, %v1795_v26  ;;  %v2543_v55 = vpop.f32.mrb[75].mxu0  ;;  %v2003_v1 = vmax.f32 %v1994_v47, %v2000_v49 }
 0x1b1   : > { %v1956_v58 = vpop.f32.mrb[74].mxu1  ;;  %v1690_v33 = vld [vmem:[#allocation3 + $0x20] sm:$0xff] }
 0x1b2   : > { %v1980_v60 = vadd.f32 %v1975_v56, %v1686_v59  ;;  %v1976_v61 = vadd.f32 %v1956_v58, %v1875_v57  ;;  %v2557_v62 = vpop.f32.mrb[75].mxu1 }
 0x1b4   : > { %1985 = vst.msk [vmem:[#allocation3] sm:$0xff] %vm498_vm6, %v1980_v60  ;;  %v1981_v2 = vadd.f32 %v1976_v61, %v1687_v0 }
 0x1b5   : > { %v1879_v4 = vpop.f32.mrb[76].mxu0 }
 0x1b6   : > { %1986 = vst.msk [vmem:[#allocation3 + $0x8] sm:$0xff] %vm498_vm6, %v1981_v2  ;;  %v1880_v5 = vadd.f32 %v1879_v4, %v1800_v30  ;;  %v2546_v8 = vpop.f32.mrb[77].mxu0 }
 0x1b7   : > { %v1961_v6 = vpop.f32.mrb[76].mxu1  ;;  %v1882_v10 = vpop.f32.mrb[78].mxu0 }
 0x1b8   : > { %v1977_v11 = vadd.f32 %v1961_v6, %v1880_v5  ;;  %v2560_v12 = vpop.f32.mrb[77].mxu1  ;;  %v1883_v13 = vadd.f32 %v1882_v10, %v1803_v35  ;;  %v2547_v14 = vpop.f32.mrb[79].mxu0 }
 0x1b9   : > { %v1964_v16 = vpop.f32.mrb[78].mxu1 }
 0x1ba   : > { %v1982_v17 = vadd.f32 %v1977_v11, %v1688_v15  ;;  %v1978_v18 = vadd.f32 %v1964_v16, %v1883_v13  ;;  %v2561_v19 = vpop.f32.mrb[79].mxu1 }
 0x1bc   : > { %1987 = vst.msk [vmem:[#allocation3 + $0x10] sm:$0xff] %vm498_vm6, %v1982_v17  ;;  %v1983_v23 = vadd.f32 %v1978_v18, %v1689_v22 }
 0x1bd   : > { %v2004_v24 = vld [vmem:[#allocation3] ss:$2 sm:$0xff]  ;;  %v2010_v25 = vld [vmem:[#allocation3 + $0x1] ss:$2 sm:$0xff]  ;;  %v1887_v26 = vpop.f32.mrb[80].mxu0 }
 0x1be   : > { %v2015_v63 = vmax.f32 %v2004_v24, %v2010_v25  ;;  %1988 = vst.msk [vmem:[#allocation3 + $0x18] sm:$0xff] %vm498_vm6, %v1983_v23  ;;  %v1888_v51 = vadd.f32 %v1887_v26, %v1808_v42  ;;  %v2550_v28 = vpop.f32.mrb[81].mxu0 }
 0x1bf   : > { %v1969_v29 = vpop.f32.mrb[80].mxu1  ;;  %v1890_v30 = vpop.f32.mrb[82].mxu0 }
 0x1c0   : > { %v2018_v31 = vmax.f32 %v2001_v27, %v2015_v63  ;;  %v1979_v32 = vadd.f32 %v1969_v29, %v1888_v51  ;;  %v2564_v3 = vpop.f32.mrb[81].mxu1  ;;  %v2551_v7 = vpop.f32.mrb[83].mxu0 }
 0x1c1   : > { %v1972_v34 = vpop.f32.mrb[82].mxu1 }
 0x1c2   : > { %v2028_v35 = vadd.f32 %v2231_v9, %v2018_v31  ;;  %v1984_v36 = vadd.f32 %v1979_v32, %v1690_v33  ;;  %v2565_v37 = vpop.f32.mrb[83].mxu1 }
 0x1c4   : > { %v2031_v40 = vmax.f32 %v2028_v35, 0.0  ;;  %1989 = vst.msk [vmem:[#allocation3 + $0x20] sm:$0xff] %vm498_vm6, %v1984_v36 }
 0x1c5   : > { %v2006_v41 = vld [vmem:[#allocation3 + $0x10] ss:$2 sm:$0xff]  ;;  %v2012_v42 = vld [vmem:[#allocation3 + $0x11] ss:$2 sm:$0xff] }
 0x1c6   : > { %v2239_v44 = vpack.c.bf16 %v2031_v40, %v2031_v40  ;;  %v2016_v45 = vmax.f32 %v2006_v41, %v2012_v42 }
 0x1c8   : > { %2048 = vst.msk [vmem:[%s217_s17] sm:$0xf] %vm2047_vm7, %v2239_v44  ;;  %v2019_v46 = vmax.f32 %v2002_v43, %v2016_v45 }
 0x1ca   : > { %v2029_v52 = vadd.f32 %v2231_v9, %v2019_v46 }
 0x1cb   : > { %v2008_v53 = vld [vmem:[#allocation3 + $0x20] ss:$2 sm:$0xf]  ;;  %v2014_v48 = vld [vmem:[#allocation3 + $0x21] ss:$2 sm:$0xf] }
 0x1cc   : > { %v2032_v54 = vmax.f32 %v2029_v52, 0.0  ;;  %v2017_v56 = vmax.f32 %v2008_v53, %v2014_v48 }
 0x1ce   : > { %v2240_v50 = vpack.c.bf16 %v2032_v54, %v2032_v54  ;;  %v2020_v57 = vmax.f32 %v2003_v1, %v2017_v56 }
 0x1d0   : > { %2049 = vst.msk [vmem:[%s217_s17 + $0x4] sm:$0xf] %vm2047_vm7, %v2240_v50  ;;  %v2030_v55 = vadd.f32 %v2231_v9, %v2020_v57 }
 0x1d2   : > { %v2033_v59 = vmax.f32 %v2030_v55, 0.0 }
 0x1d4   : > { %v2241_v58 = vpack.c.bf16 %v2033_v59, %v2033_v59 }
 0x1d6   : > { %2051 = vst.msk [vmem:[%s217_s17 + $0x8] sm:$0x3] %vm2050_vm8, %v2241_v58 }
 0x1d7 PF: > { %s14_s15 = sadd.s32 1, %s2679_s15  }
 0x1d8   : > { %p11_p4 = scmp.ge.s32.totalorder %s14_s15, 4  }
 0x1da   :  { %13 = sbr.rel (!%p11_p4) target bundleno = 1 (0x1), region = 79 }

// kernel: net_forward.7
= control target key start
LH: loop header
LB: loop body
LE: loop exit
PB: predicated region body
PF: predicated region fallthrough
CT: control target
= control target key end

     0   :  { %s1848_s15 = smov 0   ;;  %s1850_s16 = smov 0   ;;  %s2174_s0 = inlined_call_operand.vmem [shape: bf16[2,256], index: 0, kind: input, shape index: {}]   ;;  %s2175_s1 = inlined_call_operand.vmem [shape: bf16[256,1024], index: 1, kind: input, shape index: {}]   ;;  %s2176_s2 = inlined_call_operand.vmem [shape: f32[1,1024], index: 2, kind: input, shape index: {}]   ;;  %s2177_s3 = inlined_call_operand.vmem [shape: bf16[1024,128], index: 3, kind: input, shape index: {}]   ;;  %s2178_s4 = inlined_call_operand.vmem [shape: f32[2,2,128], index: 4, kind: output, shape index: {}]  }
   0x1   :  { %s1852_s17 = smov 0   ;;  %s1854_s18 = smov 0  }
   0x2   :  { %s1856_s19 = smov 0  }
   0x3 LB: > { %s26_s20 = sadd.s32 1, %s1815_s18  ;;  %p68_p1 = scmp.ne.s32.totalorder %s1807_s16, %s1803_s15  ;;  %s1819_s19 = sphi %s1856_s19, %s14_s19   ;;  %s1815_s18 = sphi %s1854_s18, %s2182_s18   ;;  %s1811_s17 = sphi %s1852_s17, %s2181_s17   ;;  %s1807_s16 = sphi %s1850_s16, %s2180_s16   ;;  %s1803_s15 = sphi %s1848_s15, %s2179_s15  }
   0x4   : > { %p28_p0 = scmp.ge.s32.totalorder %s26_s20, 2  ;;  %p69_p2 = scmp.eq.s32.totalorder %s1819_s19, 0 }
   0x5   : > { %s61_s22 = sadd.s32 1, %s1807_s16  ;;  %p1457_p5 = scmp.ge.s32.totalorder %s1819_s19, 2 }
   0x6   : > { %s2184_s20 = smov (%p28_p0, %s26_s20), 0  ;;  %p70_p3 = por %p69_p2, %p68_p1 }
   0x7   : > { %s57_s21 = ssub.s32 %s1815_s18, %s2184_s20  ;;  %180 = sbr.rel (%p1457_p5) target bundleno = 50 (0x32), region = 20 }
   0x8   : > { %p59_p4 = scmp.eq.s32.totalorder %s57_s21, 0 }
   0xa   : > { %s1883_s23 = scalar_select %p59_p4, %s1807_s16, %s61_s22  }
   0xe   : > { %183 = sbr.rel (!%p70_p3) target bundleno = 50 (0x32), region = 24  ;;  %s185_s24 = sand.u32 (%p70_p3), 1, %s1807_s16  }
   0xf   : > { %s1566_s25 = sshll.u32 (%p70_p3), %s1815_s18, 4  ;;  %s1458_s26 = sshll.u32 (%p70_p3), %s185_s24, 9 }
  0x10   : > { %s1891_s29 = scalar_lea.vmem (%p70_p3), %s2175_s1, %s1566_s25  ;;  %s1896_s30 = scalar_lea.vmem (%p70_p3), [#allocation3], %s1458_s26 }
  0x11   : > { %v206_v0 = vld [vmem:[%s1891_s29] sm:$0xff] (%p70_p3)  ;;  %v208_v1 = vld [vmem:[%s1891_s29 + $0x8] sm:$0xff] (%p70_p3) }
  0x12   : > { %v210_v2 = vld [vmem:[%s1891_s29 + $0x20] sm:$0xff] (%p70_p3)  ;;  %207 = vst [vmem:[%s1896_s30] sm:$0xff] (%p70_p3), %v206_v0  ;;  %209 = vst [vmem:[%s1896_s30 + $0x8] sm:$0xff] (%p70_p3), %v208_v1  ;;  %v212_v3 = vld [vmem:[%s1891_s29 + $0x28] sm:$0xff] (%p70_p3) }
  0x13   : > { %211 = vst [vmem:[%s1896_s30 + $0x10] sm:$0xff] (%p70_p3), %v210_v2  ;;  %v214_v4 = vld [vmem:[%s1891_s29 + $0x40] sm:$0xff] (%p70_p3)  ;;  %v216_v5 = vld [vmem:[%s1891_s29 + $0x48] sm:$0xff] (%p70_p3)  ;;  %213 = vst [vmem:[%s1896_s30 + $0x18] sm:$0xff] (%p70_p3), %v212_v3 }
  0x14   : > { %215 = vst [vmem:[%s1896_s30 + $0x20] sm:$0xff] (%p70_p3), %v214_v4  ;;  %217 = vst [vmem:[%s1896_s30 + $0x28] sm:$0xff] (%p70_p3), %v216_v5  ;;  %v218_v6 = vld [vmem:[%s1891_s29 + $0x60] sm:$0xff] (%p70_p3)  ;;  %v220_v7 = vld [vmem:[%s1891_s29 + $0x68] sm:$0xff] (%p70_p3) }
  0x15   : > { %v222_v8 = vld [vmem:[%s1891_s29 + $0x80] sm:$0xff]  ;;  %219 = vst [vmem:[%s1896_s30 + $0x30] sm:$0xff] %v218_v6  ;;  %221 = vst [vmem:[%s1896_s30 + $0x38] sm:$0xff] %v220_v7  ;;  %v224_v9 = vld [vmem:[%s1891_s29 + $0x88] sm:$0xff] }
  0x16   : > { %223 = vst [vmem:[%s1896_s30 + $0x40] sm:$0xff] %v222_v8  ;;  %v226_v10 = vld [vmem:[%s1891_s29 + $0xa0] sm:$0xff]  ;;  %v228_v11 = vld [vmem:[%s1891_s29 + $0xa8] sm:$0xff]  ;;  %225 = vst [vmem:[%s1896_s30 + $0x48] sm:$0xff] %v224_v9 }
  0x17   : > { %227 = vst [vmem:[%s1896_s30 + $0x50] sm:$0xff] %v226_v10  ;;  %229 = vst [vmem:[%s1896_s30 + $0x58] sm:$0xff] %v228_v11  ;;  %v230_v12 = vld [vmem:[%s1891_s29 + $0xc0] sm:$0xff]  ;;  %v232_v13 = vld [vmem:[%s1891_s29 + $0xc8] sm:$0xff] }
  0x18   : > { %v234_v14 = vld [vmem:[%s1891_s29 + $0xe0] sm:$0xff]  ;;  %231 = vst [vmem:[%s1896_s30 + $0x60] sm:$0xff] %v230_v12  ;;  %233 = vst [vmem:[%s1896_s30 + $0x68] sm:$0xff] %v232_v13  ;;  %v236_v15 = vld [vmem:[%s1891_s29 + $0xe8] sm:$0xff] }
  0x19   : > { %235 = vst [vmem:[%s1896_s30 + $0x70] sm:$0xff] %v234_v14  ;;  %v238_v16 = vld [vmem:[%s1891_s29 + $0x100] sm:$0xff]  ;;  %v240_v17 = vld [vmem:[%s1891_s29 + $0x108] sm:$0xff]  ;;  %237 = vst [vmem:[%s1896_s30 + $0x78] sm:$0xff] %v236_v15 }
  0x1a   : > { %239 = vst [vmem:[%s1896_s30 + $0x80] sm:$0xff] %v238_v16  ;;  %241 = vst [vmem:[%s1896_s30 + $0x88] sm:$0xff] %v240_v17  ;;  %v242_v18 = vld [vmem:[%s1891_s29 + $0x120] sm:$0xff]  ;;  %v244_v19 = vld [vmem:[%s1891_s29 + $0x128] sm:$0xff] }
  0x1b   : > { %v246_v20 = vld [vmem:[%s1891_s29 + $0x140] sm:$0xff]  ;;  %243 = vst [vmem:[%s1896_s30 + $0x90] sm:$0xff] %v242_v18  ;;  %245 = vst [vmem:[%s1896_s30 + $0x98] sm:$0xff] %v244_v19  ;;  %v248_v21 = vld [vmem:[%s1891_s29 + $0x148] sm:$0xff] }
  0x1c   : > { %247 = vst [vmem:[%s1896_s30 + $0xa0] sm:$0xff] %v246_v20  ;;  %v250_v22 = vld [vmem:[%s1891_s29 + $0x160] sm:$0xff]  ;;  %v252_v23 = vld [vmem:[%s1891_s29 + $0x168] sm:$0xff]  ;;  %249 = vst [vmem:[%s1896_s30 + $0xa8] sm:$0xff] %v248_v21 }
  0x1d   : > { %251 = vst [vmem:[%s1896_s30 + $0xb0] sm:$0xff] %v250_v22  ;;  %253 = vst [vmem:[%s1896_s30 + $0xb8] sm:$0xff] %v252_v23  ;;  %v254_v24 = vld [vmem:[%s1891_s29 + $0x180] sm:$0xff]  ;;  %v256_v25 = vld [vmem:[%s1891_s29 + $0x188] sm:$0xff] }
  0x1e   : > { %v258_v26 = vld [vmem:[%s1891_s29 + $0x1a0] sm:$0xff]  ;;  %255 = vst [vmem:[%s1896_s30 + $0xc0] sm:$0xff] %v254_v24  ;;  %257 = vst [vmem:[%s1896_s30 + $0xc8] sm:$0xff] %v256_v25  ;;  %v260_v27 = vld [vmem:[%s1891_s29 + $0x1a8] sm:$0xff] }
  0x1f   : > { %259 = vst [vmem:[%s1896_s30 + $0xd0] sm:$0xff] %v258_v26  ;;  %v262_v28 = vld [vmem:[%s1891_s29 + $0x1c0] sm:$0xff]  ;;  %v264_v29 = vld [vmem:[%s1891_s29 + $0x1c8] sm:$0xff]  ;;  %261 = vst [vmem:[%s1896_s30 + $0xd8] sm:$0xff] %v260_v27 }
  0x20   : > { %263 = vst [vmem:[%s1896_s30 + $0xe0] sm:$0xff] %v262_v28  ;;  %265 = vst [vmem:[%s1896_s30 + $0xe8] sm:$0xff] %v264_v29  ;;  %v266_v30 = vld [vmem:[%s1891_s29 + $0x1e0] sm:$0xff]  ;;  %v268_v31 = vld [vmem:[%s1891_s29 + $0x1e8] sm:$0xff] }
  0x21   : > { %v270_v32 = vld [vmem:[%s1891_s29 + $0x200] sm:$0xff]  ;;  %267 = vst [vmem:[%s1896_s30 + $0xf0] sm:$0xff] %v266_v30  ;;  %269 = vst [vmem:[%s1896_s30 + $0xf8] sm:$0xff] %v268_v31  ;;  %v272_v33 = vld [vmem:[%s1891_s29 + $0x208] sm:$0xff] }
  0x22   : > { %271 = vst [vmem:[%s1896_s30 + $0x100] sm:$0xff] %v270_v32  ;;  %v274_v34 = vld [vmem:[%s1891_s29 + $0x220] sm:$0xff]  ;;  %v276_v35 = vld [vmem:[%s1891_s29 + $0x228] sm:$0xff]  ;;  %273 = vst [vmem:[%s1896_s30 + $0x108] sm:$0xff] %v272_v33 }
  0x23   : > { %275 = vst [vmem:[%s1896_s30 + $0x110] sm:$0xff] %v274_v34  ;;  %277 = vst [vmem:[%s1896_s30 + $0x118] sm:$0xff] %v276_v35  ;;  %v278_v36 = vld [vmem:[%s1891_s29 + $0x240] sm:$0xff]  ;;  %v280_v37 = vld [vmem:[%s1891_s29 + $0x248] sm:$0xff] }
  0x24   : > { %v282_v38 = vld [vmem:[%s1891_s29 + $0x260] sm:$0xff]  ;;  %279 = vst [vmem:[%s1896_s30 + $0x120] sm:$0xff] %v278_v36  ;;  %281 = vst [vmem:[%s1896_s30 + $0x128] sm:$0xff] %v280_v37  ;;  %v284_v39 = vld [vmem:[%s1891_s29 + $0x268] sm:$0xff] }
  0x25   : > { %283 = vst [vmem:[%s1896_s30 + $0x130] sm:$0xff] %v282_v38  ;;  %v286_v40 = vld [vmem:[%s1891_s29 + $0x280] sm:$0xff]  ;;  %v288_v41 = vld [vmem:[%s1891_s29 + $0x288] sm:$0xff]  ;;  %285 = vst [vmem:[%s1896_s30 + $0x138] sm:$0xff] %v284_v39 }
  0x26   : > { %287 = vst [vmem:[%s1896_s30 + $0x140] sm:$0xff] %v286_v40  ;;  %289 = vst [vmem:[%s1896_s30 + $0x148] sm:$0xff] %v288_v41  ;;  %v290_v42 = vld [vmem:[%s1891_s29 + $0x2a0] sm:$0xff]  ;;  %v292_v43 = vld [vmem:[%s1891_s29 + $0x2a8] sm:$0xff] }
  0x27   : > { %v294_v44 = vld [vmem:[%s1891_s29 + $0x2c0] sm:$0xff]  ;;  %291 = vst [vmem:[%s1896_s30 + $0x150] sm:$0xff] %v290_v42  ;;  %293 = vst [vmem:[%s1896_s30 + $0x158] sm:$0xff] %v292_v43  ;;  %v296_v45 = vld [vmem:[%s1891_s29 + $0x2c8] sm:$0xff] }
  0x28   : > { %295 = vst [vmem:[%s1896_s30 + $0x160] sm:$0xff] %v294_v44  ;;  %v298_v46 = vld [vmem:[%s1891_s29 + $0x2e0] sm:$0xff]  ;;  %v300_v47 = vld [vmem:[%s1891_s29 + $0x2e8] sm:$0xff]  ;;  %297 = vst [vmem:[%s1896_s30 + $0x168] sm:$0xff] %v296_v45 }
  0x29   : > { %299 = vst [vmem:[%s1896_s30 + $0x170] sm:$0xff] %v298_v46  ;;  %301 = vst [vmem:[%s1896_s30 + $0x178] sm:$0xff] %v300_v47  ;;  %v302_v48 = vld [vmem:[%s1891_s29 + $0x300] sm:$0xff]  ;;  %v304_v49 = vld [vmem:[%s1891_s29 + $0x308] sm:$0xff] }
  0x2a   : > { %v306_v50 = vld [vmem:[%s1891_s29 + $0x320] sm:$0xff]  ;;  %303 = vst [vmem:[%s1896_s30 + $0x180] sm:$0xff] %v302_v48  ;;  %305 = vst [vmem:[%s1896_s30 + $0x188] sm:$0xff] %v304_v49  ;;  %v308_v51 = vld [vmem:[%s1891_s29 + $0x328] sm:$0xff] }
  0x2b   : > { %307 = vst [vmem:[%s1896_s30 + $0x190] sm:$0xff] %v306_v50  ;;  %v310_v52 = vld [vmem:[%s1891_s29 + $0x340] sm:$0xff]  ;;  %v312_v53 = vld [vmem:[%s1891_s29 + $0x348] sm:$0xff]  ;;  %309 = vst [vmem:[%s1896_s30 + $0x198] sm:$0xff] %v308_v51 }
  0x2c   : > { %311 = vst [vmem:[%s1896_s30 + $0x1a0] sm:$0xff] %v310_v52  ;;  %313 = vst [vmem:[%s1896_s30 + $0x1a8] sm:$0xff] %v312_v53  ;;  %v314_v54 = vld [vmem:[%s1891_s29 + $0x360] sm:$0xff]  ;;  %v316_v55 = vld [vmem:[%s1891_s29 + $0x368] sm:$0xff] }
  0x2d   : > { %v318_v56 = vld [vmem:[%s1891_s29 + $0x380] sm:$0xff]  ;;  %315 = vst [vmem:[%s1896_s30 + $0x1b0] sm:$0xff] %v314_v54  ;;  %317 = vst [vmem:[%s1896_s30 + $0x1b8] sm:$0xff] %v316_v55  ;;  %v320_v57 = vld [vmem:[%s1891_s29 + $0x388] sm:$0xff] }
  0x2e   : > { %319 = vst [vmem:[%s1896_s30 + $0x1c0] sm:$0xff] %v318_v56  ;;  %v322_v58 = vld [vmem:[%s1891_s29 + $0x3a0] sm:$0xff]  ;;  %v324_v59 = vld [vmem:[%s1891_s29 + $0x3a8] sm:$0xff]  ;;  %321 = vst [vmem:[%s1896_s30 + $0x1c8] sm:$0xff] %v320_v57 }
  0x2f   : > { %323 = vst [vmem:[%s1896_s30 + $0x1d0] sm:$0xff] %v322_v58  ;;  %325 = vst [vmem:[%s1896_s30 + $0x1d8] sm:$0xff] %v324_v59  ;;  %v326_v60 = vld [vmem:[%s1891_s29 + $0x3c0] sm:$0xff]  ;;  %v328_v61 = vld [vmem:[%s1891_s29 + $0x3c8] sm:$0xff] }
  0x30   : > { %v330_v62 = vld [vmem:[%s1891_s29 + $0x3e0] sm:$0xff]  ;;  %327 = vst [vmem:[%s1896_s30 + $0x1e0] sm:$0xff] %v326_v60  ;;  %329 = vst [vmem:[%s1896_s30 + $0x1e8] sm:$0xff] %v328_v61  ;;  %v332_v63 = vld [vmem:[%s1891_s29 + $0x3e8] sm:$0xff] }
  0x31   : > { %331 = vst [vmem:[%s1896_s30 + $0x1f0] sm:$0xff] %v330_v62  ;;  %333 = vst [vmem:[%s1896_s30 + $0x1f8] sm:$0xff] %v332_v63 }
  0x32 PF: > { %p1461_p6 = scmp.ge.s32.totalorder %s1819_s19, 1  ;;  %p355_p7 = scmp.lt.s32.totalorder %s1819_s19, 3 }
  0x34   : > { %p356_p8 = pnand %p1461_p6, %p355_p7 }
  0x35   : > { %s362_s5 = sand.u32 (!%p356_p8), 1, %s1803_s15   ;;  %v2029_v0 = vld.sshfl [vmem:[%s2174_s0] sm:$0x11 pattern:$0x75316420] (!%p356_p8)  ;;  %v505_v1 = vlaneseq (!%p356_p8)  ;;  %s1464_s10 = sshll.u32 (!%p356_p8), %s1811_s17, 6 }
  0x36   : > { %359 = sbr.rel (%p356_p8) target bundleno = 571 (0x23b), region = 55  ;;  %s1462_s8 = sshll.u32 (!%p356_p8), %s362_s5, 9  ;;  %v1821_v2 = vmov (!%p356_p8), 1966171168   ;;  %v501_v7 = vcombine.high (!%p356_p8), %v2029_v0, %v2029_v0 }
  0x37   : > { %v503_v3 = vunpack.c.l.s4 (!%p356_p8), %v1821_v2  ;;  %v2031_v4 = vshrl.u32 (!%p356_p8), %v505_v1, 7  ;;  %s2033_s9 = scalar_lea.vmem (!%p356_p8), [#allocation3], %s1462_s8  ;;  %p412_p9 = scmp.lt.s32.totalorder (!%p356_p8), %s1464_s10, 127 }
  0x38   : > { %v1653_v5 = vld [vmem:[%s2033_s9 + $0x4] ss:$16 sps:$4 sm:$0xff] (!%p356_p8)   ;;  %v1655_v6 = vld [vmem:[%s2033_s9 + $0xc] ss:$16 sps:$4 sm:$0xff] (!%p356_p8)   ;;  %v1657_v9 = vld [vmem:[%s2033_s9] ss:$16 sps:$4 sm:$0xff] (!%p356_p8)  }
  0x39   : > { %v504_v8 = vunpack.c.0.s8 (!%p356_p8), %v503_v3  ;;  %838 = vmatprep.subr.bf16.mxu0 (!%p356_p8), %v1653_v5  ;;  %v1658_v10 = vld [vmem:[%s2033_s9 + $0x8] ss:$16 sps:$4 sm:$0xff] (!%p356_p8)   ;;  %879 = vmatprep.subr.bf16.mxu1 (!%p356_p8), %v1655_v6  ;;  %v1659_v11 = vld [vmem:[%s2033_s9 + $0x24] ss:$16 sps:$4 sm:$0xff] (!%p356_p8)   ;;  %v1661_v13 = vld [vmem:[%s2033_s9 + $0x2c] ss:$16 sps:$4 sm:$0xff] (!%p356_p8)  }
  0x3a   : > { %839 = vmatpush1.bf16.msra.mxu0 (!%p356_p8), %v1657_v9  ;;  %880 = vmatpush1.bf16.msra.mxu1 (!%p356_p8), %v1658_v10  ;;  %v1663_v14 = vld [vmem:[%s2033_s9 + $0x20] ss:$16 sps:$4 sm:$0xff] (!%p356_p8)   ;;  %v1664_v15 = vld [vmem:[%s2033_s9 + $0x28] ss:$16 sps:$4 sm:$0xff] (!%p356_p8)   ;;  %v1665_v17 = vld [vmem:[%s2033_s9 + $0x44] ss:$16 sps:$4 sm:$0xff] (!%p356_p8)  }
  0x3b   : > { %v2043_v12 = vsub.s32 (!%p356_p8), %v504_v8, %v2031_v4  ;;  %840 = vmatprep.subr.bf16.mxu0 (!%p356_p8), %v1659_v11  ;;  %881 = vmatprep.subr.bf16.mxu1 (!%p356_p8), %v1661_v13  ;;  %v1667_v18 = vld [vmem:[%s2033_s9 + $0x4c] ss:$16 sps:$4 sm:$0xff] (!%p356_p8)   ;;  %v1669_v19 = vld [vmem:[%s2033_s9 + $0x40] ss:$16 sps:$4 sm:$0xff] (!%p356_p8)   ;;  %v1670_v20 = vld [vmem:[%s2033_s9 + $0x48] ss:$16 sps:$4 sm:$0xff] (!%p356_p8)  }
  0x3c   : > { %v1671_v21 = vld [vmem:[%s2033_s9 + $0x64] ss:$16 sps:$4 sm:$0xff] (!%p356_p8)   ;;  %v1673_v22 = vld [vmem:[%s2033_s9 + $0x6c] ss:$16 sps:$4 sm:$0xff] (!%p356_p8)   ;;  %v1675_v23 = vld [vmem:[%s2033_s9 + $0x60] ss:$16 sps:$4 sm:$0xff] (!%p356_p8)  }
  0x3d   : > { %v515_v16 = vrot.slane %v501_v7, %v2043_v12  ;;  %v1676_v24 = vld [vmem:[%s2033_s9 + $0x68] ss:$16 sps:$4 sm:$0xff]   ;;  %v1677_v25 = vld [vmem:[%s2033_s9 + $0x84] ss:$16 sps:$4 sm:$0xff]   ;;  %v1679_v26 = vld [vmem:[%s2033_s9 + $0x8c] ss:$16 sps:$4 sm:$0xff]  }
  0x3e   : > { %841 = vmatpush1.bf16.msra.mxu0 %v1663_v14  ;;  %882 = vmatpush1.bf16.msra.mxu1 %v1664_v15  ;;  %v1681_v27 = vld [vmem:[%s2033_s9 + $0x80] ss:$16 sps:$4 sm:$0xff]   ;;  %v1682_v28 = vld [vmem:[%s2033_s9 + $0x88] ss:$16 sps:$4 sm:$0xff]   ;;  %v1683_v29 = vld [vmem:[%s2033_s9 + $0xa4] ss:$16 sps:$4 sm:$0xff]  }
  0x3f   : > { %870 = vmatprep.mubr.bf16.mxu0 %v515_v16  ;;  %911 = vmatprep.mubr.bf16.mxu1 %v515_v16  ;;  %v1685_v30 = vld [vmem:[%s2033_s9 + $0xac] ss:$16 sps:$4 sm:$0xff]   ;;  %v1687_v31 = vld [vmem:[%s2033_s9 + $0xa0] ss:$16 sps:$4 sm:$0xff]   ;;  %v1688_v32 = vld [vmem:[%s2033_s9 + $0xa8] ss:$16 sps:$4 sm:$0xff]   ;;  %v508_v16 = vrot.slane %v2029_v0, %v2043_v12 }
  0x40   : > { %842 = vmatprep.subr.bf16.mxu0 %v1665_v17  ;;  %883 = vmatprep.subr.bf16.mxu1 %v1667_v18  ;;  %v1689_v33 = vld [vmem:[%s2033_s9 + $0xc4] ss:$16 sps:$4 sm:$0xff]   ;;  %v1691_v34 = vld [vmem:[%s2033_s9 + $0xcc] ss:$16 sps:$4 sm:$0xff]   ;;  %v1693_v35 = vld [vmem:[%s2033_s9 + $0xc0] ss:$16 sps:$4 sm:$0xff]  }
  0x41   : > { %v1694_v36 = vld [vmem:[%s2033_s9 + $0xc8] ss:$16 sps:$4 sm:$0xff]   ;;  %v1695_v37 = vld [vmem:[%s2033_s9 + $0xe4] ss:$16 sps:$4 sm:$0xff]   ;;  %v1697_v38 = vld [vmem:[%s2033_s9 + $0xec] ss:$16 sps:$4 sm:$0xff]  }
  0x42   : > { %843 = vmatpush1.bf16.msra.mxu0 %v1669_v19  ;;  %884 = vmatpush1.bf16.msra.mxu1 %v1670_v20  ;;  %v1699_v39 = vld [vmem:[%s2033_s9 + $0xe0] ss:$16 sps:$4 sm:$0xff]   ;;  %v1700_v40 = vld [vmem:[%s2033_s9 + $0xe8] ss:$16 sps:$4 sm:$0xff]   ;;  %v1701_v41 = vld [vmem:[%s2033_s9 + $0x104] ss:$16 sps:$4 sm:$0xff]  }
  0x43   : > { %844 = vmatprep.subr.bf16.mxu0 %v1671_v21  ;;  %885 = vmatprep.subr.bf16.mxu1 %v1673_v22  ;;  %v1703_v42 = vld [vmem:[%s2033_s9 + $0x10c] ss:$16 sps:$4 sm:$0xff]   ;;  %v1705_v43 = vld [vmem:[%s2033_s9 + $0x100] ss:$16 sps:$4 sm:$0xff]   ;;  %v1706_v44 = vld [vmem:[%s2033_s9 + $0x108] ss:$16 sps:$4 sm:$0xff]  }
  0x44   : > { %v1707_v45 = vld [vmem:[%s2033_s9 + $0x124] ss:$16 sps:$4 sm:$0xff]   ;;  %v1709_v46 = vld [vmem:[%s2033_s9 + $0x12c] ss:$16 sps:$4 sm:$0xff]   ;;  %s2186_s10 = smov (!%p412_p9, %s1464_s10), 127  ;;  %s1463_s15 = sshll.u32 %s1811_s17, 2 }
  0x45   : > { %v1711_v47 = vld [vmem:[%s2033_s9 + $0x120] ss:$16 sps:$4 sm:$0xff]   ;;  %v1712_v48 = vld [vmem:[%s2033_s9 + $0x128] ss:$16 sps:$4 sm:$0xff]   ;;  %v1713_v49 = vld [vmem:[%s2033_s9 + $0x144] ss:$16 sps:$4 sm:$0xff]  }
  0x46   : > { %845 = vmatpush1.bf16.msra.mxu0 %v1675_v23  ;;  %886 = vmatpush1.bf16.msra.mxu1 %v1676_v24  ;;  %v1715_v50 = vld [vmem:[%s2033_s9 + $0x14c] ss:$16 sps:$4 sm:$0xff]   ;;  %s1465_s11 = sshll.u32 %s2186_s10, 2  ;;  %v1717_v51 = vld [vmem:[%s2033_s9 + $0x140] ss:$16 sps:$4 sm:$0xff]   ;;  %p407_p10 = scmp.lt.s32.totalorder %s1463_s15, 7 }
  0x47   : > { %846 = vmatprep.subr.bf16.mxu0 %v1677_v25  ;;  %887 = vmatprep.subr.bf16.mxu1 %v1679_v26  ;;  %v1718_v52 = vld [vmem:[%s2033_s9 + $0x148] ss:$16 sps:$4 sm:$0xff]   ;;  %v1719_v53 = vld [vmem:[%s2033_s9 + $0x164] ss:$16 sps:$4 sm:$0xff]   ;;  %v1721_v54 = vld [vmem:[%s2033_s9 + $0x16c] ss:$16 sps:$4 sm:$0xff]   ;;  %s2091_s14 = scalar_lea.vmem %s2177_s3, %s1465_s11 }
  0x48   : > { %v1723_v55 = vld [vmem:[%s2033_s9 + $0x160] ss:$16 sps:$4 sm:$0xff]   ;;  %v1724_v56 = vld [vmem:[%s2033_s9 + $0x168] ss:$16 sps:$4 sm:$0xff]   ;;  %v1725_v57 = vld [vmem:[%s2033_s9 + $0x184] ss:$16 sps:$4 sm:$0xff]  }
  0x49   : > { %v1727_v58 = vld [vmem:[%s2033_s9 + $0x18c] ss:$16 sps:$4 sm:$0xff]   ;;  %v1729_v59 = vld [vmem:[%s2033_s9 + $0x180] ss:$16 sps:$4 sm:$0xff]   ;;  %v1730_v60 = vld [vmem:[%s2033_s9 + $0x188] ss:$16 sps:$4 sm:$0xff]  }
  0x4a   : > { %847 = vmatpush1.bf16.msra.mxu0 %v1681_v27  ;;  %888 = vmatpush1.bf16.msra.mxu1 %v1682_v28  ;;  %v1731_v61 = vld [vmem:[%s2033_s9 + $0x1a4] ss:$16 sps:$4 sm:$0xff]   ;;  %v1733_v62 = vld [vmem:[%s2033_s9 + $0x1ac] ss:$16 sps:$4 sm:$0xff]   ;;  %v1735_v63 = vld [vmem:[%s2033_s9 + $0x1a0] ss:$16 sps:$4 sm:$0xff]  }
  0x4b   : > { %848 = vmatprep.subr.bf16.mxu0 %v1683_v29  ;;  %889 = vmatprep.subr.bf16.mxu1 %v1685_v30  ;;  %v1736_v1 = vld [vmem:[%s2033_s9 + $0x1a8] ss:$16 sps:$4 sm:$0xff]   ;;  %v1737_v2 = vld [vmem:[%s2033_s9 + $0x1c4] ss:$16 sps:$4 sm:$0xff]   ;;  %v1739_v3 = vld [vmem:[%s2033_s9 + $0x1cc] ss:$16 sps:$4 sm:$0xff]  }
  0x4c   : > { %v1741_v5 = vld [vmem:[%s2033_s9 + $0x1c0] ss:$16 sps:$4 sm:$0xff]   ;;  %v1742_v6 = vld [vmem:[%s2033_s9 + $0x1c8] ss:$16 sps:$4 sm:$0xff]   ;;  %v1743_v7 = vld [vmem:[%s2033_s9 + $0x1e4] ss:$16 sps:$4 sm:$0xff]  }
  0x4d   : > { %v1745_v8 = vld [vmem:[%s2033_s9 + $0x1ec] ss:$16 sps:$4 sm:$0xff]   ;;  %v1747_v9 = vld [vmem:[%s2033_s9 + $0x1e0] ss:$16 sps:$4 sm:$0xff]   ;;  %v1748_v10 = vld [vmem:[%s2033_s9 + $0x1e8] ss:$16 sps:$4 sm:$0xff]  }
  0x4e   : > { %849 = vmatpush1.bf16.msra.mxu0 %v1687_v31  ;;  %890 = vmatpush1.bf16.msra.mxu1 %v1688_v32  ;;  %v1749_v11 = vld [vmem:[%s2091_s14 + $0x40] sm:$0xff]   ;;  %v1753_v17 = vld [vmem:[%s2091_s14 + $0x48] sm:$0xff]   ;;  %v1757_v0 = vld [vmem:[%s2091_s14 + $0x50] sm:$0xff]   ;;  %s2188_s15 = smov (!%p407_p10, %s1463_s15), 7  ;;  %p417_p11 = scmp.lt.s32.totalorder %s1811_s17, 1 }
  0x4f   : > { %850 = vmatprep.subr.bf16.mxu0 %v1689_v33  ;;  %891 = vmatprep.subr.bf16.mxu1 %v1691_v34  ;;  %v1751_v13 = vld [vmem:[%s2091_s14 + $0xc0] sm:$0xff]   ;;  %v1755_v18 = vld [vmem:[%s2091_s14 + $0xc8] sm:$0xff]   ;;  %v1759_v12 = vld [vmem:[%s2091_s14 + $0xd0] sm:$0xff]   ;;  %s409_s24 = scalar_lea.vmem %s2176_s2, %s2188_s15 }
  0x50   : > { %v1750_v14 = vld [vmem:[%s2091_s14] sm:$0xff]   ;;  %v1754_v19 = vld [vmem:[%s2091_s14 + $0x8] sm:$0xff]   ;;  %v1758_v21 = vld [vmem:[%s2091_s14 + $0x10] sm:$0xff]   ;;  %s2190_s17 = smov (!%p417_p11, %s1811_s17), 1 }
  0x51   : > { %v1752_v15 = vld [vmem:[%s2091_s14 + $0x80] sm:$0xff]   ;;  %v1756_v20 = vld [vmem:[%s2091_s14 + $0x88] sm:$0xff]   ;;  %v1760_v22 = vld [vmem:[%s2091_s14 + $0x90] sm:$0xff]   ;;  %s1466_s25 = sshll.u32 %s2190_s17, 1 }
  0x52   : > { %851 = vmatpush1.bf16.msra.mxu0 %v1693_v35  ;;  %892 = vmatpush1.bf16.msra.mxu1 %v1694_v36  ;;  %v1761_v23 = vld [vmem:[%s2091_s14 + $0x58] sm:$0xff]   ;;  %v1765_v27 = vld [vmem:[%s2091_s14 + $0x60] sm:$0xff]   ;;  %v1769_v31 = vld [vmem:[%s2091_s14 + $0x68] sm:$0xff]   ;;  %s420_s28 = scalar_lea.vmem %s2178_s4, %s1466_s25 }
  0x53   : > { %852 = vmatprep.subr.bf16.mxu0 %v1695_v37  ;;  %893 = vmatprep.subr.bf16.mxu1 %v1697_v38  ;;  %v1762_v24 = vld [vmem:[%s2091_s14 + $0x18] sm:$0xff]   ;;  %v1766_v28 = vld [vmem:[%s2091_s14 + $0x20] sm:$0xff]   ;;  %v1770_v32 = vld [vmem:[%s2091_s14 + $0x28] sm:$0xff]  }
  0x54   : > { %v1763_v25 = vld [vmem:[%s2091_s14 + $0xd8] sm:$0xff]   ;;  %v1767_v29 = vld [vmem:[%s2091_s14 + $0xe0] sm:$0xff]   ;;  %v1771_v33 = vld [vmem:[%s2091_s14 + $0xe8] sm:$0xff]  }
  0x55   : > { %v1764_v26 = vld [vmem:[%s2091_s14 + $0x98] sm:$0xff]   ;;  %v1768_v30 = vld [vmem:[%s2091_s14 + $0xa0] sm:$0xff]   ;;  %v1772_v34 = vld [vmem:[%s2091_s14 + $0xa8] sm:$0xff]  }
  0x56   : > { %853 = vmatpush1.bf16.msra.mxu0 %v1699_v39  ;;  %894 = vmatpush1.bf16.msra.mxu1 %v1700_v40  ;;  %v1773_v35 = vld [vmem:[%s2091_s14 + $0x70] sm:$0xff]   ;;  %v1777_v39 = vld [vmem:[%s2091_s14 + $0x78] sm:$0xff]  }
  0x57   : > { %854 = vmatprep.subr.bf16.mxu0 %v1701_v41  ;;  %895 = vmatprep.subr.bf16.mxu1 %v1703_v42  ;;  %v1774_v36 = vld [vmem:[%s2091_s14 + $0x30] sm:$0xff]   ;;  %v1779_v40 = vld [vmem:[%s2091_s14 + $0xf8] sm:$0xff]  }
  0x58   : > { %v1775_v37 = vld [vmem:[%s2091_s14 + $0xf0] sm:$0xff]   ;;  %v1778_v41 = vld [vmem:[%s2091_s14 + $0x38] sm:$0xff]  }
  0x59   : > { %v1776_v38 = vld [vmem:[%s2091_s14 + $0xb0] sm:$0xff]   ;;  %v1780_v42 = vld [vmem:[%s2091_s14 + $0xb8] sm:$0xff]  }
  0x5a   : > { %855 = vmatpush1.bf16.msra.mxu0 %v1705_v43  ;;  %896 = vmatpush1.bf16.msra.mxu1 %v1706_v44  ;;  %v1822_v43 = vmov 1983009808  }
  0x5b   : > { %856 = vmatprep.subr.bf16.mxu0 %v1707_v45  ;;  %897 = vmatprep.subr.bf16.mxu1 %v1709_v46  ;;  %v927_v44 = vunpack.c.l.s4 %v1822_v43  ;;  %v952_v45 = vsub.s32 0, %v2031_v4  ;;  %v956_v46 = vsub.s32 1, %v2031_v4 }
  0x5e   : > { %857 = vmatpush1.bf16.msra.mxu0 %v1711_v47  ;;  %898 = vmatpush1.bf16.msra.mxu1 %v1712_v48  ;;  %v960_v47 = vsub.s32 2, %v2031_v4  ;;  %v964_v48 = vsub.s32 3, %v2031_v4 }
  0x5f   : > { %858 = vmatprep.subr.bf16.mxu0 %v1713_v49  ;;  %899 = vmatprep.subr.bf16.mxu1 %v1715_v50  ;;  %v948_v49 = vld [vmem:[%s409_s24] sm:$0xf]  ;;  %v928_v50 = vunpack.c.0.s8 %v927_v44 }
  0x62   : > { %859 = vmatpush1.bf16.msra.mxu0 %v1717_v51  ;;  %900 = vmatpush1.bf16.msra.mxu1 %v1718_v52  ;;  %v953_v51 = vrot.slane %v948_v49, %v952_v45  ;;  %v957_v52 = vrot.slane %v948_v49, %v956_v46 }
  0x63   : > { %860 = vmatprep.subr.bf16.mxu0 %v1719_v53  ;;  %901 = vmatprep.subr.bf16.mxu1 %v1721_v54  ;;  %v961_v53 = vrot.slane %v948_v49, %v960_v47  ;;  %v965_v54 = vrot.slane %v948_v49, %v964_v48 }
  0x66   : > { %861 = vmatpush1.bf16.msra.mxu0 %v1723_v55  ;;  %902 = vmatpush1.bf16.msra.mxu1 %v1724_v56  ;;  %v931_v55 = vsub.s32 %v928_v50, %v2031_v4  ;;  %v966_v56 = vcombine.low %v953_v51, %v957_v52 }
  0x67   : > { %862 = vmatprep.subr.bf16.mxu0 %v1725_v57  ;;  %903 = vmatprep.subr.bf16.mxu1 %v1727_v58  ;;  %v967_v57 = vcombine.low %v961_v53, %v965_v54 }
  0x6a   : > { %863 = vmatpush1.bf16.msra.mxu0 %v1729_v59  ;;  %904 = vmatpush1.bf16.msra.mxu1 %v1730_v60  ;;  %v974_v60 = vrot.slane %v966_v56, %v931_v55 }
  0x6b   : > { %864 = vmatprep.subr.bf16.mxu0 %v1731_v61  ;;  %905 = vmatprep.subr.bf16.mxu1 %v1733_v62  ;;  %v981_v61 = vrot.slane %v967_v57, %v931_v55 }
  0x6e   : > { %865 = vmatpush1.bf16.msra.mxu0 %v1735_v63  ;;  %906 = vmatpush1.bf16.msra.mxu1 %v1736_v1 }
  0x6f   : > { %866 = vmatprep.subr.bf16.mxu0 %v1737_v2  ;;  %907 = vmatprep.subr.bf16.mxu1 %v1739_v3 }
  0x72   : > { %867 = vmatpush1.bf16.msra.mxu0 %v1741_v5  ;;  %908 = vmatpush1.bf16.msra.mxu1 %v1742_v6 }
  0x73   : > { %868 = vmatprep.subr.bf16.mxu0 %v1743_v7  ;;  %909 = vmatprep.subr.bf16.mxu1 %v1745_v8 }
  0x76   : > { %869 = vmatpush1.bf16.msra.mxu0 %v1747_v9  ;;  %910 = vmatpush1.bf16.msra.mxu1 %v1748_v10  ;;  %v982_v10 = vcombine.low %v974_v60, %v981_v61 }
  0x77   : > { %1567 = vmatprep.subr.bf16.mxu0 %v1749_v11  ;;  %1589 = vmatprep.subr.bf16.mxu1 %v1751_v13 }
  0x79   : > { %871 = vmatmul.mubr.bf16.vlgmr.msra.gmra.mrb[0].mxu0 %v508_v16  ;;  %912 = vmatmul.mubr.bf16.vlgmr.msra.gmra.mrb[0].mxu1 %v508_v16 }
  0x7a   : > { %1568 = vmatpush3.bf16.msra.mxu0 %v1750_v14  ;;  %1590 = vmatpush3.bf16.msra.mxu1 %v1752_v15 }
  0x7b   : > { %1569 = vmatprep.subr.bf16.mxu0 %v1753_v17  ;;  %1591 = vmatprep.subr.bf16.mxu1 %v1755_v18 }
  0x7e   : > { %1570 = vmatpush3.bf16.msra.mxu0 %v1754_v19  ;;  %1592 = vmatpush3.bf16.msra.mxu1 %v1756_v20 }
  0x7f   : > { %1571 = vmatprep.subr.bf16.mxu0 %v1757_v0  ;;  %1593 = vmatprep.subr.bf16.mxu1 %v1759_v12 }
  0x82   : > { %1572 = vmatpush3.bf16.msra.mxu0 %v1758_v21  ;;  %1594 = vmatpush3.bf16.msra.mxu1 %v1760_v22 }
  0x83   : > { %1573 = vmatprep.subr.bf16.mxu0 %v1761_v23  ;;  %1595 = vmatprep.subr.bf16.mxu1 %v1763_v25 }
  0x86   : > { %1574 = vmatpush3.bf16.msra.mxu0 %v1762_v24  ;;  %1596 = vmatpush3.bf16.msra.mxu1 %v1764_v26 }
  0x87   : > { %1575 = vmatprep.subr.bf16.mxu0 %v1765_v27  ;;  %1597 = vmatprep.subr.bf16.mxu1 %v1767_v29 }
  0x8a   : > { %1576 = vmatpush3.bf16.msra.mxu0 %v1766_v28  ;;  %1598 = vmatpush3.bf16.msra.mxu1 %v1768_v30 }
  0x8b   : > { %1577 = vmatprep.subr.bf16.mxu0 %v1769_v31  ;;  %1599 = vmatprep.subr.bf16.mxu1 %v1771_v33 }
  0x8e   : > { %1578 = vmatpush3.bf16.msra.mxu0 %v1770_v32  ;;  %1600 = vmatpush3.bf16.msra.mxu1 %v1772_v34 }
  0x8f   : > { %1579 = vmatprep.subr.bf16.mxu0 %v1773_v35  ;;  %1601 = vmatprep.subr.bf16.mxu1 %v1775_v37 }
  0x92   : > { %1580 = vmatpush3.bf16.msra.mxu0 %v1774_v36  ;;  %1602 = vmatpush3.bf16.msra.mxu1 %v1776_v38 }
  0x93   : > { %1581 = vmatprep.subr.bf16.mxu0 %v1777_v39  ;;  %1603 = vmatprep.subr.bf16.mxu1 %v1779_v40 }
  0x96   : > { %1582 = vmatpush3.bf16.msra.mxu0 %v1778_v41  ;;  %1604 = vmatpush3.bf16.msra.mxu1 %v1780_v42 }
 0x14c   : > { %v872_v58 = vpop.f32.mrb[0].mxu0  ;;  %v913_v59 = vpop.f32.mrb[0].mxu1 }
 0x14d   : > { %v874_v62 = vpop.f32.mrb[1].mxu0  ;;  %v915_v63 = vpop.f32.mrb[1].mxu1 }
 0x14e   : > { %v924_v1 = vcombine.low %v872_v58, %v874_v62  ;;  %v925_v2 = vcombine.low %v913_v59, %v915_v63  ;;  %v876_v3 = vpop.f32.mrb[2].mxu0  ;;  %v917_v5 = vpop.f32.mrb[2].mxu1 }
 0x14f   : > { %v877_v6 = vpop.f32.mrb[3].mxu0  ;;  %v918_v7 = vpop.f32.mrb[3].mxu1 }
 0x150   : > { %v932_v8 = vrot.slane %v924_v1, %v931_v55  ;;  %v939_v9 = vrot.slane %v925_v2, %v931_v55 }
 0x152   : > { %v940_v11 = vcombine.low %v932_v8, %v939_v9 }
 0x154   : > { %v984_v4 = vadd.f32 %v982_v10, %v940_v11 }
 0x156   : > { %v985_v13 = vmax.f32 %v984_v4, 0.0 }
 0x158   : > { %v994_v14 = vrot.slane %v985_v13, %v931_v55  ;;  %v987_v15 = vcombine.high %v985_v13, %v985_v13 }
 0x15a   : > { %v1002_v16 = vcombine.high %v994_v14, %v994_v14  ;;  %v1001_v17 = vrot.slane %v987_v15, %v931_v55  ;;  %v1008_v20 = vpack.c.bf16 %v994_v14, %v994_v14 }
 0x15c   : > { %v1009_v18 = vpack.c.bf16 %v1002_v16, %v1002_v16  ;;  %v1003_v19 = vcombine.high %v1001_v17, %v1001_v17  ;;  %v1010_v12 = vpack.c.bf16 %v1001_v17, %v1001_v17 }
 0x15e   : > { %1300 = vmatprep.mubr.bf16.mxu0 %v1009_v18  ;;  %v1011_v0 = vpack.c.bf16 %v1003_v19, %v1003_v19 }
 0x15f   : > { %1301 = vmatmul.mubr.bf16.vlgmr.msra.gmra.mrb[4].mxu0 %v1008_v20 }
 0x160   : > { %1340 = vmatprep.mubr.bf16.mxu1 %v1011_v0 }
 0x161   : > { %1341 = vmatmul.mubr.bf16.vlgmr.msra.gmra.mrb[4].mxu1 %v1010_v12 }
 0x232   : > { %v1583_v21 = vpop.f32.mrb[4].mxu0 }
 0x233   : > { %v1584_v22 = vpop.f32.mrb[5].mxu0 }
 0x234   : > { %v1585_v23 = vadd.f32 %v1584_v22, %v1583_v21  ;;  %v1586_v24 = vpop.f32.mrb[6].mxu0  ;;  %v1605_v25 = vpop.f32.mrb[4].mxu1 }
 0x235   : > { %v1587_v26 = vpop.f32.mrb[7].mxu0  ;;  %v1606_v27 = vpop.f32.mrb[5].mxu1 }
 0x236   : > { %v1607_v28 = vadd.f32 %v1606_v27, %v1605_v25  ;;  %v1608_v29 = vpop.f32.mrb[6].mxu1 }
 0x237   : > { %v1609_v30 = vpop.f32.mrb[7].mxu1 }
 0x238   : > { %v1343_v31 = vadd.f32 %v1607_v28, %v1585_v23 }
 0x23a   : > { %1348 = vst [vmem:[%s420_s28] sm:$0x3] %v1343_v31 }
 0x23b PF: > { %s14_s19 = sadd.s32 1, %s1819_s19   ;;  %s2179_s15 = smov %s1807_s16 }
 0x23c   : > { %p11_p12 = scmp.ge.s32.totalorder %s14_s19, 4   ;;  %s2180_s16 = smov %s1883_s23 }
 0x23d   : > { %s2181_s17 = smov %s1815_s18  ;;  %s2182_s18 = smov %s2184_s20 }
 0x23e   :  { %13 = sbr.rel (!%p11_p12) target bundleno = 3 (0x3), region = 111 }

// kernel: net_forward.6
= control target key start
LH: loop header
LB: loop body
LE: loop exit
PB: predicated region body
PF: predicated region fallthrough
CT: control target
= control target key end

     0   :  { %s2008_s15 = smov 0   ;;  %s2328_s0 = inlined_call_operand.vmem [shape: bf16[2,24,32], index: 0, kind: input, shape index: {}]   ;;  %s2329_s1 = inlined_call_operand.vmem [shape: bf16[2,24,32], index: 1, kind: input, shape index: {}]   ;;  %s2330_s2 = inlined_call_operand.vmem [shape: bf16[288,64], index: 2, kind: input, shape index: {}]   ;;  %s2331_s3 = inlined_call_operand.vmem [shape: f32[1,64], index: 3, kind: input, shape index: {}]   ;;  %s2332_s4 = inlined_call_operand.vmem [shape: bf16[2,6,64], index: 4, kind: output, shape index: {}]  }
   0x1 LB: > { %s1605_s16 = sadd.s32 4294967295, %s1979_s15   ;;  %p1609_p0 = scmp.ge.s32.totalorder %s1979_s15, 1  ;;  %s1979_s15 = sphi %s2008_s15, %s14_s15  }
   0x2   : > { %p172_p1 = scmp.lt.s32.totalorder %s1979_s15, 3 }
   0x4   : > { %p173_p2 = pnand %p1609_p0, %p172_p1 }
   0x5   : > { %v1916_v0 = vld [vmem:[%s2330_s2 + $0x10] sm:$0xff] (!%p173_p2)   ;;  %v1981_v1 = vmov (!%p173_p2), 0.0   ;;  %v1917_v2 = vld [vmem:[%s2330_s2 + $0x40] sm:$0xff] (!%p173_p2)   ;;  %v1918_v3 = vld [vmem:[%s2330_s2 + $0x18] sm:$0xff] (!%p173_p2)   ;;  %vm1982_vm0 = vmmov (!%p173_p2), 0   ;;  %p202_p3 = scmp.lt.s32.totalorder (!%p173_p2), %s1605_s16, 1 }
   0x6   : > { %176 = sbr.rel (%p173_p2) target bundleno = 337 (0x151), region = 36  ;;  %1745 = vmatprep.subr.bf16.mxu0 (!%p173_p2), %v1981_v1  ;;  %1769 = vmatprep.subr.bf16.mxu1 (!%p173_p2), %v1981_v1  ;;  %v1919_v4 = vld [vmem:[%s2330_s2 + $0x48] sm:$0xff] (!%p173_p2)   ;;  %vm252_vm1 = vcmask (!%p173_p2), 261120   ;;  %v1921_v16 = vld [vmem:[%s2330_s2] sm:$0xff] (!%p173_p2)   ;;  %v1923_v19 = vld [vmem:[%s2330_s2 + $0x30] sm:$0xff] (!%p173_p2)   ;;  %vm737_vm2 = vcmask (!%p173_p2), 1044480  }
   0x7   : > { %1746 = vmatpush3.bf16.msra.mxu0 (!%p173_p2), %v1916_v0  ;;  %1749 = vmatprep.mubr.msk.bf16.mxu0 (!%p173_p2), %vm1982_vm0, %v1981_v1  ;;  %v1924_v21 = vld [vmem:[%s2330_s2 + $0x38] sm:$0xff] (!%p173_p2)   ;;  %v1925_v22 = vld [vmem:[%s2330_s2 + $0x8] sm:$0xff] (!%p173_p2)   ;;  %v1927_v27 = vld [vmem:[%s2330_s2 + $0x50] sm:$0xff] (!%p173_p2)   ;;  %vm660_vm3 = vsmask.f32 (!%p173_p2), 4352  ;;  %vm423_vm4 = vcmask (!%p173_p2), 523264  }
   0x8   : > { %1770 = vmatpush3.bf16.msra.mxu1 (!%p173_p2), %v1917_v2  ;;  %1747 = vmatprep.subr.bf16.mxu0 (!%p173_p2), %v1981_v1  ;;  %v1929_v28 = vld [vmem:[%s2330_s2 + $0x20] sm:$0xff] (!%p173_p2)   ;;  %v1930_v30 = vld [vmem:[%s2330_s2 + $0x58] sm:$0xff] (!%p173_p2)   ;;  %v1933_v34 = vld [vmem:[%s2330_s2 + $0x28] sm:$0xff] (!%p173_p2)   ;;  %vm425_vm5 = vcmask (!%p173_p2), 519168   ;;  %vm1538_vm6 = vcmask (!%p173_p2), 518144  }
   0x9   : > { %1771 = vmatprep.subr.bf16.mxu1 (!%p173_p2), %v1981_v1  ;;  %1773 = vmatprep.mubr.msk.bf16.mxu1 (!%p173_p2), %vm1982_vm0, %v1981_v1  ;;  %v1932_v37 = vld [vmem:[%s2330_s2 + $0x60] sm:$0xff] (!%p173_p2)   ;;  %v1934_v50 = vld [vmem:[%s2330_s2 + $0x68] sm:$0xff] (!%p173_p2)   ;;  %v1936_v54 = vld [vmem:[%s2330_s2 + $0x70] sm:$0xff] (!%p173_p2)  }
   0xa   : > { %v1939_v61 = vld [vmem:[%s2330_s2 + $0x10] sm:$0xff] (!%p173_p2)   ;;  %v1940_v62 = vld [vmem:[%s2330_s2 + $0x78] sm:$0xff] (!%p173_p2)  }
   0xb   : > { %1748 = vmatpush3.bf16.msra.mxu0 (!%p173_p2), %v1918_v3  ;;  %v1941_v63 = vld [vmem:[%s2330_s2 + $0x18] sm:$0xff] (!%p173_p2)  }
   0xc   : > { %1772 = vmatpush3.bf16.msra.mxu1 (!%p173_p2), %v1919_v4  ;;  %1753 = vmatprep.subr.bf16.mxu0 (!%p173_p2), %v1981_v1 }
   0xd   : > { %s2334_s16 = smov (!%p202_p3, %s1605_s16), 1  ;;  %1777 = vmatprep.subr.bf16.mxu1 %v1981_v1 }
   0xe   : > { %s1905_s25 = smul.u32 12, %s2334_s16  ;;  %s1612_s29 = sshll.u32 %s2334_s16, 2 }
   0xf   : > { %s215_s7 = scalar_lea.vmem %s2332_s4, %s1612_s29 }
  0x10   : > { %s2043_s28 = scalar_lea.vmem %s2328_s0, %s1905_s25  ;;  %s2048_s5 = scalar_lea.vmem %s2329_s1, %s1905_s25 }
  0x11   : > { %v217_v5 = vld [vmem:[%s2043_s28] sm:$0xf]  ;;  %v2053_v6 = vld [vmem:[%s2043_s28 + $0x4] sm:$0x7]  ;;  %v2097_v33 = vld [vmem:[%s2043_s28 + $0x8] sm:$0x3] }
  0x12   : > { %v429_v7 = vld [vmem:[%s2048_s5] sm:$0xf]  ;;  %v1613_v8 = vcombine.low %v217_v5, %v2053_v6  ;;  %v435_v9 = vld [vmem:[%s2048_s5 + $0x4] sm:$0x7]  ;;  %v1638_v40 = vcombine.low %v2097_v33, %v2097_v33 }
  0x13   : > { %v1625_v10 = vcombine.low %v429_v7, %v435_v9  ;;  %v430_v23 = vld [vmem:[%s2048_s5 + $0x4] sm:$0x3]  ;;  %v567_v26 = vld [vmem:[%s2048_s5] sm:$0xe] }
  0x14   : > { %v234_v11 = vshrl.u32 %v1613_v8, 16  ;;  %v236_v12 = vshll.u32 %v1613_v8, 16  ;;  %v1629_v24 = vcombine.low %v429_v7, %v430_v23  ;;  %v218_v25 = vld [vmem:[%s2043_s28 + $0x4] sm:$0x3]  ;;  %v1633_v31 = vcombine.low %v567_v26, %v435_v9  ;;  %v640_v32 = vld [vmem:[%s2043_s28] sm:$0x8] }
  0x15   : > { %v446_v13 = vshrl.u32 %v1625_v10, 16  ;;  %v448_v14 = vshll.u32 %v1625_v10, 16  ;;  %v1617_v29 = vcombine.low %v217_v5, %v218_v25  ;;  %v2104_v35 = vld [vmem:[%s2043_s28 + $0x4] sm:$0xf]  ;;  %v356_v39 = vld [vmem:[%s2043_s28] sm:$0xe] }
  0x16   : > { %v238_v15 = vrot.slane %v236_v12, 1  ;;  %v575_v36 = vrot.slane %v1633_v31, 1  ;;  %v1938_v38 = vld [vmem:[%s2043_s28 + $0x8] ss:$0 sps:$4 sm:$0x11]   ;;  %v1637_v41 = vcombine.low %v640_v32, %v2104_v35  ;;  %v1621_v44 = vcombine.low %v356_v39, %v2053_v6  ;;  %v1943_v9 = vld [vmem:[%s2330_s2 + $0x80] sm:$0xff]  }
  0x17   : > { %v450_v17 = vrot.slane %v448_v14, 1  ;;  %v2119_v42 = vld [vmem:[%s2048_s5] sm:$0xf]  ;;  %v2122_v43 = vld [vmem:[%s2048_s5 + $0x4] sm:$0x7]  ;;  %v670_v47 = vshrl.u32 %v1638_v40, 16 }
  0x18   : > { %v239_v18 = vor.u32 %v238_v15, %v234_v11  ;;  %v662_v45 = vshrl.u32 %v1637_v41, 16  ;;  %v665_v46 = vshll.u32 %v1637_v41, 16  ;;  %v673_v48 = vshll.u32 %v1638_v40, 16  ;;  %v1073_v5 = vld [vmem:[%s2043_s28] sm:$0x8]  ;;  %v1946_v14 = vld [vmem:[%s2330_s2 + $0x88] sm:$0xff]  }
  0x19   : > { %v451_v20 = vor.u32 %v450_v17, %v446_v13  ;;  %v1650_v49 = vcombine.low %v2119_v42, %v2122_v43  ;;  %v738_v51 = vrot.slane %v1637_v41, 3  ;;  %v739_v52 = vrot.slane %v1938_v38, 3  ;;  %v2154_v6 = vld [vmem:[%s2043_s28 + $0x4] sm:$0xf]  ;;  %v2158_v7 = vld [vmem:[%s2043_s28 + $0x8] sm:$0x3] }
  0x1a   : > { %1750 = vmatmul.mubr.msk.bf16.vlgmr.msra.gmra.mrb[0].mxu0 %vm252_vm1, %v239_v18  ;;  %v364_v53 = vrot.slane %v1621_v44, 1  ;;  %v664_v55 = vrot.slane %v662_v45, 3  ;;  %v667_v56 = vrot.slane %v665_v46, 4  ;;  %v672_v57 = vrot.slane %v670_v47, 3  ;;  %v1945_v13 = vld [vmem:[%s2330_s2] sm:$0xff]   ;;  %v1956_v38 = vld [vmem:[%s2330_s2 + $0x28] sm:$0xff]  }
  0x1b   : > { %1754 = vmatpush3.bf16.msra.mxu0 %v1921_v16  ;;  %1774 = vmatmul.mubr.msk.bf16.vlgmr.msra.gmra.mrb[0].mxu1 %vm252_vm1, %v451_v20  ;;  %v675_v58 = vrot.slane %v673_v48, 4  ;;  %v883_v59 = vshll.u32 %v1650_v49, 16  ;;  %v740_v60 = vsel %vm737_vm2, %v738_v51, %v739_v52  ;;  %v881_v3 = vshrl.u32 %v1650_v49, 16  ;;  %v865_v26 = vld [vmem:[%s2048_s5 + $0x4] sm:$0x3] }
  0x1c   : > { %1778 = vmatpush3.bf16.msra.mxu1 %v1923_v19  ;;  %1755 = vmatprep.subr.bf16.mxu0 %v1981_v1  ;;  %v668_v0 = vor.u32 %v667_v56, %v664_v55  ;;  %v2170_v11 = vcombine.low %v1073_v5, %v2154_v6  ;;  %v1663_v12 = vcombine.low %v2158_v7, %v2158_v7  ;;  %v1948_v19 = vld [vmem:[%s2330_s2 + $0x8] sm:$0xff]   ;;  %v1952_v31 = vld [vmem:[%s2330_s2 + $0x20] sm:$0xff]  }
  0x1d   : > { %1779 = vmatprep.subr.bf16.mxu1 %v1981_v1  ;;  %1781 = vmatprep.mubr.msk.bf16.mxu1 %vm1982_vm0, %v1981_v1  ;;  %v676_v2 = vor.u32 %v675_v58, %v672_v57  ;;  %v885_v4 = vrot.slane %v883_v59, 1  ;;  %v1646_v20 = vcombine.low %v2104_v35, %v2097_v33  ;;  %v1297_v32 = vld [vmem:[%s2048_s5] sm:$0x8]  ;;  %v2216_v33 = vld [vmem:[%s2048_s5 + $0x4] sm:$0xf]  ;;  %v1962_v58 = vld [vmem:[%s2330_s2 + $0x58] sm:$0xff]  }
  0x1e   : > { %1757 = vmatprep.mubr.msk.bf16.mxu0 %vm1982_vm0, %v1981_v1  ;;  %v1094_v15 = vshrl.u32 %v2170_v11, 16  ;;  %v1097_v16 = vshll.u32 %v2170_v11, 16  ;;  %v1102_v17 = vshrl.u32 %v1663_v12, 16  ;;  %v1105_v18 = vshll.u32 %v1663_v12, 16  ;;  %v1002_v39 = vld [vmem:[%s2048_s5] sm:$0xe] }
  0x1f   : > { %1756 = vmatpush3.bf16.msra.mxu0 %v1925_v22  ;;  %v677_v8 = vsel %vm660_vm3, %v668_v0, %v676_v2  ;;  %v886_v10 = vor.u32 %v885_v4, %v881_v3  ;;  %v2233_v40 = vcombine.low %v1297_v32, %v2216_v33  ;;  %v1658_v44 = vcombine.low %v1002_v39, %v2122_v43  ;;  %v1960_v43 = vld [vmem:[%s2330_s2 + $0x50] sm:$0xff]   ;;  %v1963_v59 = vld [vmem:[%s2330_s2 + $0x78] sm:$0xff]   ;;  %v1971_v0 = vld [vmem:[%s2048_s5 + $0x8] ss:$0 sps:$4 sm:$0x11]  }
  0x20   : > { %1780 = vmatpush3.bf16.msra.mxu1 %v1924_v21  ;;  %1761 = vmatprep.subr.bf16.mxu0 %v1981_v1  ;;  %v1949_v21 = vld [vmem:[%s2330_s2 + $0x40] sm:$0xff]   ;;  %v1096_v22 = vrot.slane %v1094_v15, 3  ;;  %v1099_v23 = vrot.slane %v1097_v16, 4  ;;  %v1107_v25 = vrot.slane %v1105_v18, 4  ;;  %v1169_v45 = vrot.slane %v2170_v11, 3  ;;  %v1969_v4 = vld [vmem:[%s2330_s2 + $0x68] sm:$0xff]  }
  0x21   : > { %1785 = vmatprep.subr.bf16.mxu1 %v1981_v1  ;;  %v1318_v47 = vshrl.u32 %v2233_v40, 16  ;;  %v1321_v48 = vshll.u32 %v2233_v40, 16  ;;  %v1010_v51 = vrot.slane %v1658_v44, 1  ;;  %v1968_v3 = vld [vmem:[%s2330_s2 + $0x80] sm:$0xff]   ;;  %v1393_v5 = vrot.slane %v2233_v40, 3 }
  0x23   : > { %1782 = vmatmul.mubr.msk.bf16.vlgmr.msra.gmra.mrb[4].mxu1 %vm252_vm1, %v1629_v24  ;;  %v1104_v24 = vrot.slane %v1102_v17, 3  ;;  %v1323_v55 = vrot.slane %v1321_v48, 4 }
  0x24   : > { %1786 = vmatpush3.bf16.msra.mxu1 %v1927_v27  ;;  %1789 = vmatprep.mubr.msk.bf16.mxu1 %vm1982_vm0, %v1981_v1  ;;  %v1654_v27 = vcombine.low %v2119_v42, %v865_v26  ;;  %v1957_v42 = vld [vmem:[%s2330_s2 + $0x38] sm:$0xff]  }
  0x25   : > { %1787 = vmatprep.subr.bf16.mxu1 %v1981_v1 }
  0x26   : > { %1758 = vmatmul.mubr.msk.bf16.vlgmr.msra.gmra.mrb[0].mxu0 %vm252_vm1, %v1617_v29  ;;  %v1100_v29 = vor.u32 %v1099_v23, %v1096_v22 }
  0x27   : > { %1762 = vmatpush3.bf16.msra.mxu0 %v1929_v28  ;;  %1765 = vmatprep.mubr.msk.bf16.mxu0 %vm1982_vm0, %v1981_v1  ;;  %v1951_v28 = vld [vmem:[%s2330_s2 + $0x48] sm:$0xff]  }
  0x28   : > { %1788 = vmatpush3.bf16.msra.mxu1 %v1930_v30  ;;  %1763 = vmatprep.subr.bf16.mxu0 %v1981_v1  ;;  %v1108_v30 = vor.u32 %v1107_v25, %v1104_v24 }
  0x29   : > { %1801 = vmatprep.subr.bf16.mxu1 %v1981_v1 }
  0x2a   : > { %v1109_v35 = vsel %vm660_vm3, %v1100_v29, %v1108_v30 }
  0x2b   : > { %1790 = vmatmul.mubr.msk.bf16.vlgmr.msra.gmra.mrb[8].mxu1 %vm252_vm1, %v575_v36  ;;  %1764 = vmatpush3.bf16.msra.mxu0 %v1933_v34  ;;  %v2219_v34 = vld [vmem:[%s2048_s5 + $0x8] sm:$0x3]  ;;  %v1955_v36 = vld [vmem:[%s2330_s2 + $0x30] sm:$0xff]  }
  0x2c   : > { %1802 = vmatpush3.bf16.msra.mxu1 %v1932_v37  ;;  %1793 = vmatprep.subr.bf16.mxu0 %v1981_v1  ;;  %v1959_v37 = vld [vmem:[%s2043_s28 + $0x8] ss:$0 sps:$4 sm:$0x11]   ;;  %v1676_v41 = vcombine.low %v2219_v34, %v2219_v34 }
  0x2d   : > { %1803 = vmatprep.subr.bf16.mxu1 %v1981_v1  ;;  %1805 = vmatprep.mubr.msk.bf16.mxu1 %vm1982_vm0, %v1981_v1  ;;  %v1170_v46 = vrot.slane %v1959_v37, 3 }
  0x2e   : > { %v1326_v49 = vshrl.u32 %v1676_v41, 16 }
  0x2f   : > { %v1171_v52 = vsel %vm737_vm2, %v1169_v45, %v1170_v46 }
  0x30   : > { %1804 = vmatpush3.bf16.msra.mxu1 %v1934_v50  ;;  %v1329_v50 = vshll.u32 %v1676_v41, 16  ;;  %v1328_v56 = vrot.slane %v1326_v49, 3 }
  0x31   : > { %1817 = vmatprep.subr.bf16.mxu1 %v1981_v1 }
  0x32   : > { %1766 = vmatmul.mubr.msk.bf16.vlgmr.msra.gmra.mrb[0].mxu0 %vm252_vm1, %v364_v53  ;;  %v1961_v53 = vld [vmem:[%s2330_s2 + $0x70] sm:$0xff]   ;;  %v1331_v57 = vrot.slane %v1329_v50, 4 }
  0x33   : > { %1794 = vmatpush3.bf16.msra.mxu0 %v1936_v54  ;;  %1806 = vmatmul.mubr.msk.bf16.vlgmr.msra.gmra.mrb[12].mxu1 %vm252_vm1, %v740_v60  ;;  %v1320_v54 = vrot.slane %v1318_v47, 3 }
  0x34   : > { %1818 = vmatpush3.bf16.msra.mxu1 %v1939_v61  ;;  %1795 = vmatprep.subr.bf16.mxu0 %v1981_v1  ;;  %v1332_v61 = vor.u32 %v1331_v57, %v1328_v56 }
  0x35   : > { %1819 = vmatprep.subr.bf16.mxu1 %v1981_v1  ;;  %1797 = vmatprep.mubr.msk.bf16.mxu0 %vm1982_vm0, %v1981_v1  ;;  %v1324_v60 = vor.u32 %v1323_v55, %v1320_v54 }
  0x36   : > { %1821 = vmatprep.mubr.msk.bf16.mxu1 %vm1982_vm0, %v1981_v1 }
  0x37   : > { %1796 = vmatpush3.bf16.msra.mxu0 %v1940_v62  ;;  %v1671_v62 = vcombine.low %v2154_v6, %v2158_v7  ;;  %v1333_v2 = vsel %vm660_vm3, %v1324_v60, %v1332_v61  ;;  %v1394_v6 = vrot.slane %v1971_v0, 3  ;;  %v1970_v7 = vld [vmem:[%s2330_s2 + $0x88] sm:$0xff]  }
  0x38   : > { %1820 = vmatpush3.bf16.msra.mxu1 %v1941_v63  ;;  %1809 = vmatprep.subr.bf16.mxu0 %v1981_v1  ;;  %v1967_v63 = vld [vmem:[%s2330_s2 + $0x60] sm:$0xff]  }
  0x39   : > { %1825 = vmatprep.subr.bf16.mxu1 %v1981_v1 }
  0x3a   : > { %1798 = vmatmul.mubr.msk.bf16.vlgmr.msra.gmra.mrb[4].mxu0 %vm252_vm1, %v677_v8  ;;  %v1395_v8 = vsel %vm737_vm2, %v1393_v5, %v1394_v6 }
  0x3b   : > { %1810 = vmatpush3.bf16.msra.mxu0 %v1943_v9  ;;  %1822 = vmatmul.mubr.msk.bf16.vlgmr.msra.gmra.mrb[16].mxu1 %vm252_vm1, %v886_v10  ;;  %v1684_v9 = vcombine.low %v2216_v33, %v2219_v34 }
  0x3c   : > { %1826 = vmatpush3.bf16.msra.mxu1 %v1945_v13  ;;  %1811 = vmatprep.subr.bf16.mxu0 %v1981_v1 }
  0x3d   : > { %1813 = vmatprep.mubr.msk.bf16.mxu0 %vm1982_vm0, %v1981_v1  ;;  %1827 = vmatprep.subr.bf16.mxu1 %v1981_v1 }
  0x3e   : > { %1829 = vmatprep.mubr.msk.bf16.mxu1 %vm1982_vm0, %v1981_v1 }
  0x3f   : > { %1812 = vmatpush3.bf16.msra.mxu0 %v1946_v14 }
  0x40   : > { %1841 = vmatprep.subr.bf16.mxu0 %v1981_v1  ;;  %1828 = vmatpush3.bf16.msra.mxu1 %v1948_v19 }
  0x41   : > { %1833 = vmatprep.subr.bf16.mxu1 %v1981_v1 }
  0x42   : > { %1814 = vmatmul.mubr.msk.bf16.vlgmr.msra.gmra.mrb[8].mxu0 %vm252_vm1, %v1646_v20 }
  0x43   : > { %1842 = vmatpush3.bf16.msra.mxu0 %v1949_v21  ;;  %1845 = vmatprep.mubr.msk.bf16.mxu0 %vm1982_vm0, %v1981_v1 }
  0x44   : > { %1843 = vmatprep.subr.bf16.mxu0 %v1981_v1 }
  0x47   : > { %1830 = vmatmul.mubr.msk.bf16.vlgmr.msra.gmra.mrb[16].mxu1 %vm252_vm1, %v1654_v27  ;;  %1844 = vmatpush3.bf16.msra.mxu0 %v1951_v28 }
  0x48   : > { %1834 = vmatpush3.bf16.msra.mxu1 %v1952_v31  ;;  %1849 = vmatprep.subr.bf16.mxu0 %v1981_v1 }
  0x49   : > { %1835 = vmatprep.subr.bf16.mxu1 %v1981_v1  ;;  %1837 = vmatprep.mubr.msk.bf16.mxu1 %vm1982_vm0, %v1981_v1 }
  0x4a   : > { %1846 = vmatmul.mubr.msk.bf16.vlgmr.msra.gmra.mrb[12].mxu0 %vm252_vm1, %v1109_v35 }
  0x4b   : > { %1850 = vmatpush3.bf16.msra.mxu0 %v1955_v36  ;;  %1853 = vmatprep.mubr.msk.bf16.mxu0 %vm1982_vm0, %v1981_v1 }
  0x4c   : > { %1851 = vmatprep.subr.bf16.mxu0 %v1981_v1  ;;  %1836 = vmatpush3.bf16.msra.mxu1 %v1956_v38 }
  0x4d   : > { %1865 = vmatprep.subr.bf16.mxu1 %v1981_v1 }
  0x4f   : > { %1852 = vmatpush3.bf16.msra.mxu0 %v1957_v42 }
  0x50   : > { %1857 = vmatprep.subr.bf16.mxu0 %v1981_v1 }
  0x52   : > { %1854 = vmatmul.mubr.msk.bf16.vlgmr.msra.gmra.mrb[16].mxu0 %vm252_vm1, %v1171_v52 }
  0x53   : > { %1838 = vmatmul.mubr.msk.bf16.vlgmr.msra.gmra.mrb[16].mxu1 %vm252_vm1, %v1010_v51  ;;  %1858 = vmatpush3.bf16.msra.mxu0 %v1960_v43 }
  0x54   : > { %1866 = vmatpush3.bf16.msra.mxu1 %v1961_v53  ;;  %1859 = vmatprep.subr.bf16.mxu0 %v1981_v1 }
  0x55   : > { %1867 = vmatprep.subr.bf16.mxu1 %v1981_v1  ;;  %1861 = vmatprep.mubr.msk.bf16.mxu0 %vm1982_vm0, %v1981_v1 }
  0x56   : > { %1869 = vmatprep.mubr.msk.bf16.mxu1 %vm1982_vm0, %v1981_v1 }
  0x57   : > { %1860 = vmatpush3.bf16.msra.mxu0 %v1962_v58 }
  0x58   : > { %1868 = vmatpush3.bf16.msra.mxu1 %v1963_v59  ;;  %1873 = vmatprep.subr.bf16.mxu0 %v1981_v1 }
  0x59   : > { %1881 = vmatprep.subr.bf16.mxu1 %v1981_v1 }
  0x5a   : > { %1862 = vmatmul.mubr.msk.bf16.vlgmr.msra.gmra.mrb[20].mxu0 %vm252_vm1, %v1671_v62 }
  0x5b   : > { %1870 = vmatmul.mubr.msk.bf16.vlgmr.msra.gmra.mrb[20].mxu1 %vm252_vm1, %v1333_v2  ;;  %1874 = vmatpush3.bf16.msra.mxu0 %v1967_v63 }
  0x5c   : > { %1882 = vmatpush3.bf16.msra.mxu1 %v1968_v3  ;;  %1875 = vmatprep.subr.bf16.mxu0 %v1981_v1 }
  0x5d   : > { %1883 = vmatprep.subr.bf16.mxu1 %v1981_v1  ;;  %1877 = vmatprep.mubr.msk.bf16.mxu0 %vm1982_vm0, %v1981_v1 }
  0x5e   : > { %1885 = vmatprep.mubr.msk.bf16.mxu1 %vm1982_vm0, %v1981_v1 }
  0x5f   : > { %1876 = vmatpush3.bf16.msra.mxu0 %v1969_v4 }
  0x60   : > { %1884 = vmatpush3.bf16.msra.mxu1 %v1970_v7 }
  0x62   : > { %1878 = vmatmul.mubr.msk.bf16.vlgmr.msra.gmra.mrb[24].mxu0 %vm252_vm1, %v1395_v8 }
  0x63   : > { %1886 = vmatmul.mubr.msk.bf16.vlgmr.msra.gmra.mrb[24].mxu1 %vm252_vm1, %v1684_v9 }
  0xee   : > { %v501_v10 = vpop.f32.mrb[0].mxu1 }
  0xef   : > { %v1775_v11 = vpop.f32.mrb[1].mxu1 }
  0xf0   : > { %v504_v12 = vpop.f32.mrb[2].mxu1 }
  0xf1   : > { %v1776_v13 = vpop.f32.mrb[3].mxu1 }
  0xf6   : > { %v560_v14 = vpop.f32.mrb[4].mxu1 }
  0xf7   : > { %v561_v15 = vadd.f32 %v560_v14, %v501_v10  ;;  %v1783_v16 = vpop.f32.mrb[5].mxu1 }
  0xf8   : > { %v563_v17 = vpop.f32.mrb[6].mxu1 }
  0xf9   : > { %v564_v1 = vadd.f32 %v563_v17, %v504_v12  ;;  %v1784_v18 = vpop.f32.mrb[7].mxu1 }
  0xfe   : > { %v625_v19 = vpop.f32.mrb[8].mxu1 }
  0xff   : > { %v632_v20 = vadd.f32 %v625_v19, %v561_v15  ;;  %v1791_v21 = vpop.f32.mrb[9].mxu1 }
 0x100   : > { %v628_v22 = vpop.f32.mrb[10].mxu1 }
 0x101   : > { %v633_v23 = vadd.f32 %v628_v22, %v564_v1  ;;  %v1792_v24 = vpop.f32.mrb[11].mxu1 }
 0x105   : > { %v414_v25 = vpop.f32.mrb[0].mxu0 }
 0x106   : > { %424 = vst.msk [vmem:[#allocation2] sm:$0xff] %vm423_vm4, %v414_v25  ;;  %v790_v26 = vpop.f32.mrb[12].mxu1  ;;  %v1767_v27 = vpop.f32.mrb[1].mxu0 }
 0x107   : > { %v1807_v28 = vpop.f32.mrb[13].mxu1  ;;  %v417_v29 = vpop.f32.mrb[2].mxu0 }
 0x108   : > { %426 = vst.msk [vmem:[#allocation2 + $0x8] sm:$0xf] %vm425_vm5, %v417_v29  ;;  %v793_v30 = vpop.f32.mrb[14].mxu1  ;;  %v1768_v31 = vpop.f32.mrb[3].mxu0 }
 0x109   : > { %v1808_v32 = vpop.f32.mrb[15].mxu1 }
 0x10d   : > { %v427_v33 = vld [vmem:[#allocation2] sm:$0xff]  ;;  %v727_v34 = vpop.f32.mrb[4].mxu0 }
 0x10e   : > { %v634_v35 = vadd.f32 %v632_v20, %v427_v33  ;;  %v791_v36 = vadd.f32 %v790_v26, %v727_v34  ;;  %v1799_v37 = vpop.f32.mrb[5].mxu0 }
 0x10f   : > { %v428_v38 = vld [vmem:[#allocation2 + $0x8] sm:$0xf]  ;;  %v730_v39 = vpop.f32.mrb[6].mxu0 }
 0x110   : > { %636 = vst.msk [vmem:[#allocation2] sm:$0xff] %vm423_vm4, %v634_v35  ;;  %v635_v40 = vadd.f32 %v633_v23, %v428_v38  ;;  %v794_v41 = vadd.f32 %v793_v30, %v730_v39  ;;  %v1800_v42 = vpop.f32.mrb[7].mxu0  ;;  %v1688_v39 = vld [vmem:[%s2331_s3] ss:$0 sm:$0xff] }
 0x112   : > { %637 = vst.msk [vmem:[#allocation2 + $0x8] sm:$0xf] %vm425_vm5, %v635_v40 }
 0x115   : > { %v851_v44 = vpop.f32.mrb[8].mxu0 }
 0x116   : > { %v858_v45 = vadd.f32 %v851_v44, %v791_v36  ;;  %v1815_v46 = vpop.f32.mrb[9].mxu0 }
 0x117   : > { %v638_v47 = vld [vmem:[#allocation2] sm:$0xff]  ;;  %v854_v48 = vpop.f32.mrb[10].mxu0 }
 0x118   : > { %v860_v49 = vadd.f32 %v858_v45, %v638_v47  ;;  %v859_v50 = vadd.f32 %v854_v48, %v794_v41  ;;  %v1816_v51 = vpop.f32.mrb[11].mxu0 }
 0x119   : > { %v639_v52 = vld [vmem:[#allocation2 + $0x8] sm:$0xf] }
 0x11a   : > { %862 = vst.msk [vmem:[#allocation2] sm:$0xff] %vm423_vm4, %v860_v49  ;;  %v861_v43 = vadd.f32 %v859_v50, %v639_v52 }
 0x11c   : > { %863 = vst.msk [vmem:[#allocation2 + $0x8] sm:$0xf] %vm425_vm5, %v861_v43 }
 0x11d   : > { %v1159_v53 = vpop.f32.mrb[12].mxu0 }
 0x11e   : > { %v1847_v54 = vpop.f32.mrb[13].mxu0 }
 0x11f   : > { %v1162_v55 = vpop.f32.mrb[14].mxu0 }
 0x120   : > { %v1848_v56 = vpop.f32.mrb[15].mxu0 }
 0x123   : > { %v1519_v33 = vld [vmem:[#allocation2] ss:$2 sm:$0x3f]  ;;  %v1521_v34 = vld [vmem:[#allocation2 + $0x1] ss:$2 sm:$0x3f] }
 0x124   : > { %v1522_v37 = vmax.f32 %v1519_v33, %v1521_v34 }
 0x125   : > { %v1221_v57 = vpop.f32.mrb[16].mxu0 }
 0x126   : > { %v1060_v58 = vpop.f32.mrb[16].mxu1  ;;  %v1222_v59 = vadd.f32 %v1221_v57, %v1159_v53  ;;  %v1855_v60 = vpop.f32.mrb[17].mxu0 }
 0x127   : > { %1069 = vst.msk [vmem:[#allocation3] sm:$0xff] %vm423_vm4, %v1060_v58  ;;  %v1839_v61 = vpop.f32.mrb[17].mxu1  ;;  %v1224_v62 = vpop.f32.mrb[18].mxu0 }
 0x128   : > { %v1063_v63 = vpop.f32.mrb[18].mxu1  ;;  %v1225_v0 = vadd.f32 %v1224_v62, %v1162_v55  ;;  %v1856_v2 = vpop.f32.mrb[19].mxu0 }
 0x129   : > { %1070 = vst.msk [vmem:[#allocation3 + $0x8] sm:$0xf] %vm425_vm5, %v1063_v63  ;;  %v1840_v3 = vpop.f32.mrb[19].mxu1 }
 0x12d   : > { %v1282_v4 = vpop.f32.mrb[20].mxu0 }
 0x12e   : > { %v1289_v5 = vadd.f32 %v1282_v4, %v1222_v59  ;;  %v1383_v6 = vpop.f32.mrb[20].mxu1  ;;  %v1863_v7 = vpop.f32.mrb[21].mxu0  ;;  %v1071_v8 = vld [vmem:[#allocation3] sm:$0xff] }
 0x12f   : > { %v1871_v9 = vpop.f32.mrb[21].mxu1  ;;  %v1285_v10 = vpop.f32.mrb[22].mxu0 }
 0x130   : > { %v1291_v11 = vadd.f32 %v1289_v5, %v1071_v8  ;;  %v1290_v12 = vadd.f32 %v1285_v10, %v1225_v0  ;;  %v1386_v13 = vpop.f32.mrb[22].mxu1  ;;  %v1864_v14 = vpop.f32.mrb[23].mxu0  ;;  %v1072_v15 = vld [vmem:[#allocation3 + $0x8] sm:$0xf] }
 0x131   : > { %v1872_v16 = vpop.f32.mrb[23].mxu1 }
 0x132   : > { %1293 = vst.msk [vmem:[#allocation3] sm:$0xff] %vm423_vm4, %v1291_v11  ;;  %v1292_v17 = vadd.f32 %v1290_v12, %v1072_v15 }
 0x134   : > { %1294 = vst.msk [vmem:[#allocation3 + $0x8] sm:$0xf] %vm425_vm5, %v1292_v17 }
 0x135   : > { %v1445_v1 = vpop.f32.mrb[24].mxu0 }
 0x136   : > { %v1446_v18 = vadd.f32 %v1445_v1, %v1383_v6  ;;  %v1506_v19 = vpop.f32.mrb[24].mxu1  ;;  %v1879_v20 = vpop.f32.mrb[25].mxu0 }
 0x137   : > { %v1887_v21 = vpop.f32.mrb[25].mxu1  ;;  %v1448_v22 = vpop.f32.mrb[26].mxu0 }
 0x138   : > { %v1513_v23 = vadd.f32 %v1506_v19, %v1446_v18  ;;  %v1449_v24 = vadd.f32 %v1448_v22, %v1386_v13  ;;  %v1509_v25 = vpop.f32.mrb[26].mxu1  ;;  %v1880_v26 = vpop.f32.mrb[27].mxu0 }
 0x139   : > { %v1295_v27 = vld [vmem:[#allocation3] sm:$0xff]  ;;  %v1888_v28 = vpop.f32.mrb[27].mxu1 }
 0x13a   : > { %v1515_v29 = vadd.f32 %v1513_v23, %v1295_v27  ;;  %v1514_v30 = vadd.f32 %v1509_v25, %v1449_v24 }
 0x13b   : > { %v1296_v31 = vld [vmem:[#allocation3 + $0x8] sm:$0xf] }
 0x13c   : > { %1517 = vst.msk [vmem:[#allocation3] sm:$0xff] %vm423_vm4, %v1515_v29  ;;  %v1516_v32 = vadd.f32 %v1514_v30, %v1296_v31 }
 0x13e   : > { %1518 = vst.msk [vmem:[#allocation3 + $0x8] sm:$0xf] %vm425_vm5, %v1516_v32 }
 0x145   : > { %v1523_v35 = vld [vmem:[#allocation3] ss:$2 sm:$0x3f]  ;;  %v1525_v36 = vld [vmem:[#allocation3 + $0x1] ss:$2 sm:$0x3f] }
 0x146   : > { %v1526_v38 = vmax.f32 %v1523_v35, %v1525_v36 }
 0x148   : > { %v1527_v40 = vmax.f32 %v1522_v37, %v1526_v38 }
 0x14a   : > { %v1535_v41 = vadd.f32 %v1688_v39, %v1527_v40 }
 0x14c   : > { %v1536_v42 = vmax.f32 %v1535_v41, 0.0 }
 0x14e   : > { %v1537_v44 = vpack.c.bf16 %v1536_v42, %v1536_v42 }
 0x150   : > { %1539 = vst.msk [vmem:[%s215_s7] sm:$0x7] %vm1538_vm6, %v1537_v44 }
 0x151 PF: > { %s14_s15 = sadd.s32 1, %s1979_s15  }
 0x152   : > { %p11_p4 = scmp.ge.s32.totalorder %s14_s15, 4  }
 0x154   :  { %13 = sbr.rel (!%p11_p4) target bundleno = 1 (0x1), region = 71 }

</bundles_post_ra>
